<compile_context>
chip_gen: v6e
topology: v6e:2x2x1
jax: 0.10.0
libtpu: 0.0.40
codegen_flags: <defaults>
</compile_context>

<pallas_src>
import jax
import jax.numpy as jnp
from jax.experimental import pallas as pl
from jax.experimental.pallas import tpu as pltpu

# ----------------------------- model dims -----------------------------------
NTOKEN   = 50
EMSIZE   = 32          # emsize == nunits so stacked-layer weights are uniform
NUNITS   = 32
NREDUCED = 16
NLAYERS  = 2
NCLASS   = 3
SEQ      = 8
BSZ      = 2


# ======================= single fused forward kernel ========================
def _bi_ran_kernel(inp_ref, encproj_ref,
                   c01_ref, wh1_ref, wx1_ref, bb1_ref,
                   c02_ref, wh2_ref, wx2_ref, bb2_ref,
                   wred_ref, bred_ref, wd_ref, bd_ref,
                   res_ref, h1_ref, h2_ref,
                   o_scr):
    ntoken = encproj_ref.shape[0]
    L, B, H = c01_ref.shape
    SB = inp_ref.shape[0]
    S = SB // B
    H3 = 3 * H

    # ---- fused embedding lookup + layer-0 gate input projections (both dirs) ----
    # one-hot (S*B, ntoken) @ (ntoken, 6H); the encoder table was folded through the
    # layer-0 gate weights in the wrapper, so the per-step layer-0 x-matmuls and the
    # separate embedding matmul are all off the recurrence critical path.
    ids = inp_ref[...]                                                # (S*B, 1) int32
    tok = jax.lax.broadcasted_iota(jnp.int32, (SB, ntoken), 1)        # (S*B, ntoken)
    onehot = (tok == ids).astype(jnp.float32)
    zx0 = jnp.dot(onehot, encproj_ref[...],
                  preferred_element_type=jnp.float32)                 # (S*B, 6H)

    # ---- recurrent state: carry BOTH c and h = tanh(c), seeded once -------------
    c1 = [c01_ref[l] for l in range(L)]
    c2 = [c02_ref[l] for l in range(L)]
    h1 = [jnp.tanh(c) for c in c1]
    h2 = [jnp.tanh(c) for c in c2]

    def ran_step(zx_in, c, h, wh_ref, wx_ref, bb_ref):
        # Per layer: z = x-proj + h_{t-1} @ Wh_blk + b_blk   (gates = [ctil | i | f]).
        # Layer 0's x-proj is precomputed (zx_in); layers >= 1 use two independent
        # small matmuls instead of a lane-concat + one wide matmul.
        x = None
        for l in range(L):
            zh = jnp.dot(h[l], wh_ref[l], preferred_element_type=jnp.float32)
            if l == 0:
                z = zx_in + zh + bb_ref[0]
            else:
                z = (jnp.dot(x, wx_ref[l], preferred_element_type=jnp.float32)
                     + zh + bb_ref[l])
            ctil = z[:, 0:H]
            i_g = jax.nn.sigmoid(z[:, H:2 * H])
            f_g = jax.nn.sigmoid(z[:, 2 * H:3 * H])
            c_new = i_g * ctil + f_g * c[l]
            h_new = jnp.tanh(c_new)                 # computed once, reused next step
            c[l] = c_new
            h[l] = h_new
            x = h_new                               # input to next stacked layer
        return x

    # TODO(synk): on v7x the two independent directions could be split across the two
    # TensorCores (pl.core_map / CORE_PARALLEL); kept single-core for v5e/v6e portability.
    for t in range(S):
        zf = zx0[t * B:(t + 1) * B, 0:H3]                  # forward dir sees token t
        zb = zx0[(S - 1 - t) * B:(S - t) * B, H3:2 * H3]   # backward dir sees token S-1-t
        of = ran_step(zf, c1, h1, wh1_ref, wx1_ref, bb1_ref)
        ob = ran_step(zb, c2, h2, wh2_ref, wx2_ref, bb2_ref)
        # keep both direction outputs VMEM-resident; backward stored time-aligned,
        # so the later fused add equals red1 + reverse(red2).
        o_scr[t * B:(t + 1) * B, 0:H] = of
        o_scr[(S - 1 - t) * B:(S - t) * B, H:2 * H] = ob

    # ---- head: stacked reducers + decoder + softmax on one (S*B, 2H) slab --------
    o = o_scr[...]                                                    # (S*B, 2H)
    red = jnp.dot(o, wred_ref[...], preferred_element_type=jnp.float32) + bred_ref[...]
    dec = jnp.dot(red, wd_ref[...], preferred_element_type=jnp.float32) + bd_ref[...]
    m = jnp.max(dec, axis=-1, keepdims=True)
    e = jnp.exp(dec - m)
    inv = pl.reciprocal(jnp.sum(e, axis=-1, keepdims=True), approx=True)
    res_ref[...] = (e * inv).astype(res_ref.dtype)

    for l in range(L):
        h1_ref[l] = c1[l].astype(h1_ref.dtype)
        h2_ref[l] = c2[l].astype(h2_ref.dtype)


# ------------------------ parameter packing helpers -------------------------
def _pack_dir(p):
    """Pack per-layer gate matrices:
       Wx_blk (L,E,3H) = [Wcx|Wic|Wfc], Wh_blk (L,H,3H) = [0|Wih|Wfh],
       b_blk (L,1,3H) = [0|bi|bf]  (ctil gets no h-term and no bias)."""
    wx = jnp.concatenate([p["wcx"], p["wic"], p["wfc"]], axis=-1)
    wh = jnp.concatenate([jnp.zeros_like(p["wih"]), p["wih"], p["wfh"]], axis=-1)
    bb = jnp.concatenate([jnp.zeros_like(p["bi"]), p["bi"], p["bf"]], axis=-1)
    return wx, wh, bb


@jax.jit
def bi_ran_forward(params, inp, hidden1, hidden2):
    """inp: (S,B) int32 token ids; hidden*: (L,B,H) f32.  Returns (result, h1, h2)."""
    S, B = inp.shape
    L, _, H = hidden1.shape
    C = params["wd"].shape[1]

    wx1, wh1, bb1 = _pack_dir(params["rnn1"])
    wx2, wh2, bb2 = _pack_dir(params["rnn2"])
    # Fold the encoder table through BOTH directions' layer-0 x-projections:
    # (ntoken, E) @ (E, 6H) -> one in-kernel (S*B, ntoken) @ (ntoken, 6H) matmul.
    enc_proj = jnp.dot(params["encoder"],
                       jnp.concatenate([wx1[0], wx2[0]], axis=-1),
                       preferred_element_type=jnp.float32)            # (ntoken, 6H)
    wred = jnp.concatenate([params["wr1"], params["wr2"]], axis=0)    # (2H, R)
    bred = params["br1"] + params["br2"]                              # (1, R)

    inp_flat = inp.reshape(S * B, 1).astype(jnp.int32)

    def vmem():
        return pl.BlockSpec(memory_space=pltpu.MemorySpace.VMEM)

    res_flat, h1, h2 = pl.pallas_call(
        _bi_ran_kernel,
        out_shape=(jax.ShapeDtypeStruct((S * B, C), jnp.float32),
                   jax.ShapeDtypeStruct((L, B, H), jnp.float32),
                   jax.ShapeDtypeStruct((L, B, H), jnp.float32)),
        in_specs=[vmem() for _ in range(14)],
        out_specs=(vmem(), vmem(), vmem()),
        scratch_shapes=[pltpu.VMEM((S * B, 2 * H), jnp.float32)],
    )(inp_flat, enc_proj, hidden1, wh1, wx1, bb1,
      hidden2, wh2, wx2, bb2, wred, bred, params["wd"], params["bd"])

    return res_flat.reshape(S, B, C), h1, h2


# ============================== parameter init ===============================
def _xavier(key, shape):
    fan_in, fan_out = shape[-2], shape[-1]
    lim = jnp.sqrt(6.0 / (fan_in + fan_out))
    return jax.random.uniform(key, shape, jnp.float32, -lim, lim)


def _bias(key, shape):
    # Non-zero biases so the bias-packing paths are exercised by the allclose check.
    return jax.random.uniform(key, shape, jnp.float32, -0.1, 0.1)


def init_params(key):
    ks = iter(jax.random.split(key, 40))
    L, E, H, R, C = NLAYERS, EMSIZE, NUNITS, NREDUCED, NCLASS

    def ran_params():
        return dict(
            wcx=_xavier(next(ks), (L, E, H)),
            wic=_xavier(next(ks), (L, E, H)),
            wih=_xavier(next(ks), (L, H, H)),
            bi=_bias(next(ks), (L, 1, H)),
            wfc=_xavier(next(ks), (L, E, H)),
            wfh=_xavier(next(ks), (L, H, H)),
            bf=_bias(next(ks), (L, 1, H)),
        )

    return dict(
        encoder=_xavier(next(ks), (NTOKEN, E)),        # init.xavier_uniform
        rnn1=ran_params(),
        rnn2=ran_params(),
        wr1=_xavier(next(ks), (H, R)), br1=_bias(next(ks), (1, R)),
        wr2=_xavier(next(ks), (H, R)), br2=_bias(next(ks), (1, R)),
        wd=_xavier(next(ks), (R, C)),  bd=_bias(next(ks), (1, C)),
    )


# ============================ pure-JAX reference =============================
def _ran_ref(emb, c0, p):
    S = emb.shape[0]
    L = c0.shape[0]
    c = c0
    outs = []
    for t in range(S):
        x = emb[t]
        cs = []
        for l in range(L):
            h_prev = jnp.tanh(c[l])
            ctil = x @ p["wcx"][l]
            i_g = jax.nn.sigmoid(x @ p["wic"][l] + h_prev @ p["wih"][l] + p["bi"][l])
            f_g = jax.nn.sigmoid(x @ p["wfc"][l] + h_prev @ p["wfh"][l] + p["bf"][l])
            c_new = i_g * ctil + f_g * c[l]
            cs.append(c_new)
            x = jnp.tanh(c_new)
        c = jnp.stack(cs)
        outs.append(x)
    return jnp.stack(outs), c


def _forward_ref(params, inp, h1, h2):
    emb1 = params["encoder"][inp]
    emb2 = params["encoder"][inp[::-1]]
    o1, h1n = _ran_ref(emb1, h1, params["rnn1"])
    o2, h2n = _ran_ref(emb2, h2, params["rnn2"])
    red1 = o1 @ params["wr1"] + params["br1"]
    red2 = o2 @ params["wr2"] + params["br2"]
    red = red1 + red2[::-1]
    dec = red @ params["wd"] + params["bd"]
    return jax.nn.softmax(dec, axis=-1), h1n, h2n


# ==================================== main ===================================
if __name__ == "__main__":
    key = jax.random.PRNGKey(0)
    pkey, ikey = jax.random.split(key)
    params = init_params(pkey)

    inp = jax.random.randint(ikey, (SEQ, BSZ), 0, NTOKEN, dtype=jnp.int32)
    hidden1 = jnp.zeros((NLAYERS, BSZ, NUNITS), jnp.float32)
    hidden2 = jnp.zeros((NLAYERS, BSZ, NUNITS), jnp.float32)

    result, h1, h2 = bi_ran_forward(params, inp, hidden1, hidden2)
    jax.block_until_ready((result, h1, h2))

    ref_result, ref_h1, ref_h2 = _forward_ref(params, inp, hidden1, hidden2)
    assert result.shape == (SEQ, BSZ, NCLASS)
    assert h1.shape == (NLAYERS, BSZ, NUNITS) and h2.shape == (NLAYERS, BSZ, NUNITS)
    assert jnp.allclose(result, ref_result, atol=2e-3, rtol=2e-3)
    assert jnp.allclose(h1, ref_h1, atol=2e-3, rtol=2e-3)
    assert jnp.allclose(h2, ref_h2, atol=2e-3, rtol=2e-3)

    print("KERNEL_OK")
</pallas_src>

<mosaic_0001>
module attributes {stable_mosaic.version = 11 : i64} {
  func.func @_bi_ran_kernel(%arg0: memref<16x1xi32, #tpu.memory_space<vmem>>, %arg1: memref<50x192xf32, #tpu.memory_space<vmem>>, %arg2: memref<2x2x32xf32, #tpu.memory_space<vmem>>, %arg3: memref<2x32x96xf32, #tpu.memory_space<vmem>>, %arg4: memref<2x32x96xf32, #tpu.memory_space<vmem>>, %arg5: memref<2x1x96xf32, #tpu.memory_space<vmem>>, %arg6: memref<2x2x32xf32, #tpu.memory_space<vmem>>, %arg7: memref<2x32x96xf32, #tpu.memory_space<vmem>>, %arg8: memref<2x32x96xf32, #tpu.memory_space<vmem>>, %arg9: memref<2x1x96xf32, #tpu.memory_space<vmem>>, %arg10: memref<64x16xf32, #tpu.memory_space<vmem>>, %arg11: memref<1x16xf32, #tpu.memory_space<vmem>>, %arg12: memref<16x3xf32, #tpu.memory_space<vmem>>, %arg13: memref<1x3xf32, #tpu.memory_space<vmem>>, %arg14: memref<16x3xf32, #tpu.memory_space<vmem>>, %arg15: memref<2x2x32xf32, #tpu.memory_space<vmem>>, %arg16: memref<2x2x32xf32, #tpu.memory_space<vmem>>, %arg17: memref<16x64xf32, #tpu.memory_space<vmem>>) attributes {dimension_semantics = [], scalar_prefetch = 0 : i64, scratch_operands = 1 : i64, tpu.core_type = #tpu.core_type<tc>} {
    %c0 = arith.constant 0 : index
    %c0_0 = arith.constant 0 : index
    %0 = vector.load %arg0[%c0, %c0_0] : memref<16x1xi32, #tpu.memory_space<vmem>>, vector<16x1xi32>
    %1 = tpu.iota {dimensions = array<i32: 1>} : vector<16x50xi32>
    %2 = vector.broadcast %0 : vector<16x1xi32> to vector<16x50xi32>
    %3 = arith.cmpi eq, %1, %2 : vector<16x50xi32>
    %4 = arith.extui %3 : vector<16x50xi1> to vector<16x50xi32>
    %5 = arith.sitofp %4 : vector<16x50xi32> to vector<16x50xf32>
    %c0_1 = arith.constant 0 : index
    %c0_2 = arith.constant 0 : index
    %6 = vector.load %arg1[%c0_1, %c0_2] : memref<50x192xf32, #tpu.memory_space<vmem>>, vector<50x192xf32>
    %cst = arith.constant dense<0.000000e+00> : vector<16x192xf32>
    %7 = tpu.matmul %5, %6, %cst {dimension_numbers = #tpu.dot_dimension_numbers<[1], [0], [0], [1], [0, 0, 1, 1], [], []>} : vector<16x50xf32>, vector<50x192xf32>, vector<16x192xf32> -> vector<16x192xf32>
    %c0_3 = arith.constant 0 : index
    %c0_4 = arith.constant 0 : index
    %c0_5 = arith.constant 0 : index
    %8 = vector.load %arg2[%c0_3, %c0_4, %c0_5] : memref<2x2x32xf32, #tpu.memory_space<vmem>>, vector<1x2x32xf32>
    %9 = vector.shape_cast %8 : vector<1x2x32xf32> to vector<2x32xf32>
    %c1 = arith.constant 1 : index
    %c0_6 = arith.constant 0 : index
    %c0_7 = arith.constant 0 : index
    %10 = vector.load %arg2[%c1, %c0_6, %c0_7] : memref<2x2x32xf32, #tpu.memory_space<vmem>>, vector<1x2x32xf32>
    %11 = vector.shape_cast %10 : vector<1x2x32xf32> to vector<2x32xf32>
    %c0_8 = arith.constant 0 : index
    %c0_9 = arith.constant 0 : index
    %c0_10 = arith.constant 0 : index
    %12 = vector.load %arg6[%c0_8, %c0_9, %c0_10] : memref<2x2x32xf32, #tpu.memory_space<vmem>>, vector<1x2x32xf32>
    %13 = vector.shape_cast %12 : vector<1x2x32xf32> to vector<2x32xf32>
    %c1_11 = arith.constant 1 : index
    %c0_12 = arith.constant 0 : index
    %c0_13 = arith.constant 0 : index
    %14 = vector.load %arg6[%c1_11, %c0_12, %c0_13] : memref<2x2x32xf32, #tpu.memory_space<vmem>>, vector<1x2x32xf32>
    %15 = vector.shape_cast %14 : vector<1x2x32xf32> to vector<2x32xf32>
    %16 = math.tanh %9 : vector<2x32xf32>
    %17 = math.tanh %11 : vector<2x32xf32>
    %18 = math.tanh %13 : vector<2x32xf32>
    %19 = math.tanh %15 : vector<2x32xf32>
    %20 = vector.extract_strided_slice %7 {offsets = [0, 0], sizes = [2, 96], strides = [1, 1]} : vector<16x192xf32> to vector<2x96xf32>
    %21 = vector.extract_strided_slice %7 {offsets = [14, 96], sizes = [2, 96], strides = [1, 1]} : vector<16x192xf32> to vector<2x96xf32>
    %c0_14 = arith.constant 0 : index
    %c0_15 = arith.constant 0 : index
    %c0_16 = arith.constant 0 : index
    %22 = vector.load %arg3[%c0_14, %c0_15, %c0_16] : memref<2x32x96xf32, #tpu.memory_space<vmem>>, vector<1x32x96xf32>
    %23 = vector.shape_cast %22 : vector<1x32x96xf32> to vector<32x96xf32>
    %cst_17 = arith.constant dense<0.000000e+00> : vector<2x96xf32>
    %24 = tpu.matmul %16, %23, %cst_17 {dimension_numbers = #tpu.dot_dimension_numbers<[1], [0], [0], [1], [0, 0, 1, 1], [], []>} : vector<2x32xf32>, vector<32x96xf32>, vector<2x96xf32> -> vector<2x96xf32>
    %25 = arith.addf %20, %24 : vector<2x96xf32>
    %c0_18 = arith.constant 0 : index
    %c0_19 = arith.constant 0 : index
    %c0_20 = arith.constant 0 : index
    %26 = vector.load %arg5[%c0_18, %c0_19, %c0_20] : memref<2x1x96xf32, #tpu.memory_space<vmem>>, vector<1x1x96xf32>
    %27 = vector.shape_cast %26 : vector<1x1x96xf32> to vector<1x96xf32>
    %28 = vector.broadcast %27 : vector<1x96xf32> to vector<2x96xf32>
    %29 = arith.addf %25, %28 : vector<2x96xf32>
    %30 = vector.extract_strided_slice %29 {offsets = [0, 0], sizes = [2, 32], strides = [1, 1]} : vector<2x96xf32> to vector<2x32xf32>
    %31 = vector.extract_strided_slice %29 {offsets = [0, 32], sizes = [2, 32], strides = [1, 1]} : vector<2x96xf32> to vector<2x32xf32>
    %32 = arith.negf %31 : vector<2x32xf32>
    %33 = math.exp %32 : vector<2x32xf32>
    %cst_21 = arith.constant 1.000000e+00 : f32
    %34 = vector.broadcast %cst_21 : f32 to vector<2x32xf32>
    %35 = arith.addf %34, %33 : vector<2x32xf32>
    %36 = arith.divf %34, %35 : vector<2x32xf32>
    %37 = vector.extract_strided_slice %29 {offsets = [0, 64], sizes = [2, 32], strides = [1, 1]} : vector<2x96xf32> to vector<2x32xf32>
    %38 = arith.negf %37 : vector<2x32xf32>
    %39 = math.exp %38 : vector<2x32xf32>
    %cst_22 = arith.constant 1.000000e+00 : f32
    %40 = vector.broadcast %cst_22 : f32 to vector<2x32xf32>
    %41 = arith.addf %40, %39 : vector<2x32xf32>
    %42 = arith.divf %40, %41 : vector<2x32xf32>
    %43 = arith.mulf %36, %30 : vector<2x32xf32>
    %44 = arith.mulf %42, %9 : vector<2x32xf32>
    %45 = arith.addf %43, %44 : vector<2x32xf32>
    %46 = math.tanh %45 : vector<2x32xf32>
    %c1_23 = arith.constant 1 : index
    %c0_24 = arith.constant 0 : index
    %c0_25 = arith.constant 0 : index
    %47 = vector.load %arg3[%c1_23, %c0_24, %c0_25] : memref<2x32x96xf32, #tpu.memory_space<vmem>>, vector<1x32x96xf32>
    %48 = vector.shape_cast %47 : vector<1x32x96xf32> to vector<32x96xf32>
    %cst_26 = arith.constant dense<0.000000e+00> : vector<2x96xf32>
    %49 = tpu.matmul %17, %48, %cst_26 {dimension_numbers = #tpu.dot_dimension_numbers<[1], [0], [0], [1], [0, 0, 1, 1], [], []>} : vector<2x32xf32>, vector<32x96xf32>, vector<2x96xf32> -> vector<2x96xf32>
    %c1_27 = arith.constant 1 : index
    %c0_28 = arith.constant 0 : index
    %c0_29 = arith.constant 0 : index
    %50 = vector.load %arg4[%c1_27, %c0_28, %c0_29] : memref<2x32x96xf32, #tpu.memory_space<vmem>>, vector<1x32x96xf32>
    %51 = vector.shape_cast %50 : vector<1x32x96xf32> to vector<32x96xf32>
    %cst_30 = arith.constant dense<0.000000e+00> : vector<2x96xf32>
    %52 = tpu.matmul %46, %51, %cst_30 {dimension_numbers = #tpu.dot_dimension_numbers<[1], [0], [0], [1], [0, 0, 1, 1], [], []>} : vector<2x32xf32>, vector<32x96xf32>, vector<2x96xf32> -> vector<2x96xf32>
    %53 = arith.addf %52, %49 : vector<2x96xf32>
    %c1_31 = arith.constant 1 : index
    %c0_32 = arith.constant 0 : index
    %c0_33 = arith.constant 0 : index
    %54 = vector.load %arg5[%c1_31, %c0_32, %c0_33] : memref<2x1x96xf32, #tpu.memory_space<vmem>>, vector<1x1x96xf32>
    %55 = vector.shape_cast %54 : vector<1x1x96xf32> to vector<1x96xf32>
    %56 = vector.broadcast %55 : vector<1x96xf32> to vector<2x96xf32>
    %57 = arith.addf %53, %56 : vector<2x96xf32>
    %58 = vector.extract_strided_slice %57 {offsets = [0, 0], sizes = [2, 32], strides = [1, 1]} : vector<2x96xf32> to vector<2x32xf32>
    %59 = vector.extract_strided_slice %57 {offsets = [0, 32], sizes = [2, 32], strides = [1, 1]} : vector<2x96xf32> to vector<2x32xf32>
    %60 = arith.negf %59 : vector<2x32xf32>
    %61 = math.exp %60 : vector<2x32xf32>
    %cst_34 = arith.constant 1.000000e+00 : f32
    %62 = vector.broadcast %cst_34 : f32 to vector<2x32xf32>
    %63 = arith.addf %62, %61 : vector<2x32xf32>
    %64 = arith.divf %62, %63 : vector<2x32xf32>
    %65 = vector.extract_strided_slice %57 {offsets = [0, 64], sizes = [2, 32], strides = [1, 1]} : vector<2x96xf32> to vector<2x32xf32>
    %66 = arith.negf %65 : vector<2x32xf32>
    %67 = math.exp %66 : vector<2x32xf32>
    %cst_35 = arith.constant 1.000000e+00 : f32
    %68 = vector.broadcast %cst_35 : f32 to vector<2x32xf32>
    %69 = arith.addf %68, %67 : vector<2x32xf32>
    %70 = arith.divf %68, %69 : vector<2x32xf32>
    %71 = arith.mulf %64, %58 : vector<2x32xf32>
    %72 = arith.mulf %70, %11 : vector<2x32xf32>
    %73 = arith.addf %71, %72 : vector<2x32xf32>
    %74 = math.tanh %73 : vector<2x32xf32>
    %c0_36 = arith.constant 0 : index
    %c0_37 = arith.constant 0 : index
    %c0_38 = arith.constant 0 : index
    %75 = vector.load %arg7[%c0_36, %c0_37, %c0_38] : memref<2x32x96xf32, #tpu.memory_space<vmem>>, vector<1x32x96xf32>
    %76 = vector.shape_cast %75 : vector<1x32x96xf32> to vector<32x96xf32>
    %cst_39 = arith.constant dense<0.000000e+00> : vector<2x96xf32>
    %77 = tpu.matmul %18, %76, %cst_39 {dimension_numbers = #tpu.dot_dimension_numbers<[1], [0], [0], [1], [0, 0, 1, 1], [], []>} : vector<2x32xf32>, vector<32x96xf32>, vector<2x96xf32> -> vector<2x96xf32>
    %78 = arith.addf %21, %77 : vector<2x96xf32>
    %c0_40 = arith.constant 0 : index
    %c0_41 = arith.constant 0 : index
    %c0_42 = arith.constant 0 : index
    %79 = vector.load %arg9[%c0_40, %c0_41, %c0_42] : memref<2x1x96xf32, #tpu.memory_space<vmem>>, vector<1x1x96xf32>
    %80 = vector.shape_cast %79 : vector<1x1x96xf32> to vector<1x96xf32>
    %81 = vector.broadcast %80 : vector<1x96xf32> to vector<2x96xf32>
    %82 = arith.addf %78, %81 : vector<2x96xf32>
    %83 = vector.extract_strided_slice %82 {offsets = [0, 0], sizes = [2, 32], strides = [1, 1]} : vector<2x96xf32> to vector<2x32xf32>
    %84 = vector.extract_strided_slice %82 {offsets = [0, 32], sizes = [2, 32], strides = [1, 1]} : vector<2x96xf32> to vector<2x32xf32>
    %85 = arith.negf %84 : vector<2x32xf32>
    %86 = math.exp %85 : vector<2x32xf32>
    %cst_43 = arith.constant 1.000000e+00 : f32
    %87 = vector.broadcast %cst_43 : f32 to vector<2x32xf32>
    %88 = arith.addf %87, %86 : vector<2x32xf32>
    %89 = arith.divf %87, %88 : vector<2x32xf32>
    %90 = vector.extract_strided_slice %82 {offsets = [0, 64], sizes = [2, 32], strides = [1, 1]} : vector<2x96xf32> to vector<2x32xf32>
    %91 = arith.negf %90 : vector<2x32xf32>
    %92 = math.exp %91 : vector<2x32xf32>
    %cst_44 = arith.constant 1.000000e+00 : f32
    %93 = vector.broadcast %cst_44 : f32 to vector<2x32xf32>
    %94 = arith.addf %93, %92 : vector<2x32xf32>
    %95 = arith.divf %93, %94 : vector<2x32xf32>
    %96 = arith.mulf %89, %83 : vector<2x32xf32>
    %97 = arith.mulf %95, %13 : vector<2x32xf32>
    %98 = arith.addf %96, %97 : vector<2x32xf32>
    %99 = math.tanh %98 : vector<2x32xf32>
    %c1_45 = arith.constant 1 : index
    %c0_46 = arith.constant 0 : index
    %c0_47 = arith.constant 0 : index
    %100 = vector.load %arg7[%c1_45, %c0_46, %c0_47] : memref<2x32x96xf32, #tpu.memory_space<vmem>>, vector<1x32x96xf32>
    %101 = vector.shape_cast %100 : vector<1x32x96xf32> to vector<32x96xf32>
    %cst_48 = arith.constant dense<0.000000e+00> : vector<2x96xf32>
    %102 = tpu.matmul %19, %101, %cst_48 {dimension_numbers = #tpu.dot_dimension_numbers<[1], [0], [0], [1], [0, 0, 1, 1], [], []>} : vector<2x32xf32>, vector<32x96xf32>, vector<2x96xf32> -> vector<2x96xf32>
    %c1_49 = arith.constant 1 : index
    %c0_50 = arith.constant 0 : index
    %c0_51 = arith.constant 0 : index
    %103 = vector.load %arg8[%c1_49, %c0_50, %c0_51] : memref<2x32x96xf32, #tpu.memory_space<vmem>>, vector<1x32x96xf32>
    %104 = vector.shape_cast %103 : vector<1x32x96xf32> to vector<32x96xf32>
    %cst_52 = arith.constant dense<0.000000e+00> : vector<2x96xf32>
    %105 = tpu.matmul %99, %104, %cst_52 {dimension_numbers = #tpu.dot_dimension_numbers<[1], [0], [0], [1], [0, 0, 1, 1], [], []>} : vector<2x32xf32>, vector<32x96xf32>, vector<2x96xf32> -> vector<2x96xf32>
    %106 = arith.addf %105, %102 : vector<2x96xf32>
    %c1_53 = arith.constant 1 : index
    %c0_54 = arith.constant 0 : index
    %c0_55 = arith.constant 0 : index
    %107 = vector.load %arg9[%c1_53, %c0_54, %c0_55] : memref<2x1x96xf32, #tpu.memory_space<vmem>>, vector<1x1x96xf32>
    %108 = vector.shape_cast %107 : vector<1x1x96xf32> to vector<1x96xf32>
    %109 = vector.broadcast %108 : vector<1x96xf32> to vector<2x96xf32>
    %110 = arith.addf %106, %109 : vector<2x96xf32>
    %111 = vector.extract_strided_slice %110 {offsets = [0, 0], sizes = [2, 32], strides = [1, 1]} : vector<2x96xf32> to vector<2x32xf32>
    %112 = vector.extract_strided_slice %110 {offsets = [0, 32], sizes = [2, 32], strides = [1, 1]} : vector<2x96xf32> to vector<2x32xf32>
    %113 = arith.negf %112 : vector<2x32xf32>
    %114 = math.exp %113 : vector<2x32xf32>
    %cst_56 = arith.constant 1.000000e+00 : f32
    %115 = vector.broadcast %cst_56 : f32 to vector<2x32xf32>
    %116 = arith.addf %115, %114 : vector<2x32xf32>
    %117 = arith.divf %115, %116 : vector<2x32xf32>
    %118 = vector.extract_strided_slice %110 {offsets = [0, 64], sizes = [2, 32], strides = [1, 1]} : vector<2x96xf32> to vector<2x32xf32>
    %119 = arith.negf %118 : vector<2x32xf32>
    %120 = math.exp %119 : vector<2x32xf32>
    %cst_57 = arith.constant 1.000000e+00 : f32
    %121 = vector.broadcast %cst_57 : f32 to vector<2x32xf32>
    %122 = arith.addf %121, %120 : vector<2x32xf32>
    %123 = arith.divf %121, %122 : vector<2x32xf32>
    %124 = arith.mulf %117, %111 : vector<2x32xf32>
    %125 = arith.mulf %123, %15 : vector<2x32xf32>
    %126 = arith.addf %124, %125 : vector<2x32xf32>
    %127 = math.tanh %126 : vector<2x32xf32>
    %c0_58 = arith.constant 0 : index
    %c0_59 = arith.constant 0 : index
    %128 = vector.load %arg17[%c0_58, %c0_59] : memref<16x64xf32, #tpu.memory_space<vmem>>, vector<2x32xf32>
    tpu.vector_store %arg17[%c0_58, %c0_59], %74 {strides = array<i32>} : memref<16x64xf32, #tpu.memory_space<vmem>>, vector<2x32xf32>,
    %c14 = arith.constant 14 : index
    %c32 = arith.constant 32 : index
    %129 = vector.load %arg17[%c14, %c32] : memref<16x64xf32, #tpu.memory_space<vmem>>, vector<2x32xf32>
    tpu.vector_store %arg17[%c14, %c32], %127 {strides = array<i32>} : memref<16x64xf32, #tpu.memory_space<vmem>>, vector<2x32xf32>,
    %130 = vector.extract_strided_slice %7 {offsets = [2, 0], sizes = [2, 96], strides = [1, 1]} : vector<16x192xf32> to vector<2x96xf32>
    %131 = vector.extract_strided_slice %7 {offsets = [12, 96], sizes = [2, 96], strides = [1, 1]} : vector<16x192xf32> to vector<2x96xf32>
    %c0_60 = arith.constant 0 : index
    %c0_61 = arith.constant 0 : index
    %c0_62 = arith.constant 0 : index
    %132 = vector.load %arg3[%c0_60, %c0_61, %c0_62] : memref<2x32x96xf32, #tpu.memory_space<vmem>>, vector<1x32x96xf32>
    %133 = vector.shape_cast %132 : vector<1x32x96xf32> to vector<32x96xf32>
    %cst_63 = arith.constant dense<0.000000e+00> : vector<2x96xf32>
    %134 = tpu.matmul %46, %133, %cst_63 {dimension_numbers = #tpu.dot_dimension_numbers<[1], [0], [0], [1], [0, 0, 1, 1], [], []>} : vector<2x32xf32>, vector<32x96xf32>, vector<2x96xf32> -> vector<2x96xf32>
    %135 = arith.addf %130, %134 : vector<2x96xf32>
    %c0_64 = arith.constant 0 : index
    %c0_65 = arith.constant 0 : index
    %c0_66 = arith.constant 0 : index
    %136 = vector.load %arg5[%c0_64, %c0_65, %c0_66] : memref<2x1x96xf32, #tpu.memory_space<vmem>>, vector<1x1x96xf32>
    %137 = vector.shape_cast %136 : vector<1x1x96xf32> to vector<1x96xf32>
    %138 = vector.broadcast %137 : vector<1x96xf32> to vector<2x96xf32>
    %139 = arith.addf %135, %138 : vector<2x96xf32>
    %140 = vector.extract_strided_slice %139 {offsets = [0, 0], sizes = [2, 32], strides = [1, 1]} : vector<2x96xf32> to vector<2x32xf32>
    %141 = vector.extract_strided_slice %139 {offsets = [0, 32], sizes = [2, 32], strides = [1, 1]} : vector<2x96xf32> to vector<2x32xf32>
    %142 = arith.negf %141 : vector<2x32xf32>
    %143 = math.exp %142 : vector<2x32xf32>
    %cst_67 = arith.constant 1.000000e+00 : f32
    %144 = vector.broadcast %cst_67 : f32 to vector<2x32xf32>
    %145 = arith.addf %144, %143 : vector<2x32xf32>
    %146 = arith.divf %144, %145 : vector<2x32xf32>
    %147 = vector.extract_strided_slice %139 {offsets = [0, 64], sizes = [2, 32], strides = [1, 1]} : vector<2x96xf32> to vector<2x32xf32>
    %148 = arith.negf %147 : vector<2x32xf32>
    %149 = math.exp %148 : vector<2x32xf32>
    %cst_68 = arith.constant 1.000000e+00 : f32
    %150 = vector.broadcast %cst_68 : f32 to vector<2x32xf32>
    %151 = arith.addf %150, %149 : vector<2x32xf32>
    %152 = arith.divf %150, %151 : vector<2x32xf32>
    %153 = arith.mulf %146, %140 : vector<2x32xf32>
    %154 = arith.mulf %152, %45 : vector<2x32xf32>
    %155 = arith.addf %153, %154 : vector<2x32xf32>
    %156 = math.tanh %155 : vector<2x32xf32>
    %c1_69 = arith.constant 1 : index
    %c0_70 = arith.constant 0 : index
    %c0_71 = arith.constant 0 : index
    %157 = vector.load %arg3[%c1_69, %c0_70, %c0_71] : memref<2x32x96xf32, #tpu.memory_space<vmem>>, vector<1x32x96xf32>
    %158 = vector.shape_cast %157 : vector<1x32x96xf32> to vector<32x96xf32>
    %cst_72 = arith.constant dense<0.000000e+00> : vector<2x96xf32>
    %159 = tpu.matmul %74, %158, %cst_72 {dimension_numbers = #tpu.dot_dimension_numbers<[1], [0], [0], [1], [0, 0, 1, 1], [], []>} : vector<2x32xf32>, vector<32x96xf32>, vector<2x96xf32> -> vector<2x96xf32>
    %c1_73 = arith.constant 1 : index
    %c0_74 = arith.constant 0 : index
    %c0_75 = arith.constant 0 : index
    %160 = vector.load %arg4[%c1_73, %c0_74, %c0_75] : memref<2x32x96xf32, #tpu.memory_space<vmem>>, vector<1x32x96xf32>
    %161 = vector.shape_cast %160 : vector<1x32x96xf32> to vector<32x96xf32>
    %cst_76 = arith.constant dense<0.000000e+00> : vector<2x96xf32>
    %162 = tpu.matmul %156, %161, %cst_76 {dimension_numbers = #tpu.dot_dimension_numbers<[1], [0], [0], [1], [0, 0, 1, 1], [], []>} : vector<2x32xf32>, vector<32x96xf32>, vector<2x96xf32> -> vector<2x96xf32>
    %163 = arith.addf %162, %159 : vector<2x96xf32>
    %c1_77 = arith.constant 1 : index
    %c0_78 = arith.constant 0 : index
    %c0_79 = arith.constant 0 : index
    %164 = vector.load %arg5[%c1_77, %c0_78, %c0_79] : memref<2x1x96xf32, #tpu.memory_space<vmem>>, vector<1x1x96xf32>
    %165 = vector.shape_cast %164 : vector<1x1x96xf32> to vector<1x96xf32>
    %166 = vector.broadcast %165 : vector<1x96xf32> to vector<2x96xf32>
    %167 = arith.addf %163, %166 : vector<2x96xf32>
    %168 = vector.extract_strided_slice %167 {offsets = [0, 0], sizes = [2, 32], strides = [1, 1]} : vector<2x96xf32> to vector<2x32xf32>
    %169 = vector.extract_strided_slice %167 {offsets = [0, 32], sizes = [2, 32], strides = [1, 1]} : vector<2x96xf32> to vector<2x32xf32>
    %170 = arith.negf %169 : vector<2x32xf32>
    %171 = math.exp %170 : vector<2x32xf32>
    %cst_80 = arith.constant 1.000000e+00 : f32
    %172 = vector.broadcast %cst_80 : f32 to vector<2x32xf32>
    %173 = arith.addf %172, %171 : vector<2x32xf32>
    %174 = arith.divf %172, %173 : vector<2x32xf32>
    %175 = vector.extract_strided_slice %167 {offsets = [0, 64], sizes = [2, 32], strides = [1, 1]} : vector<2x96xf32> to vector<2x32xf32>
    %176 = arith.negf %175 : vector<2x32xf32>
    %177 = math.exp %176 : vector<2x32xf32>
    %cst_81 = arith.constant 1.000000e+00 : f32
    %178 = vector.broadcast %cst_81 : f32 to vector<2x32xf32>
    %179 = arith.addf %178, %177 : vector<2x32xf32>
    %180 = arith.divf %178, %179 : vector<2x32xf32>
    %181 = arith.mulf %174, %168 : vector<2x32xf32>
    %182 = arith.mulf %180, %73 : vector<2x32xf32>
    %183 = arith.addf %181, %182 : vector<2x32xf32>
    %184 = math.tanh %183 : vector<2x32xf32>
    %c0_82 = arith.constant 0 : index
    %c0_83 = arith.constant 0 : index
    %c0_84 = arith.constant 0 : index
    %185 = vector.load %arg7[%c0_82, %c0_83, %c0_84] : memref<2x32x96xf32, #tpu.memory_space<vmem>>, vector<1x32x96xf32>
    %186 = vector.shape_cast %185 : vector<1x32x96xf32> to vector<32x96xf32>
    %cst_85 = arith.constant dense<0.000000e+00> : vector<2x96xf32>
    %187 = tpu.matmul %99, %186, %cst_85 {dimension_numbers = #tpu.dot_dimension_numbers<[1], [0], [0], [1], [0, 0, 1, 1], [], []>} : vector<2x32xf32>, vector<32x96xf32>, vector<2x96xf32> -> vector<2x96xf32>
    %188 = arith.addf %131, %187 : vector<2x96xf32>
    %c0_86 = arith.constant 0 : index
    %c0_87 = arith.constant 0 : index
    %c0_88 = arith.constant 0 : index
    %189 = vector.load %arg9[%c0_86, %c0_87, %c0_88] : memref<2x1x96xf32, #tpu.memory_space<vmem>>, vector<1x1x96xf32>
    %190 = vector.shape_cast %189 : vector<1x1x96xf32> to vector<1x96xf32>
    %191 = vector.broadcast %190 : vector<1x96xf32> to vector<2x96xf32>
    %192 = arith.addf %188, %191 : vector<2x96xf32>
    %193 = vector.extract_strided_slice %192 {offsets = [0, 0], sizes = [2, 32], strides = [1, 1]} : vector<2x96xf32> to vector<2x32xf32>
    %194 = vector.extract_strided_slice %192 {offsets = [0, 32], sizes = [2, 32], strides = [1, 1]} : vector<2x96xf32> to vector<2x32xf32>
    %195 = arith.negf %194 : vector<2x32xf32>
    %196 = math.exp %195 : vector<2x32xf32>
    %cst_89 = arith.constant 1.000000e+00 : f32
    %197 = vector.broadcast %cst_89 : f32 to vector<2x32xf32>
    %198 = arith.addf %197, %196 : vector<2x32xf32>
    %199 = arith.divf %197, %198 : vector<2x32xf32>
    %200 = vector.extract_strided_slice %192 {offsets = [0, 64], sizes = [2, 32], strides = [1, 1]} : vector<2x96xf32> to vector<2x32xf32>
    %201 = arith.negf %200 : vector<2x32xf32>
    %202 = math.exp %201 : vector<2x32xf32>
    %cst_90 = arith.constant 1.000000e+00 : f32
    %203 = vector.broadcast %cst_90 : f32 to vector<2x32xf32>
    %204 = arith.addf %203, %202 : vector<2x32xf32>
    %205 = arith.divf %203, %204 : vector<2x32xf32>
    %206 = arith.mulf %199, %193 : vector<2x32xf32>
    %207 = arith.mulf %205, %98 : vector<2x32xf32>
    %208 = arith.addf %206, %207 : vector<2x32xf32>
    %209 = math.tanh %208 : vector<2x32xf32>
    %c1_91 = arith.constant 1 : index
    %c0_92 = arith.constant 0 : index
    %c0_93 = arith.constant 0 : index
    %210 = vector.load %arg7[%c1_91, %c0_92, %c0_93] : memref<2x32x96xf32, #tpu.memory_space<vmem>>, vector<1x32x96xf32>
    %211 = vector.shape_cast %210 : vector<1x32x96xf32> to vector<32x96xf32>
    %cst_94 = arith.constant dense<0.000000e+00> : vector<2x96xf32>
    %212 = tpu.matmul %127, %211, %cst_94 {dimension_numbers = #tpu.dot_dimension_numbers<[1], [0], [0], [1], [0, 0, 1, 1], [], []>} : vector<2x32xf32>, vector<32x96xf32>, vector<2x96xf32> -> vector<2x96xf32>
    %c1_95 = arith.constant 1 : index
    %c0_96 = arith.constant 0 : index
    %c0_97 = arith.constant 0 : index
    %213 = vector.load %arg8[%c1_95, %c0_96, %c0_97] : memref<2x32x96xf32, #tpu.memory_space<vmem>>, vector<1x32x96xf32>
    %214 = vector.shape_cast %213 : vector<1x32x96xf32> to vector<32x96xf32>
    %cst_98 = arith.constant dense<0.000000e+00> : vector<2x96xf32>
    %215 = tpu.matmul %209, %214, %cst_98 {dimension_numbers = #tpu.dot_dimension_numbers<[1], [0], [0], [1], [0, 0, 1, 1], [], []>} : vector<2x32xf32>, vector<32x96xf32>, vector<2x96xf32> -> vector<2x96xf32>
    %216 = arith.addf %215, %212 : vector<2x96xf32>
    %c1_99 = arith.constant 1 : index
    %c0_100 = arith.constant 0 : index
    %c0_101 = arith.constant 0 : index
    %217 = vector.load %arg9[%c1_99, %c0_100, %c0_101] : memref<2x1x96xf32, #tpu.memory_space<vmem>>, vector<1x1x96xf32>
    %218 = vector.shape_cast %217 : vector<1x1x96xf32> to vector<1x96xf32>
    %219 = vector.broadcast %218 : vector<1x96xf32> to vector<2x96xf32>
    %220 = arith.addf %216, %219 : vector<2x96xf32>
    %221 = vector.extract_strided_slice %220 {offsets = [0, 0], sizes = [2, 32], strides = [1, 1]} : vector<2x96xf32> to vector<2x32xf32>
    %222 = vector.extract_strided_slice %220 {offsets = [0, 32], sizes = [2, 32], strides = [1, 1]} : vector<2x96xf32> to vector<2x32xf32>
    %223 = arith.negf %222 : vector<2x32xf32>
    %224 = math.exp %223 : vector<2x32xf32>
    %cst_102 = arith.constant 1.000000e+00 : f32
    %225 = vector.broadcast %cst_102 : f32 to vector<2x32xf32>
    %226 = arith.addf %225, %224 : vector<2x32xf32>
    %227 = arith.divf %225, %226 : vector<2x32xf32>
    %228 = vector.extract_strided_slice %220 {offsets = [0, 64], sizes = [2, 32], strides = [1, 1]} : vector<2x96xf32> to vector<2x32xf32>
    %229 = arith.negf %228 : vector<2x32xf32>
    %230 = math.exp %229 : vector<2x32xf32>
    %cst_103 = arith.constant 1.000000e+00 : f32
    %231 = vector.broadcast %cst_103 : f32 to vector<2x32xf32>
    %232 = arith.addf %231, %230 : vector<2x32xf32>
    %233 = arith.divf %231, %232 : vector<2x32xf32>
    %234 = arith.mulf %227, %221 : vector<2x32xf32>
    %235 = arith.mulf %233, %126 : vector<2x32xf32>
    %236 = arith.addf %234, %235 : vector<2x32xf32>
    %237 = math.tanh %236 : vector<2x32xf32>
    %c2 = arith.constant 2 : index
    %c0_104 = arith.constant 0 : index
    %238 = vector.load %arg17[%c2, %c0_104] : memref<16x64xf32, #tpu.memory_space<vmem>>, vector<2x32xf32>
    tpu.vector_store %arg17[%c2, %c0_104], %184 {strides = array<i32>} : memref<16x64xf32, #tpu.memory_space<vmem>>, vector<2x32xf32>,
    %c12 = arith.constant 12 : index
    %c32_105 = arith.constant 32 : index
    %239 = vector.load %arg17[%c12, %c32_105] : memref<16x64xf32, #tpu.memory_space<vmem>>, vector<2x32xf32>
    tpu.vector_store %arg17[%c12, %c32_105], %237 {strides = array<i32>} : memref<16x64xf32, #tpu.memory_space<vmem>>, vector<2x32xf32>,
    %240 = vector.extract_strided_slice %7 {offsets = [4, 0], sizes = [2, 96], strides = [1, 1]} : vector<16x192xf32> to vector<2x96xf32>
    %241 = vector.extract_strided_slice %7 {offsets = [10, 96], sizes = [2, 96], strides = [1, 1]} : vector<16x192xf32> to vector<2x96xf32>
    %c0_106 = arith.constant 0 : index
    %c0_107 = arith.constant 0 : index
    %c0_108 = arith.constant 0 : index
    %242 = vector.load %arg3[%c0_106, %c0_107, %c0_108] : memref<2x32x96xf32, #tpu.memory_space<vmem>>, vector<1x32x96xf32>
    %243 = vector.shape_cast %242 : vector<1x32x96xf32> to vector<32x96xf32>
    %cst_109 = arith.constant dense<0.000000e+00> : vector<2x96xf32>
    %244 = tpu.matmul %156, %243, %cst_109 {dimension_numbers = #tpu.dot_dimension_numbers<[1], [0], [0], [1], [0, 0, 1, 1], [], []>} : vector<2x32xf32>, vector<32x96xf32>, vector<2x96xf32> -> vector<2x96xf32>
    %245 = arith.addf %240, %244 : vector<2x96xf32>
    %c0_110 = arith.constant 0 : index
    %c0_111 = arith.constant 0 : index
    %c0_112 = arith.constant 0 : index
    %246 = vector.load %arg5[%c0_110, %c0_111, %c0_112] : memref<2x1x96xf32, #tpu.memory_space<vmem>>, vector<1x1x96xf32>
    %247 = vector.shape_cast %246 : vector<1x1x96xf32> to vector<1x96xf32>
    %248 = vector.broadcast %247 : vector<1x96xf32> to vector<2x96xf32>
    %249 = arith.addf %245, %248 : vector<2x96xf32>
    %250 = vector.extract_strided_slice %249 {offsets = [0, 0], sizes = [2, 32], strides = [1, 1]} : vector<2x96xf32> to vector<2x32xf32>
    %251 = vector.extract_strided_slice %249 {offsets = [0, 32], sizes = [2, 32], strides = [1, 1]} : vector<2x96xf32> to vector<2x32xf32>
    %252 = arith.negf %251 : vector<2x32xf32>
    %253 = math.exp %252 : vector<2x32xf32>
    %cst_113 = arith.constant 1.000000e+00 : f32
    %254 = vector.broadcast %cst_113 : f32 to vector<2x32xf32>
    %255 = arith.addf %254, %253 : vector<2x32xf32>
    %256 = arith.divf %254, %255 : vector<2x32xf32>
    %257 = vector.extract_strided_slice %249 {offsets = [0, 64], sizes = [2, 32], strides = [1, 1]} : vector<2x96xf32> to vector<2x32xf32>
    %258 = arith.negf %257 : vector<2x32xf32>
    %259 = math.exp %258 : vector<2x32xf32>
    %cst_114 = arith.constant 1.000000e+00 : f32
    %260 = vector.broadcast %cst_114 : f32 to vector<2x32xf32>
    %261 = arith.addf %260, %259 : vector<2x32xf32>
    %262 = arith.divf %260, %261 : vector<2x32xf32>
    %263 = arith.mulf %256, %250 : vector<2x32xf32>
    %264 = arith.mulf %262, %155 : vector<2x32xf32>
    %265 = arith.addf %263, %264 : vector<2x32xf32>
    %266 = math.tanh %265 : vector<2x32xf32>
    %c1_115 = arith.constant 1 : index
    %c0_116 = arith.constant 0 : index
    %c0_117 = arith.constant 0 : index
    %267 = vector.load %arg3[%c1_115, %c0_116, %c0_117] : memref<2x32x96xf32, #tpu.memory_space<vmem>>, vector<1x32x96xf32>
    %268 = vector.shape_cast %267 : vector<1x32x96xf32> to vector<32x96xf32>
    %cst_118 = arith.constant dense<0.000000e+00> : vector<2x96xf32>
    %269 = tpu.matmul %184, %268, %cst_118 {dimension_numbers = #tpu.dot_dimension_numbers<[1], [0], [0], [1], [0, 0, 1, 1], [], []>} : vector<2x32xf32>, vector<32x96xf32>, vector<2x96xf32> -> vector<2x96xf32>
    %c1_119 = arith.constant 1 : index
    %c0_120 = arith.constant 0 : index
    %c0_121 = arith.constant 0 : index
    %270 = vector.load %arg4[%c1_119, %c0_120, %c0_121] : memref<2x32x96xf32, #tpu.memory_space<vmem>>, vector<1x32x96xf32>
    %271 = vector.shape_cast %270 : vector<1x32x96xf32> to vector<32x96xf32>
    %cst_122 = arith.constant dense<0.000000e+00> : vector<2x96xf32>
    %272 = tpu.matmul %266, %271, %cst_122 {dimension_numbers = #tpu.dot_dimension_numbers<[1], [0], [0], [1], [0, 0, 1, 1], [], []>} : vector<2x32xf32>, vector<32x96xf32>, vector<2x96xf32> -> vector<2x96xf32>
    %273 = arith.addf %272, %269 : vector<2x96xf32>
    %c1_123 = arith.constant 1 : index
    %c0_124 = arith.constant 0 : index
    %c0_125 = arith.constant 0 : index
    %274 = vector.load %arg5[%c1_123, %c0_124, %c0_125] : memref<2x1x96xf32, #tpu.memory_space<vmem>>, vector<1x1x96xf32>
    %275 = vector.shape_cast %274 : vector<1x1x96xf32> to vector<1x96xf32>
    %276 = vector.broadcast %275 : vector<1x96xf32> to vector<2x96xf32>
    %277 = arith.addf %273, %276 : vector<2x96xf32>
    %278 = vector.extract_strided_slice %277 {offsets = [0, 0], sizes = [2, 32], strides = [1, 1]} : vector<2x96xf32> to vector<2x32xf32>
    %279 = vector.extract_strided_slice %277 {offsets = [0, 32], sizes = [2, 32], strides = [1, 1]} : vector<2x96xf32> to vector<2x32xf32>
    %280 = arith.negf %279 : vector<2x32xf32>
    %281 = math.exp %280 : vector<2x32xf32>
    %cst_126 = arith.constant 1.000000e+00 : f32
    %282 = vector.broadcast %cst_126 : f32 to vector<2x32xf32>
    %283 = arith.addf %282, %281 : vector<2x32xf32>
    %284 = arith.divf %282, %283 : vector<2x32xf32>
    %285 = vector.extract_strided_slice %277 {offsets = [0, 64], sizes = [2, 32], strides = [1, 1]} : vector<2x96xf32> to vector<2x32xf32>
    %286 = arith.negf %285 : vector<2x32xf32>
    %287 = math.exp %286 : vector<2x32xf32>
    %cst_127 = arith.constant 1.000000e+00 : f32
    %288 = vector.broadcast %cst_127 : f32 to vector<2x32xf32>
    %289 = arith.addf %288, %287 : vector<2x32xf32>
    %290 = arith.divf %288, %289 : vector<2x32xf32>
    %291 = arith.mulf %284, %278 : vector<2x32xf32>
    %292 = arith.mulf %290, %183 : vector<2x32xf32>
    %293 = arith.addf %291, %292 : vector<2x32xf32>
    %294 = math.tanh %293 : vector<2x32xf32>
    %c0_128 = arith.constant 0 : index
    %c0_129 = arith.constant 0 : index
    %c0_130 = arith.constant 0 : index
    %295 = vector.load %arg7[%c0_128, %c0_129, %c0_130] : memref<2x32x96xf32, #tpu.memory_space<vmem>>, vector<1x32x96xf32>
    %296 = vector.shape_cast %295 : vector<1x32x96xf32> to vector<32x96xf32>
    %cst_131 = arith.constant dense<0.000000e+00> : vector<2x96xf32>
    %297 = tpu.matmul %209, %296, %cst_131 {dimension_numbers = #tpu.dot_dimension_numbers<[1], [0], [0], [1], [0, 0, 1, 1], [], []>} : vector<2x32xf32>, vector<32x96xf32>, vector<2x96xf32> -> vector<2x96xf32>
    %298 = arith.addf %241, %297 : vector<2x96xf32>
    %c0_132 = arith.constant 0 : index
    %c0_133 = arith.constant 0 : index
    %c0_134 = arith.constant 0 : index
    %299 = vector.load %arg9[%c0_132, %c0_133, %c0_134] : memref<2x1x96xf32, #tpu.memory_space<vmem>>, vector<1x1x96xf32>
    %300 = vector.shape_cast %299 : vector<1x1x96xf32> to vector<1x96xf32>
    %301 = vector.broadcast %300 : vector<1x96xf32> to vector<2x96xf32>
    %302 = arith.addf %298, %301 : vector<2x96xf32>
    %303 = vector.extract_strided_slice %302 {offsets = [0, 0], sizes = [2, 32], strides = [1, 1]} : vector<2x96xf32> to vector<2x32xf32>
    %304 = vector.extract_strided_slice %302 {offsets = [0, 32], sizes = [2, 32], strides = [1, 1]} : vector<2x96xf32> to vector<2x32xf32>
    %305 = arith.negf %304 : vector<2x32xf32>
    %306 = math.exp %305 : vector<2x32xf32>
    %cst_135 = arith.constant 1.000000e+00 : f32
    %307 = vector.broadcast %cst_135 : f32 to vector<2x32xf32>
    %308 = arith.addf %307, %306 : vector<2x32xf32>
    %309 = arith.divf %307, %308 : vector<2x32xf32>
    %310 = vector.extract_strided_slice %302 {offsets = [0, 64], sizes = [2, 32], strides = [1, 1]} : vector<2x96xf32> to vector<2x32xf32>
    %311 = arith.negf %310 : vector<2x32xf32>
    %312 = math.exp %311 : vector<2x32xf32>
    %cst_136 = arith.constant 1.000000e+00 : f32
    %313 = vector.broadcast %cst_136 : f32 to vector<2x32xf32>
    %314 = arith.addf %313, %312 : vector<2x32xf32>
    %315 = arith.divf %313, %314 : vector<2x32xf32>
    %316 = arith.mulf %309, %303 : vector<2x32xf32>
    %317 = arith.mulf %315, %208 : vector<2x32xf32>
    %318 = arith.addf %316, %317 : vector<2x32xf32>
    %319 = math.tanh %318 : vector<2x32xf32>
    %c1_137 = arith.constant 1 : index
    %c0_138 = arith.constant 0 : index
    %c0_139 = arith.constant 0 : index
    %320 = vector.load %arg7[%c1_137, %c0_138, %c0_139] : memref<2x32x96xf32, #tpu.memory_space<vmem>>, vector<1x32x96xf32>
    %321 = vector.shape_cast %320 : vector<1x32x96xf32> to vector<32x96xf32>
    %cst_140 = arith.constant dense<0.000000e+00> : vector<2x96xf32>
    %322 = tpu.matmul %237, %321, %cst_140 {dimension_numbers = #tpu.dot_dimension_numbers<[1], [0], [0], [1], [0, 0, 1, 1], [], []>} : vector<2x32xf32>, vector<32x96xf32>, vector<2x96xf32> -> vector<2x96xf32>
    %c1_141 = arith.constant 1 : index
    %c0_142 = arith.constant 0 : index
    %c0_143 = arith.constant 0 : index
    %323 = vector.load %arg8[%c1_141, %c0_142, %c0_143] : memref<2x32x96xf32, #tpu.memory_space<vmem>>, vector<1x32x96xf32>
    %324 = vector.shape_cast %323 : vector<1x32x96xf32> to vector<32x96xf32>
    %cst_144 = arith.constant dense<0.000000e+00> : vector<2x96xf32>
    %325 = tpu.matmul %319, %324, %cst_144 {dimension_numbers = #tpu.dot_dimension_numbers<[1], [0], [0], [1], [0, 0, 1, 1], [], []>} : vector<2x32xf32>, vector<32x96xf32>, vector<2x96xf32> -> vector<2x96xf32>
    %326 = arith.addf %325, %322 : vector<2x96xf32>
    %c1_145 = arith.constant 1 : index
    %c0_146 = arith.constant 0 : index
    %c0_147 = arith.constant 0 : index
    %327 = vector.load %arg9[%c1_145, %c0_146, %c0_147] : memref<2x1x96xf32, #tpu.memory_space<vmem>>, vector<1x1x96xf32>
    %328 = vector.shape_cast %327 : vector<1x1x96xf32> to vector<1x96xf32>
    %329 = vector.broadcast %328 : vector<1x96xf32> to vector<2x96xf32>
    %330 = arith.addf %326, %329 : vector<2x96xf32>
    %331 = vector.extract_strided_slice %330 {offsets = [0, 0], sizes = [2, 32], strides = [1, 1]} : vector<2x96xf32> to vector<2x32xf32>
    %332 = vector.extract_strided_slice %330 {offsets = [0, 32], sizes = [2, 32], strides = [1, 1]} : vector<2x96xf32> to vector<2x32xf32>
    %333 = arith.negf %332 : vector<2x32xf32>
    %334 = math.exp %333 : vector<2x32xf32>
    %cst_148 = arith.constant 1.000000e+00 : f32
    %335 = vector.broadcast %cst_148 : f32 to vector<2x32xf32>
    %336 = arith.addf %335, %334 : vector<2x32xf32>
    %337 = arith.divf %335, %336 : vector<2x32xf32>
    %338 = vector.extract_strided_slice %330 {offsets = [0, 64], sizes = [2, 32], strides = [1, 1]} : vector<2x96xf32> to vector<2x32xf32>
    %339 = arith.negf %338 : vector<2x32xf32>
    %340 = math.exp %339 : vector<2x32xf32>
    %cst_149 = arith.constant 1.000000e+00 : f32
    %341 = vector.broadcast %cst_149 : f32 to vector<2x32xf32>
    %342 = arith.addf %341, %340 : vector<2x32xf32>
    %343 = arith.divf %341, %342 : vector<2x32xf32>
    %344 = arith.mulf %337, %331 : vector<2x32xf32>
    %345 = arith.mulf %343, %236 : vector<2x32xf32>
    %346 = arith.addf %344, %345 : vector<2x32xf32>
    %347 = math.tanh %346 : vector<2x32xf32>
    %c4 = arith.constant 4 : index
    %c0_150 = arith.constant 0 : index
    %348 = vector.load %arg17[%c4, %c0_150] : memref<16x64xf32, #tpu.memory_space<vmem>>, vector<2x32xf32>
    tpu.vector_store %arg17[%c4, %c0_150], %294 {strides = array<i32>} : memref<16x64xf32, #tpu.memory_space<vmem>>, vector<2x32xf32>,
    %c10 = arith.constant 10 : index
    %c32_151 = arith.constant 32 : index
    %349 = vector.load %arg17[%c10, %c32_151] : memref<16x64xf32, #tpu.memory_space<vmem>>, vector<2x32xf32>
    tpu.vector_store %arg17[%c10, %c32_151], %347 {strides = array<i32>} : memref<16x64xf32, #tpu.memory_space<vmem>>, vector<2x32xf32>,
    %350 = vector.extract_strided_slice %7 {offsets = [6, 0], sizes = [2, 96], strides = [1, 1]} : vector<16x192xf32> to vector<2x96xf32>
    %351 = vector.extract_strided_slice %7 {offsets = [8, 96], sizes = [2, 96], strides = [1, 1]} : vector<16x192xf32> to vector<2x96xf32>
    %c0_152 = arith.constant 0 : index
    %c0_153 = arith.constant 0 : index
    %c0_154 = arith.constant 0 : index
    %352 = vector.load %arg3[%c0_152, %c0_153, %c0_154] : memref<2x32x96xf32, #tpu.memory_space<vmem>>, vector<1x32x96xf32>
    %353 = vector.shape_cast %352 : vector<1x32x96xf32> to vector<32x96xf32>
    %cst_155 = arith.constant dense<0.000000e+00> : vector<2x96xf32>
    %354 = tpu.matmul %266, %353, %cst_155 {dimension_numbers = #tpu.dot_dimension_numbers<[1], [0], [0], [1], [0, 0, 1, 1], [], []>} : vector<2x32xf32>, vector<32x96xf32>, vector<2x96xf32> -> vector<2x96xf32>
    %355 = arith.addf %350, %354 : vector<2x96xf32>
    %c0_156 = arith.constant 0 : index
    %c0_157 = arith.constant 0 : index
    %c0_158 = arith.constant 0 : index
    %356 = vector.load %arg5[%c0_156, %c0_157, %c0_158] : memref<2x1x96xf32, #tpu.memory_space<vmem>>, vector<1x1x96xf32>
    %357 = vector.shape_cast %356 : vector<1x1x96xf32> to vector<1x96xf32>
    %358 = vector.broadcast %357 : vector<1x96xf32> to vector<2x96xf32>
    %359 = arith.addf %355, %358 : vector<2x96xf32>
    %360 = vector.extract_strided_slice %359 {offsets = [0, 0], sizes = [2, 32], strides = [1, 1]} : vector<2x96xf32> to vector<2x32xf32>
    %361 = vector.extract_strided_slice %359 {offsets = [0, 32], sizes = [2, 32], strides = [1, 1]} : vector<2x96xf32> to vector<2x32xf32>
    %362 = arith.negf %361 : vector<2x32xf32>
    %363 = math.exp %362 : vector<2x32xf32>
    %cst_159 = arith.constant 1.000000e+00 : f32
    %364 = vector.broadcast %cst_159 : f32 to vector<2x32xf32>
    %365 = arith.addf %364, %363 : vector<2x32xf32>
    %366 = arith.divf %364, %365 : vector<2x32xf32>
    %367 = vector.extract_strided_slice %359 {offsets = [0, 64], sizes = [2, 32], strides = [1, 1]} : vector<2x96xf32> to vector<2x32xf32>
    %368 = arith.negf %367 : vector<2x32xf32>
    %369 = math.exp %368 : vector<2x32xf32>
    %cst_160 = arith.constant 1.000000e+00 : f32
    %370 = vector.broadcast %cst_160 : f32 to vector<2x32xf32>
    %371 = arith.addf %370, %369 : vector<2x32xf32>
    %372 = arith.divf %370, %371 : vector<2x32xf32>
    %373 = arith.mulf %366, %360 : vector<2x32xf32>
    %374 = arith.mulf %372, %265 : vector<2x32xf32>
    %375 = arith.addf %373, %374 : vector<2x32xf32>
    %376 = math.tanh %375 : vector<2x32xf32>
    %c1_161 = arith.constant 1 : index
    %c0_162 = arith.constant 0 : index
    %c0_163 = arith.constant 0 : index
    %377 = vector.load %arg3[%c1_161, %c0_162, %c0_163] : memref<2x32x96xf32, #tpu.memory_space<vmem>>, vector<1x32x96xf32>
    %378 = vector.shape_cast %377 : vector<1x32x96xf32> to vector<32x96xf32>
    %cst_164 = arith.constant dense<0.000000e+00> : vector<2x96xf32>
    %379 = tpu.matmul %294, %378, %cst_164 {dimension_numbers = #tpu.dot_dimension_numbers<[1], [0], [0], [1], [0, 0, 1, 1], [], []>} : vector<2x32xf32>, vector<32x96xf32>, vector<2x96xf32> -> vector<2x96xf32>
    %c1_165 = arith.constant 1 : index
    %c0_166 = arith.constant 0 : index
    %c0_167 = arith.constant 0 : index
    %380 = vector.load %arg4[%c1_165, %c0_166, %c0_167] : memref<2x32x96xf32, #tpu.memory_space<vmem>>, vector<1x32x96xf32>
    %381 = vector.shape_cast %380 : vector<1x32x96xf32> to vector<32x96xf32>
    %cst_168 = arith.constant dense<0.000000e+00> : vector<2x96xf32>
    %382 = tpu.matmul %376, %381, %cst_168 {dimension_numbers = #tpu.dot_dimension_numbers<[1], [0], [0], [1], [0, 0, 1, 1], [], []>} : vector<2x32xf32>, vector<32x96xf32>, vector<2x96xf32> -> vector<2x96xf32>
    %383 = arith.addf %382, %379 : vector<2x96xf32>
    %c1_169 = arith.constant 1 : index
    %c0_170 = arith.constant 0 : index
    %c0_171 = arith.constant 0 : index
    %384 = vector.load %arg5[%c1_169, %c0_170, %c0_171] : memref<2x1x96xf32, #tpu.memory_space<vmem>>, vector<1x1x96xf32>
    %385 = vector.shape_cast %384 : vector<1x1x96xf32> to vector<1x96xf32>
    %386 = vector.broadcast %385 : vector<1x96xf32> to vector<2x96xf32>
    %387 = arith.addf %383, %386 : vector<2x96xf32>
    %388 = vector.extract_strided_slice %387 {offsets = [0, 0], sizes = [2, 32], strides = [1, 1]} : vector<2x96xf32> to vector<2x32xf32>
    %389 = vector.extract_strided_slice %387 {offsets = [0, 32], sizes = [2, 32], strides = [1, 1]} : vector<2x96xf32> to vector<2x32xf32>
    %390 = arith.negf %389 : vector<2x32xf32>
    %391 = math.exp %390 : vector<2x32xf32>
    %cst_172 = arith.constant 1.000000e+00 : f32
    %392 = vector.broadcast %cst_172 : f32 to vector<2x32xf32>
    %393 = arith.addf %392, %391 : vector<2x32xf32>
    %394 = arith.divf %392, %393 : vector<2x32xf32>
    %395 = vector.extract_strided_slice %387 {offsets = [0, 64], sizes = [2, 32], strides = [1, 1]} : vector<2x96xf32> to vector<2x32xf32>
    %396 = arith.negf %395 : vector<2x32xf32>
    %397 = math.exp %396 : vector<2x32xf32>
    %cst_173 = arith.constant 1.000000e+00 : f32
    %398 = vector.broadcast %cst_173 : f32 to vector<2x32xf32>
    %399 = arith.addf %398, %397 : vector<2x32xf32>
    %400 = arith.divf %398, %399 : vector<2x32xf32>
    %401 = arith.mulf %394, %388 : vector<2x32xf32>
    %402 = arith.mulf %400, %293 : vector<2x32xf32>
    %403 = arith.addf %401, %402 : vector<2x32xf32>
    %404 = math.tanh %403 : vector<2x32xf32>
    %c0_174 = arith.constant 0 : index
    %c0_175 = arith.constant 0 : index
    %c0_176 = arith.constant 0 : index
    %405 = vector.load %arg7[%c0_174, %c0_175, %c0_176] : memref<2x32x96xf32, #tpu.memory_space<vmem>>, vector<1x32x96xf32>
    %406 = vector.shape_cast %405 : vector<1x32x96xf32> to vector<32x96xf32>
    %cst_177 = arith.constant dense<0.000000e+00> : vector<2x96xf32>
    %407 = tpu.matmul %319, %406, %cst_177 {dimension_numbers = #tpu.dot_dimension_numbers<[1], [0], [0], [1], [0, 0, 1, 1], [], []>} : vector<2x32xf32>, vector<32x96xf32>, vector<2x96xf32> -> vector<2x96xf32>
    %408 = arith.addf %351, %407 : vector<2x96xf32>
    %c0_178 = arith.constant 0 : index
    %c0_179 = arith.constant 0 : index
    %c0_180 = arith.constant 0 : index
    %409 = vector.load %arg9[%c0_178, %c0_179, %c0_180] : memref<2x1x96xf32, #tpu.memory_space<vmem>>, vector<1x1x96xf32>
    %410 = vector.shape_cast %409 : vector<1x1x96xf32> to vector<1x96xf32>
    %411 = vector.broadcast %410 : vector<1x96xf32> to vector<2x96xf32>
    %412 = arith.addf %408, %411 : vector<2x96xf32>
    %413 = vector.extract_strided_slice %412 {offsets = [0, 0], sizes = [2, 32], strides = [1, 1]} : vector<2x96xf32> to vector<2x32xf32>
    %414 = vector.extract_strided_slice %412 {offsets = [0, 32], sizes = [2, 32], strides = [1, 1]} : vector<2x96xf32> to vector<2x32xf32>
    %415 = arith.negf %414 : vector<2x32xf32>
    %416 = math.exp %415 : vector<2x32xf32>
    %cst_181 = arith.constant 1.000000e+00 : f32
    %417 = vector.broadcast %cst_181 : f32 to vector<2x32xf32>
    %418 = arith.addf %417, %416 : vector<2x32xf32>
    %419 = arith.divf %417, %418 : vector<2x32xf32>
    %420 = vector.extract_strided_slice %412 {offsets = [0, 64], sizes = [2, 32], strides = [1, 1]} : vector<2x96xf32> to vector<2x32xf32>
    %421 = arith.negf %420 : vector<2x32xf32>
    %422 = math.exp %421 : vector<2x32xf32>
    %cst_182 = arith.constant 1.000000e+00 : f32
    %423 = vector.broadcast %cst_182 : f32 to vector<2x32xf32>
    %424 = arith.addf %423, %422 : vector<2x32xf32>
    %425 = arith.divf %423, %424 : vector<2x32xf32>
    %426 = arith.mulf %419, %413 : vector<2x32xf32>
    %427 = arith.mulf %425, %318 : vector<2x32xf32>
    %428 = arith.addf %426, %427 : vector<2x32xf32>
    %429 = math.tanh %428 : vector<2x32xf32>
    %c1_183 = arith.constant 1 : index
    %c0_184 = arith.constant 0 : index
    %c0_185 = arith.constant 0 : index
    %430 = vector.load %arg7[%c1_183, %c0_184, %c0_185] : memref<2x32x96xf32, #tpu.memory_space<vmem>>, vector<1x32x96xf32>
    %431 = vector.shape_cast %430 : vector<1x32x96xf32> to vector<32x96xf32>
    %cst_186 = arith.constant dense<0.000000e+00> : vector<2x96xf32>
    %432 = tpu.matmul %347, %431, %cst_186 {dimension_numbers = #tpu.dot_dimension_numbers<[1], [0], [0], [1], [0, 0, 1, 1], [], []>} : vector<2x32xf32>, vector<32x96xf32>, vector<2x96xf32> -> vector<2x96xf32>
    %c1_187 = arith.constant 1 : index
    %c0_188 = arith.constant 0 : index
    %c0_189 = arith.constant 0 : index
    %433 = vector.load %arg8[%c1_187, %c0_188, %c0_189] : memref<2x32x96xf32, #tpu.memory_space<vmem>>, vector<1x32x96xf32>
    %434 = vector.shape_cast %433 : vector<1x32x96xf32> to vector<32x96xf32>
    %cst_190 = arith.constant dense<0.000000e+00> : vector<2x96xf32>
    %435 = tpu.matmul %429, %434, %cst_190 {dimension_numbers = #tpu.dot_dimension_numbers<[1], [0], [0], [1], [0, 0, 1, 1], [], []>} : vector<2x32xf32>, vector<32x96xf32>, vector<2x96xf32> -> vector<2x96xf32>
    %436 = arith.addf %435, %432 : vector<2x96xf32>
    %c1_191 = arith.constant 1 : index
    %c0_192 = arith.constant 0 : index
    %c0_193 = arith.constant 0 : index
    %437 = vector.load %arg9[%c1_191, %c0_192, %c0_193] : memref<2x1x96xf32, #tpu.memory_space<vmem>>, vector<1x1x96xf32>
    %438 = vector.shape_cast %437 : vector<1x1x96xf32> to vector<1x96xf32>
    %439 = vector.broadcast %438 : vector<1x96xf32> to vector<2x96xf32>
    %440 = arith.addf %436, %439 : vector<2x96xf32>
    %441 = vector.extract_strided_slice %440 {offsets = [0, 0], sizes = [2, 32], strides = [1, 1]} : vector<2x96xf32> to vector<2x32xf32>
    %442 = vector.extract_strided_slice %440 {offsets = [0, 32], sizes = [2, 32], strides = [1, 1]} : vector<2x96xf32> to vector<2x32xf32>
    %443 = arith.negf %442 : vector<2x32xf32>
    %444 = math.exp %443 : vector<2x32xf32>
    %cst_194 = arith.constant 1.000000e+00 : f32
    %445 = vector.broadcast %cst_194 : f32 to vector<2x32xf32>
    %446 = arith.addf %445, %444 : vector<2x32xf32>
    %447 = arith.divf %445, %446 : vector<2x32xf32>
    %448 = vector.extract_strided_slice %440 {offsets = [0, 64], sizes = [2, 32], strides = [1, 1]} : vector<2x96xf32> to vector<2x32xf32>
    %449 = arith.negf %448 : vector<2x32xf32>
    %450 = math.exp %449 : vector<2x32xf32>
    %cst_195 = arith.constant 1.000000e+00 : f32
    %451 = vector.broadcast %cst_195 : f32 to vector<2x32xf32>
    %452 = arith.addf %451, %450 : vector<2x32xf32>
    %453 = arith.divf %451, %452 : vector<2x32xf32>
    %454 = arith.mulf %447, %441 : vector<2x32xf32>
    %455 = arith.mulf %453, %346 : vector<2x32xf32>
    %456 = arith.addf %454, %455 : vector<2x32xf32>
    %457 = math.tanh %456 : vector<2x32xf32>
    %c6 = arith.constant 6 : index
    %c0_196 = arith.constant 0 : index
    %458 = vector.load %arg17[%c6, %c0_196] : memref<16x64xf32, #tpu.memory_space<vmem>>, vector<2x32xf32>
    tpu.vector_store %arg17[%c6, %c0_196], %404 {strides = array<i32>} : memref<16x64xf32, #tpu.memory_space<vmem>>, vector<2x32xf32>,
    %c8 = arith.constant 8 : index
    %c32_197 = arith.constant 32 : index
    %459 = vector.load %arg17[%c8, %c32_197] : memref<16x64xf32, #tpu.memory_space<vmem>>, vector<2x32xf32>
    tpu.vector_store %arg17[%c8, %c32_197], %457 {strides = array<i32>} : memref<16x64xf32, #tpu.memory_space<vmem>>, vector<2x32xf32>,
    %460 = vector.extract_strided_slice %7 {offsets = [8, 0], sizes = [2, 96], strides = [1, 1]} : vector<16x192xf32> to vector<2x96xf32>
    %461 = vector.extract_strided_slice %7 {offsets = [6, 96], sizes = [2, 96], strides = [1, 1]} : vector<16x192xf32> to vector<2x96xf32>
    %c0_198 = arith.constant 0 : index
    %c0_199 = arith.constant 0 : index
    %c0_200 = arith.constant 0 : index
    %462 = vector.load %arg3[%c0_198, %c0_199, %c0_200] : memref<2x32x96xf32, #tpu.memory_space<vmem>>, vector<1x32x96xf32>
    %463 = vector.shape_cast %462 : vector<1x32x96xf32> to vector<32x96xf32>
    %cst_201 = arith.constant dense<0.000000e+00> : vector<2x96xf32>
    %464 = tpu.matmul %376, %463, %cst_201 {dimension_numbers = #tpu.dot_dimension_numbers<[1], [0], [0], [1], [0, 0, 1, 1], [], []>} : vector<2x32xf32>, vector<32x96xf32>, vector<2x96xf32> -> vector<2x96xf32>
    %465 = arith.addf %460, %464 : vector<2x96xf32>
    %c0_202 = arith.constant 0 : index
    %c0_203 = arith.constant 0 : index
    %c0_204 = arith.constant 0 : index
    %466 = vector.load %arg5[%c0_202, %c0_203, %c0_204] : memref<2x1x96xf32, #tpu.memory_space<vmem>>, vector<1x1x96xf32>
    %467 = vector.shape_cast %466 : vector<1x1x96xf32> to vector<1x96xf32>
    %468 = vector.broadcast %467 : vector<1x96xf32> to vector<2x96xf32>
    %469 = arith.addf %465, %468 : vector<2x96xf32>
    %470 = vector.extract_strided_slice %469 {offsets = [0, 0], sizes = [2, 32], strides = [1, 1]} : vector<2x96xf32> to vector<2x32xf32>
    %471 = vector.extract_strided_slice %469 {offsets = [0, 32], sizes = [2, 32], strides = [1, 1]} : vector<2x96xf32> to vector<2x32xf32>
    %472 = arith.negf %471 : vector<2x32xf32>
    %473 = math.exp %472 : vector<2x32xf32>
    %cst_205 = arith.constant 1.000000e+00 : f32
    %474 = vector.broadcast %cst_205 : f32 to vector<2x32xf32>
    %475 = arith.addf %474, %473 : vector<2x32xf32>
    %476 = arith.divf %474, %475 : vector<2x32xf32>
    %477 = vector.extract_strided_slice %469 {offsets = [0, 64], sizes = [2, 32], strides = [1, 1]} : vector<2x96xf32> to vector<2x32xf32>
    %478 = arith.negf %477 : vector<2x32xf32>
    %479 = math.exp %478 : vector<2x32xf32>
    %cst_206 = arith.constant 1.000000e+00 : f32
    %480 = vector.broadcast %cst_206 : f32 to vector<2x32xf32>
    %481 = arith.addf %480, %479 : vector<2x32xf32>
    %482 = arith.divf %480, %481 : vector<2x32xf32>
    %483 = arith.mulf %476, %470 : vector<2x32xf32>
    %484 = arith.mulf %482, %375 : vector<2x32xf32>
    %485 = arith.addf %483, %484 : vector<2x32xf32>
    %486 = math.tanh %485 : vector<2x32xf32>
    %c1_207 = arith.constant 1 : index
    %c0_208 = arith.constant 0 : index
    %c0_209 = arith.constant 0 : index
    %487 = vector.load %arg3[%c1_207, %c0_208, %c0_209] : memref<2x32x96xf32, #tpu.memory_space<vmem>>, vector<1x32x96xf32>
    %488 = vector.shape_cast %487 : vector<1x32x96xf32> to vector<32x96xf32>
    %cst_210 = arith.constant dense<0.000000e+00> : vector<2x96xf32>
    %489 = tpu.matmul %404, %488, %cst_210 {dimension_numbers = #tpu.dot_dimension_numbers<[1], [0], [0], [1], [0, 0, 1, 1], [], []>} : vector<2x32xf32>, vector<32x96xf32>, vector<2x96xf32> -> vector<2x96xf32>
    %c1_211 = arith.constant 1 : index
    %c0_212 = arith.constant 0 : index
    %c0_213 = arith.constant 0 : index
    %490 = vector.load %arg4[%c1_211, %c0_212, %c0_213] : memref<2x32x96xf32, #tpu.memory_space<vmem>>, vector<1x32x96xf32>
    %491 = vector.shape_cast %490 : vector<1x32x96xf32> to vector<32x96xf32>
    %cst_214 = arith.constant dense<0.000000e+00> : vector<2x96xf32>
    %492 = tpu.matmul %486, %491, %cst_214 {dimension_numbers = #tpu.dot_dimension_numbers<[1], [0], [0], [1], [0, 0, 1, 1], [], []>} : vector<2x32xf32>, vector<32x96xf32>, vector<2x96xf32> -> vector<2x96xf32>
    %493 = arith.addf %492, %489 : vector<2x96xf32>
    %c1_215 = arith.constant 1 : index
    %c0_216 = arith.constant 0 : index
    %c0_217 = arith.constant 0 : index
    %494 = vector.load %arg5[%c1_215, %c0_216, %c0_217] : memref<2x1x96xf32, #tpu.memory_space<vmem>>, vector<1x1x96xf32>
    %495 = vector.shape_cast %494 : vector<1x1x96xf32> to vector<1x96xf32>
    %496 = vector.broadcast %495 : vector<1x96xf32> to vector<2x96xf32>
    %497 = arith.addf %493, %496 : vector<2x96xf32>
    %498 = vector.extract_strided_slice %497 {offsets = [0, 0], sizes = [2, 32], strides = [1, 1]} : vector<2x96xf32> to vector<2x32xf32>
    %499 = vector.extract_strided_slice %497 {offsets = [0, 32], sizes = [2, 32], strides = [1, 1]} : vector<2x96xf32> to vector<2x32xf32>
    %500 = arith.negf %499 : vector<2x32xf32>
    %501 = math.exp %500 : vector<2x32xf32>
    %cst_218 = arith.constant 1.000000e+00 : f32
    %502 = vector.broadcast %cst_218 : f32 to vector<2x32xf32>
    %503 = arith.addf %502, %501 : vector<2x32xf32>
    %504 = arith.divf %502, %503 : vector<2x32xf32>
    %505 = vector.extract_strided_slice %497 {offsets = [0, 64], sizes = [2, 32], strides = [1, 1]} : vector<2x96xf32> to vector<2x32xf32>
    %506 = arith.negf %505 : vector<2x32xf32>
    %507 = math.exp %506 : vector<2x32xf32>
    %cst_219 = arith.constant 1.000000e+00 : f32
    %508 = vector.broadcast %cst_219 : f32 to vector<2x32xf32>
    %509 = arith.addf %508, %507 : vector<2x32xf32>
    %510 = arith.divf %508, %509 : vector<2x32xf32>
    %511 = arith.mulf %504, %498 : vector<2x32xf32>
    %512 = arith.mulf %510, %403 : vector<2x32xf32>
    %513 = arith.addf %511, %512 : vector<2x32xf32>
    %514 = math.tanh %513 : vector<2x32xf32>
    %c0_220 = arith.constant 0 : index
    %c0_221 = arith.constant 0 : index
    %c0_222 = arith.constant 0 : index
    %515 = vector.load %arg7[%c0_220, %c0_221, %c0_222] : memref<2x32x96xf32, #tpu.memory_space<vmem>>, vector<1x32x96xf32>
    %516 = vector.shape_cast %515 : vector<1x32x96xf32> to vector<32x96xf32>
    %cst_223 = arith.constant dense<0.000000e+00> : vector<2x96xf32>
    %517 = tpu.matmul %429, %516, %cst_223 {dimension_numbers = #tpu.dot_dimension_numbers<[1], [0], [0], [1], [0, 0, 1, 1], [], []>} : vector<2x32xf32>, vector<32x96xf32>, vector<2x96xf32> -> vector<2x96xf32>
    %518 = arith.addf %461, %517 : vector<2x96xf32>
    %c0_224 = arith.constant 0 : index
    %c0_225 = arith.constant 0 : index
    %c0_226 = arith.constant 0 : index
    %519 = vector.load %arg9[%c0_224, %c0_225, %c0_226] : memref<2x1x96xf32, #tpu.memory_space<vmem>>, vector<1x1x96xf32>
    %520 = vector.shape_cast %519 : vector<1x1x96xf32> to vector<1x96xf32>
    %521 = vector.broadcast %520 : vector<1x96xf32> to vector<2x96xf32>
    %522 = arith.addf %518, %521 : vector<2x96xf32>
    %523 = vector.extract_strided_slice %522 {offsets = [0, 0], sizes = [2, 32], strides = [1, 1]} : vector<2x96xf32> to vector<2x32xf32>
    %524 = vector.extract_strided_slice %522 {offsets = [0, 32], sizes = [2, 32], strides = [1, 1]} : vector<2x96xf32> to vector<2x32xf32>
    %525 = arith.negf %524 : vector<2x32xf32>
    %526 = math.exp %525 : vector<2x32xf32>
    %cst_227 = arith.constant 1.000000e+00 : f32
    %527 = vector.broadcast %cst_227 : f32 to vector<2x32xf32>
    %528 = arith.addf %527, %526 : vector<2x32xf32>
    %529 = arith.divf %527, %528 : vector<2x32xf32>
    %530 = vector.extract_strided_slice %522 {offsets = [0, 64], sizes = [2, 32], strides = [1, 1]} : vector<2x96xf32> to vector<2x32xf32>
    %531 = arith.negf %530 : vector<2x32xf32>
    %532 = math.exp %531 : vector<2x32xf32>
    %cst_228 = arith.constant 1.000000e+00 : f32
    %533 = vector.broadcast %cst_228 : f32 to vector<2x32xf32>
    %534 = arith.addf %533, %532 : vector<2x32xf32>
    %535 = arith.divf %533, %534 : vector<2x32xf32>
    %536 = arith.mulf %529, %523 : vector<2x32xf32>
    %537 = arith.mulf %535, %428 : vector<2x32xf32>
    %538 = arith.addf %536, %537 : vector<2x32xf32>
    %539 = math.tanh %538 : vector<2x32xf32>
    %c1_229 = arith.constant 1 : index
    %c0_230 = arith.constant 0 : index
    %c0_231 = arith.constant 0 : index
    %540 = vector.load %arg7[%c1_229, %c0_230, %c0_231] : memref<2x32x96xf32, #tpu.memory_space<vmem>>, vector<1x32x96xf32>
    %541 = vector.shape_cast %540 : vector<1x32x96xf32> to vector<32x96xf32>
    %cst_232 = arith.constant dense<0.000000e+00> : vector<2x96xf32>
    %542 = tpu.matmul %457, %541, %cst_232 {dimension_numbers = #tpu.dot_dimension_numbers<[1], [0], [0], [1], [0, 0, 1, 1], [], []>} : vector<2x32xf32>, vector<32x96xf32>, vector<2x96xf32> -> vector<2x96xf32>
    %c1_233 = arith.constant 1 : index
    %c0_234 = arith.constant 0 : index
    %c0_235 = arith.constant 0 : index
    %543 = vector.load %arg8[%c1_233, %c0_234, %c0_235] : memref<2x32x96xf32, #tpu.memory_space<vmem>>, vector<1x32x96xf32>
    %544 = vector.shape_cast %543 : vector<1x32x96xf32> to vector<32x96xf32>
    %cst_236 = arith.constant dense<0.000000e+00> : vector<2x96xf32>
    %545 = tpu.matmul %539, %544, %cst_236 {dimension_numbers = #tpu.dot_dimension_numbers<[1], [0], [0], [1], [0, 0, 1, 1], [], []>} : vector<2x32xf32>, vector<32x96xf32>, vector<2x96xf32> -> vector<2x96xf32>
    %546 = arith.addf %545, %542 : vector<2x96xf32>
    %c1_237 = arith.constant 1 : index
    %c0_238 = arith.constant 0 : index
    %c0_239 = arith.constant 0 : index
    %547 = vector.load %arg9[%c1_237, %c0_238, %c0_239] : memref<2x1x96xf32, #tpu.memory_space<vmem>>, vector<1x1x96xf32>
    %548 = vector.shape_cast %547 : vector<1x1x96xf32> to vector<1x96xf32>
    %549 = vector.broadcast %548 : vector<1x96xf32> to vector<2x96xf32>
    %550 = arith.addf %546, %549 : vector<2x96xf32>
    %551 = vector.extract_strided_slice %550 {offsets = [0, 0], sizes = [2, 32], strides = [1, 1]} : vector<2x96xf32> to vector<2x32xf32>
    %552 = vector.extract_strided_slice %550 {offsets = [0, 32], sizes = [2, 32], strides = [1, 1]} : vector<2x96xf32> to vector<2x32xf32>
    %553 = arith.negf %552 : vector<2x32xf32>
    %554 = math.exp %553 : vector<2x32xf32>
    %cst_240 = arith.constant 1.000000e+00 : f32
    %555 = vector.broadcast %cst_240 : f32 to vector<2x32xf32>
    %556 = arith.addf %555, %554 : vector<2x32xf32>
    %557 = arith.divf %555, %556 : vector<2x32xf32>
    %558 = vector.extract_strided_slice %550 {offsets = [0, 64], sizes = [2, 32], strides = [1, 1]} : vector<2x96xf32> to vector<2x32xf32>
    %559 = arith.negf %558 : vector<2x32xf32>
    %560 = math.exp %559 : vector<2x32xf32>
    %cst_241 = arith.constant 1.000000e+00 : f32
    %561 = vector.broadcast %cst_241 : f32 to vector<2x32xf32>
    %562 = arith.addf %561, %560 : vector<2x32xf32>
    %563 = arith.divf %561, %562 : vector<2x32xf32>
    %564 = arith.mulf %557, %551 : vector<2x32xf32>
    %565 = arith.mulf %563, %456 : vector<2x32xf32>
    %566 = arith.addf %564, %565 : vector<2x32xf32>
    %567 = math.tanh %566 : vector<2x32xf32>
    %c8_242 = arith.constant 8 : index
    %c0_243 = arith.constant 0 : index
    %568 = vector.load %arg17[%c8_242, %c0_243] : memref<16x64xf32, #tpu.memory_space<vmem>>, vector<2x32xf32>
    tpu.vector_store %arg17[%c8_242, %c0_243], %514 {strides = array<i32>} : memref<16x64xf32, #tpu.memory_space<vmem>>, vector<2x32xf32>,
    %c6_244 = arith.constant 6 : index
    %c32_245 = arith.constant 32 : index
    %569 = vector.load %arg17[%c6_244, %c32_245] : memref<16x64xf32, #tpu.memory_space<vmem>>, vector<2x32xf32>
    tpu.vector_store %arg17[%c6_244, %c32_245], %567 {strides = array<i32>} : memref<16x64xf32, #tpu.memory_space<vmem>>, vector<2x32xf32>,
    %570 = vector.extract_strided_slice %7 {offsets = [10, 0], sizes = [2, 96], strides = [1, 1]} : vector<16x192xf32> to vector<2x96xf32>
    %571 = vector.extract_strided_slice %7 {offsets = [4, 96], sizes = [2, 96], strides = [1, 1]} : vector<16x192xf32> to vector<2x96xf32>
    %c0_246 = arith.constant 0 : index
    %c0_247 = arith.constant 0 : index
    %c0_248 = arith.constant 0 : index
    %572 = vector.load %arg3[%c0_246, %c0_247, %c0_248] : memref<2x32x96xf32, #tpu.memory_space<vmem>>, vector<1x32x96xf32>
    %573 = vector.shape_cast %572 : vector<1x32x96xf32> to vector<32x96xf32>
    %cst_249 = arith.constant dense<0.000000e+00> : vector<2x96xf32>
    %574 = tpu.matmul %486, %573, %cst_249 {dimension_numbers = #tpu.dot_dimension_numbers<[1], [0], [0], [1], [0, 0, 1, 1], [], []>} : vector<2x32xf32>, vector<32x96xf32>, vector<2x96xf32> -> vector<2x96xf32>
    %575 = arith.addf %570, %574 : vector<2x96xf32>
    %c0_250 = arith.constant 0 : index
    %c0_251 = arith.constant 0 : index
    %c0_252 = arith.constant 0 : index
    %576 = vector.load %arg5[%c0_250, %c0_251, %c0_252] : memref<2x1x96xf32, #tpu.memory_space<vmem>>, vector<1x1x96xf32>
    %577 = vector.shape_cast %576 : vector<1x1x96xf32> to vector<1x96xf32>
    %578 = vector.broadcast %577 : vector<1x96xf32> to vector<2x96xf32>
    %579 = arith.addf %575, %578 : vector<2x96xf32>
    %580 = vector.extract_strided_slice %579 {offsets = [0, 0], sizes = [2, 32], strides = [1, 1]} : vector<2x96xf32> to vector<2x32xf32>
    %581 = vector.extract_strided_slice %579 {offsets = [0, 32], sizes = [2, 32], strides = [1, 1]} : vector<2x96xf32> to vector<2x32xf32>
    %582 = arith.negf %581 : vector<2x32xf32>
    %583 = math.exp %582 : vector<2x32xf32>
    %cst_253 = arith.constant 1.000000e+00 : f32
    %584 = vector.broadcast %cst_253 : f32 to vector<2x32xf32>
    %585 = arith.addf %584, %583 : vector<2x32xf32>
    %586 = arith.divf %584, %585 : vector<2x32xf32>
    %587 = vector.extract_strided_slice %579 {offsets = [0, 64], sizes = [2, 32], strides = [1, 1]} : vector<2x96xf32> to vector<2x32xf32>
    %588 = arith.negf %587 : vector<2x32xf32>
    %589 = math.exp %588 : vector<2x32xf32>
    %cst_254 = arith.constant 1.000000e+00 : f32
    %590 = vector.broadcast %cst_254 : f32 to vector<2x32xf32>
    %591 = arith.addf %590, %589 : vector<2x32xf32>
    %592 = arith.divf %590, %591 : vector<2x32xf32>
    %593 = arith.mulf %586, %580 : vector<2x32xf32>
    %594 = arith.mulf %592, %485 : vector<2x32xf32>
    %595 = arith.addf %593, %594 : vector<2x32xf32>
    %596 = math.tanh %595 : vector<2x32xf32>
    %c1_255 = arith.constant 1 : index
    %c0_256 = arith.constant 0 : index
    %c0_257 = arith.constant 0 : index
    %597 = vector.load %arg3[%c1_255, %c0_256, %c0_257] : memref<2x32x96xf32, #tpu.memory_space<vmem>>, vector<1x32x96xf32>
    %598 = vector.shape_cast %597 : vector<1x32x96xf32> to vector<32x96xf32>
    %cst_258 = arith.constant dense<0.000000e+00> : vector<2x96xf32>
    %599 = tpu.matmul %514, %598, %cst_258 {dimension_numbers = #tpu.dot_dimension_numbers<[1], [0], [0], [1], [0, 0, 1, 1], [], []>} : vector<2x32xf32>, vector<32x96xf32>, vector<2x96xf32> -> vector<2x96xf32>
    %c1_259 = arith.constant 1 : index
    %c0_260 = arith.constant 0 : index
    %c0_261 = arith.constant 0 : index
    %600 = vector.load %arg4[%c1_259, %c0_260, %c0_261] : memref<2x32x96xf32, #tpu.memory_space<vmem>>, vector<1x32x96xf32>
    %601 = vector.shape_cast %600 : vector<1x32x96xf32> to vector<32x96xf32>
    %cst_262 = arith.constant dense<0.000000e+00> : vector<2x96xf32>
    %602 = tpu.matmul %596, %601, %cst_262 {dimension_numbers = #tpu.dot_dimension_numbers<[1], [0], [0], [1], [0, 0, 1, 1], [], []>} : vector<2x32xf32>, vector<32x96xf32>, vector<2x96xf32> -> vector<2x96xf32>
    %603 = arith.addf %602, %599 : vector<2x96xf32>
    %c1_263 = arith.constant 1 : index
    %c0_264 = arith.constant 0 : index
    %c0_265 = arith.constant 0 : index
    %604 = vector.load %arg5[%c1_263, %c0_264, %c0_265] : memref<2x1x96xf32, #tpu.memory_space<vmem>>, vector<1x1x96xf32>
    %605 = vector.shape_cast %604 : vector<1x1x96xf32> to vector<1x96xf32>
    %606 = vector.broadcast %605 : vector<1x96xf32> to vector<2x96xf32>
    %607 = arith.addf %603, %606 : vector<2x96xf32>
    %608 = vector.extract_strided_slice %607 {offsets = [0, 0], sizes = [2, 32], strides = [1, 1]} : vector<2x96xf32> to vector<2x32xf32>
    %609 = vector.extract_strided_slice %607 {offsets = [0, 32], sizes = [2, 32], strides = [1, 1]} : vector<2x96xf32> to vector<2x32xf32>
    %610 = arith.negf %609 : vector<2x32xf32>
    %611 = math.exp %610 : vector<2x32xf32>
    %cst_266 = arith.constant 1.000000e+00 : f32
    %612 = vector.broadcast %cst_266 : f32 to vector<2x32xf32>
    %613 = arith.addf %612, %611 : vector<2x32xf32>
    %614 = arith.divf %612, %613 : vector<2x32xf32>
    %615 = vector.extract_strided_slice %607 {offsets = [0, 64], sizes = [2, 32], strides = [1, 1]} : vector<2x96xf32> to vector<2x32xf32>
    %616 = arith.negf %615 : vector<2x32xf32>
    %617 = math.exp %616 : vector<2x32xf32>
    %cst_267 = arith.constant 1.000000e+00 : f32
    %618 = vector.broadcast %cst_267 : f32 to vector<2x32xf32>
    %619 = arith.addf %618, %617 : vector<2x32xf32>
    %620 = arith.divf %618, %619 : vector<2x32xf32>
    %621 = arith.mulf %614, %608 : vector<2x32xf32>
    %622 = arith.mulf %620, %513 : vector<2x32xf32>
    %623 = arith.addf %621, %622 : vector<2x32xf32>
    %624 = math.tanh %623 : vector<2x32xf32>
    %c0_268 = arith.constant 0 : index
    %c0_269 = arith.constant 0 : index
    %c0_270 = arith.constant 0 : index
    %625 = vector.load %arg7[%c0_268, %c0_269, %c0_270] : memref<2x32x96xf32, #tpu.memory_space<vmem>>, vector<1x32x96xf32>
    %626 = vector.shape_cast %625 : vector<1x32x96xf32> to vector<32x96xf32>
    %cst_271 = arith.constant dense<0.000000e+00> : vector<2x96xf32>
    %627 = tpu.matmul %539, %626, %cst_271 {dimension_numbers = #tpu.dot_dimension_numbers<[1], [0], [0], [1], [0, 0, 1, 1], [], []>} : vector<2x32xf32>, vector<32x96xf32>, vector<2x96xf32> -> vector<2x96xf32>
    %628 = arith.addf %571, %627 : vector<2x96xf32>
    %c0_272 = arith.constant 0 : index
    %c0_273 = arith.constant 0 : index
    %c0_274 = arith.constant 0 : index
    %629 = vector.load %arg9[%c0_272, %c0_273, %c0_274] : memref<2x1x96xf32, #tpu.memory_space<vmem>>, vector<1x1x96xf32>
    %630 = vector.shape_cast %629 : vector<1x1x96xf32> to vector<1x96xf32>
    %631 = vector.broadcast %630 : vector<1x96xf32> to vector<2x96xf32>
    %632 = arith.addf %628, %631 : vector<2x96xf32>
    %633 = vector.extract_strided_slice %632 {offsets = [0, 0], sizes = [2, 32], strides = [1, 1]} : vector<2x96xf32> to vector<2x32xf32>
    %634 = vector.extract_strided_slice %632 {offsets = [0, 32], sizes = [2, 32], strides = [1, 1]} : vector<2x96xf32> to vector<2x32xf32>
    %635 = arith.negf %634 : vector<2x32xf32>
    %636 = math.exp %635 : vector<2x32xf32>
    %cst_275 = arith.constant 1.000000e+00 : f32
    %637 = vector.broadcast %cst_275 : f32 to vector<2x32xf32>
    %638 = arith.addf %637, %636 : vector<2x32xf32>
    %639 = arith.divf %637, %638 : vector<2x32xf32>
    %640 = vector.extract_strided_slice %632 {offsets = [0, 64], sizes = [2, 32], strides = [1, 1]} : vector<2x96xf32> to vector<2x32xf32>
    %641 = arith.negf %640 : vector<2x32xf32>
    %642 = math.exp %641 : vector<2x32xf32>
    %cst_276 = arith.constant 1.000000e+00 : f32
    %643 = vector.broadcast %cst_276 : f32 to vector<2x32xf32>
    %644 = arith.addf %643, %642 : vector<2x32xf32>
    %645 = arith.divf %643, %644 : vector<2x32xf32>
    %646 = arith.mulf %639, %633 : vector<2x32xf32>
    %647 = arith.mulf %645, %538 : vector<2x32xf32>
    %648 = arith.addf %646, %647 : vector<2x32xf32>
    %649 = math.tanh %648 : vector<2x32xf32>
    %c1_277 = arith.constant 1 : index
    %c0_278 = arith.constant 0 : index
    %c0_279 = arith.constant 0 : index
    %650 = vector.load %arg7[%c1_277, %c0_278, %c0_279] : memref<2x32x96xf32, #tpu.memory_space<vmem>>, vector<1x32x96xf32>
    %651 = vector.shape_cast %650 : vector<1x32x96xf32> to vector<32x96xf32>
    %cst_280 = arith.constant dense<0.000000e+00> : vector<2x96xf32>
    %652 = tpu.matmul %567, %651, %cst_280 {dimension_numbers = #tpu.dot_dimension_numbers<[1], [0], [0], [1], [0, 0, 1, 1], [], []>} : vector<2x32xf32>, vector<32x96xf32>, vector<2x96xf32> -> vector<2x96xf32>
    %c1_281 = arith.constant 1 : index
    %c0_282 = arith.constant 0 : index
    %c0_283 = arith.constant 0 : index
    %653 = vector.load %arg8[%c1_281, %c0_282, %c0_283] : memref<2x32x96xf32, #tpu.memory_space<vmem>>, vector<1x32x96xf32>
    %654 = vector.shape_cast %653 : vector<1x32x96xf32> to vector<32x96xf32>
    %cst_284 = arith.constant dense<0.000000e+00> : vector<2x96xf32>
    %655 = tpu.matmul %649, %654, %cst_284 {dimension_numbers = #tpu.dot_dimension_numbers<[1], [0], [0], [1], [0, 0, 1, 1], [], []>} : vector<2x32xf32>, vector<32x96xf32>, vector<2x96xf32> -> vector<2x96xf32>
    %656 = arith.addf %655, %652 : vector<2x96xf32>
    %c1_285 = arith.constant 1 : index
    %c0_286 = arith.constant 0 : index
    %c0_287 = arith.constant 0 : index
    %657 = vector.load %arg9[%c1_285, %c0_286, %c0_287] : memref<2x1x96xf32, #tpu.memory_space<vmem>>, vector<1x1x96xf32>
    %658 = vector.shape_cast %657 : vector<1x1x96xf32> to vector<1x96xf32>
    %659 = vector.broadcast %658 : vector<1x96xf32> to vector<2x96xf32>
    %660 = arith.addf %656, %659 : vector<2x96xf32>
    %661 = vector.extract_strided_slice %660 {offsets = [0, 0], sizes = [2, 32], strides = [1, 1]} : vector<2x96xf32> to vector<2x32xf32>
    %662 = vector.extract_strided_slice %660 {offsets = [0, 32], sizes = [2, 32], strides = [1, 1]} : vector<2x96xf32> to vector<2x32xf32>
    %663 = arith.negf %662 : vector<2x32xf32>
    %664 = math.exp %663 : vector<2x32xf32>
    %cst_288 = arith.constant 1.000000e+00 : f32
    %665 = vector.broadcast %cst_288 : f32 to vector<2x32xf32>
    %666 = arith.addf %665, %664 : vector<2x32xf32>
    %667 = arith.divf %665, %666 : vector<2x32xf32>
    %668 = vector.extract_strided_slice %660 {offsets = [0, 64], sizes = [2, 32], strides = [1, 1]} : vector<2x96xf32> to vector<2x32xf32>
    %669 = arith.negf %668 : vector<2x32xf32>
    %670 = math.exp %669 : vector<2x32xf32>
    %cst_289 = arith.constant 1.000000e+00 : f32
    %671 = vector.broadcast %cst_289 : f32 to vector<2x32xf32>
    %672 = arith.addf %671, %670 : vector<2x32xf32>
    %673 = arith.divf %671, %672 : vector<2x32xf32>
    %674 = arith.mulf %667, %661 : vector<2x32xf32>
    %675 = arith.mulf %673, %566 : vector<2x32xf32>
    %676 = arith.addf %674, %675 : vector<2x32xf32>
    %677 = math.tanh %676 : vector<2x32xf32>
    %c10_290 = arith.constant 10 : index
    %c0_291 = arith.constant 0 : index
    %678 = vector.load %arg17[%c10_290, %c0_291] : memref<16x64xf32, #tpu.memory_space<vmem>>, vector<2x32xf32>
    tpu.vector_store %arg17[%c10_290, %c0_291], %624 {strides = array<i32>} : memref<16x64xf32, #tpu.memory_space<vmem>>, vector<2x32xf32>,
    %c4_292 = arith.constant 4 : index
    %c32_293 = arith.constant 32 : index
    %679 = vector.load %arg17[%c4_292, %c32_293] : memref<16x64xf32, #tpu.memory_space<vmem>>, vector<2x32xf32>
    tpu.vector_store %arg17[%c4_292, %c32_293], %677 {strides = array<i32>} : memref<16x64xf32, #tpu.memory_space<vmem>>, vector<2x32xf32>,
    %680 = vector.extract_strided_slice %7 {offsets = [12, 0], sizes = [2, 96], strides = [1, 1]} : vector<16x192xf32> to vector<2x96xf32>
    %681 = vector.extract_strided_slice %7 {offsets = [2, 96], sizes = [2, 96], strides = [1, 1]} : vector<16x192xf32> to vector<2x96xf32>
    %c0_294 = arith.constant 0 : index
    %c0_295 = arith.constant 0 : index
    %c0_296 = arith.constant 0 : index
    %682 = vector.load %arg3[%c0_294, %c0_295, %c0_296] : memref<2x32x96xf32, #tpu.memory_space<vmem>>, vector<1x32x96xf32>
    %683 = vector.shape_cast %682 : vector<1x32x96xf32> to vector<32x96xf32>
    %cst_297 = arith.constant dense<0.000000e+00> : vector<2x96xf32>
    %684 = tpu.matmul %596, %683, %cst_297 {dimension_numbers = #tpu.dot_dimension_numbers<[1], [0], [0], [1], [0, 0, 1, 1], [], []>} : vector<2x32xf32>, vector<32x96xf32>, vector<2x96xf32> -> vector<2x96xf32>
    %685 = arith.addf %680, %684 : vector<2x96xf32>
    %c0_298 = arith.constant 0 : index
    %c0_299 = arith.constant 0 : index
    %c0_300 = arith.constant 0 : index
    %686 = vector.load %arg5[%c0_298, %c0_299, %c0_300] : memref<2x1x96xf32, #tpu.memory_space<vmem>>, vector<1x1x96xf32>
    %687 = vector.shape_cast %686 : vector<1x1x96xf32> to vector<1x96xf32>
    %688 = vector.broadcast %687 : vector<1x96xf32> to vector<2x96xf32>
    %689 = arith.addf %685, %688 : vector<2x96xf32>
    %690 = vector.extract_strided_slice %689 {offsets = [0, 0], sizes = [2, 32], strides = [1, 1]} : vector<2x96xf32> to vector<2x32xf32>
    %691 = vector.extract_strided_slice %689 {offsets = [0, 32], sizes = [2, 32], strides = [1, 1]} : vector<2x96xf32> to vector<2x32xf32>
    %692 = arith.negf %691 : vector<2x32xf32>
    %693 = math.exp %692 : vector<2x32xf32>
    %cst_301 = arith.constant 1.000000e+00 : f32
    %694 = vector.broadcast %cst_301 : f32 to vector<2x32xf32>
    %695 = arith.addf %694, %693 : vector<2x32xf32>
    %696 = arith.divf %694, %695 : vector<2x32xf32>
    %697 = vector.extract_strided_slice %689 {offsets = [0, 64], sizes = [2, 32], strides = [1, 1]} : vector<2x96xf32> to vector<2x32xf32>
    %698 = arith.negf %697 : vector<2x32xf32>
    %699 = math.exp %698 : vector<2x32xf32>
    %cst_302 = arith.constant 1.000000e+00 : f32
    %700 = vector.broadcast %cst_302 : f32 to vector<2x32xf32>
    %701 = arith.addf %700, %699 : vector<2x32xf32>
    %702 = arith.divf %700, %701 : vector<2x32xf32>
    %703 = arith.mulf %696, %690 : vector<2x32xf32>
    %704 = arith.mulf %702, %595 : vector<2x32xf32>
    %705 = arith.addf %703, %704 : vector<2x32xf32>
    %706 = math.tanh %705 : vector<2x32xf32>
    %c1_303 = arith.constant 1 : index
    %c0_304 = arith.constant 0 : index
    %c0_305 = arith.constant 0 : index
    %707 = vector.load %arg3[%c1_303, %c0_304, %c0_305] : memref<2x32x96xf32, #tpu.memory_space<vmem>>, vector<1x32x96xf32>
    %708 = vector.shape_cast %707 : vector<1x32x96xf32> to vector<32x96xf32>
    %cst_306 = arith.constant dense<0.000000e+00> : vector<2x96xf32>
    %709 = tpu.matmul %624, %708, %cst_306 {dimension_numbers = #tpu.dot_dimension_numbers<[1], [0], [0], [1], [0, 0, 1, 1], [], []>} : vector<2x32xf32>, vector<32x96xf32>, vector<2x96xf32> -> vector<2x96xf32>
    %c1_307 = arith.constant 1 : index
    %c0_308 = arith.constant 0 : index
    %c0_309 = arith.constant 0 : index
    %710 = vector.load %arg4[%c1_307, %c0_308, %c0_309] : memref<2x32x96xf32, #tpu.memory_space<vmem>>, vector<1x32x96xf32>
    %711 = vector.shape_cast %710 : vector<1x32x96xf32> to vector<32x96xf32>
    %cst_310 = arith.constant dense<0.000000e+00> : vector<2x96xf32>
    %712 = tpu.matmul %706, %711, %cst_310 {dimension_numbers = #tpu.dot_dimension_numbers<[1], [0], [0], [1], [0, 0, 1, 1], [], []>} : vector<2x32xf32>, vector<32x96xf32>, vector<2x96xf32> -> vector<2x96xf32>
    %713 = arith.addf %712, %709 : vector<2x96xf32>
    %c1_311 = arith.constant 1 : index
    %c0_312 = arith.constant 0 : index
    %c0_313 = arith.constant 0 : index
    %714 = vector.load %arg5[%c1_311, %c0_312, %c0_313] : memref<2x1x96xf32, #tpu.memory_space<vmem>>, vector<1x1x96xf32>
    %715 = vector.shape_cast %714 : vector<1x1x96xf32> to vector<1x96xf32>
    %716 = vector.broadcast %715 : vector<1x96xf32> to vector<2x96xf32>
    %717 = arith.addf %713, %716 : vector<2x96xf32>
    %718 = vector.extract_strided_slice %717 {offsets = [0, 0], sizes = [2, 32], strides = [1, 1]} : vector<2x96xf32> to vector<2x32xf32>
    %719 = vector.extract_strided_slice %717 {offsets = [0, 32], sizes = [2, 32], strides = [1, 1]} : vector<2x96xf32> to vector<2x32xf32>
    %720 = arith.negf %719 : vector<2x32xf32>
    %721 = math.exp %720 : vector<2x32xf32>
    %cst_314 = arith.constant 1.000000e+00 : f32
    %722 = vector.broadcast %cst_314 : f32 to vector<2x32xf32>
    %723 = arith.addf %722, %721 : vector<2x32xf32>
    %724 = arith.divf %722, %723 : vector<2x32xf32>
    %725 = vector.extract_strided_slice %717 {offsets = [0, 64], sizes = [2, 32], strides = [1, 1]} : vector<2x96xf32> to vector<2x32xf32>
    %726 = arith.negf %725 : vector<2x32xf32>
    %727 = math.exp %726 : vector<2x32xf32>
    %cst_315 = arith.constant 1.000000e+00 : f32
    %728 = vector.broadcast %cst_315 : f32 to vector<2x32xf32>
    %729 = arith.addf %728, %727 : vector<2x32xf32>
    %730 = arith.divf %728, %729 : vector<2x32xf32>
    %731 = arith.mulf %724, %718 : vector<2x32xf32>
    %732 = arith.mulf %730, %623 : vector<2x32xf32>
    %733 = arith.addf %731, %732 : vector<2x32xf32>
    %734 = math.tanh %733 : vector<2x32xf32>
    %c0_316 = arith.constant 0 : index
    %c0_317 = arith.constant 0 : index
    %c0_318 = arith.constant 0 : index
    %735 = vector.load %arg7[%c0_316, %c0_317, %c0_318] : memref<2x32x96xf32, #tpu.memory_space<vmem>>, vector<1x32x96xf32>
    %736 = vector.shape_cast %735 : vector<1x32x96xf32> to vector<32x96xf32>
    %cst_319 = arith.constant dense<0.000000e+00> : vector<2x96xf32>
    %737 = tpu.matmul %649, %736, %cst_319 {dimension_numbers = #tpu.dot_dimension_numbers<[1], [0], [0], [1], [0, 0, 1, 1], [], []>} : vector<2x32xf32>, vector<32x96xf32>, vector<2x96xf32> -> vector<2x96xf32>
    %738 = arith.addf %681, %737 : vector<2x96xf32>
    %c0_320 = arith.constant 0 : index
    %c0_321 = arith.constant 0 : index
    %c0_322 = arith.constant 0 : index
    %739 = vector.load %arg9[%c0_320, %c0_321, %c0_322] : memref<2x1x96xf32, #tpu.memory_space<vmem>>, vector<1x1x96xf32>
    %740 = vector.shape_cast %739 : vector<1x1x96xf32> to vector<1x96xf32>
    %741 = vector.broadcast %740 : vector<1x96xf32> to vector<2x96xf32>
    %742 = arith.addf %738, %741 : vector<2x96xf32>
    %743 = vector.extract_strided_slice %742 {offsets = [0, 0], sizes = [2, 32], strides = [1, 1]} : vector<2x96xf32> to vector<2x32xf32>
    %744 = vector.extract_strided_slice %742 {offsets = [0, 32], sizes = [2, 32], strides = [1, 1]} : vector<2x96xf32> to vector<2x32xf32>
    %745 = arith.negf %744 : vector<2x32xf32>
    %746 = math.exp %745 : vector<2x32xf32>
    %cst_323 = arith.constant 1.000000e+00 : f32
    %747 = vector.broadcast %cst_323 : f32 to vector<2x32xf32>
    %748 = arith.addf %747, %746 : vector<2x32xf32>
    %749 = arith.divf %747, %748 : vector<2x32xf32>
    %750 = vector.extract_strided_slice %742 {offsets = [0, 64], sizes = [2, 32], strides = [1, 1]} : vector<2x96xf32> to vector<2x32xf32>
    %751 = arith.negf %750 : vector<2x32xf32>
    %752 = math.exp %751 : vector<2x32xf32>
    %cst_324 = arith.constant 1.000000e+00 : f32
    %753 = vector.broadcast %cst_324 : f32 to vector<2x32xf32>
    %754 = arith.addf %753, %752 : vector<2x32xf32>
    %755 = arith.divf %753, %754 : vector<2x32xf32>
    %756 = arith.mulf %749, %743 : vector<2x32xf32>
    %757 = arith.mulf %755, %648 : vector<2x32xf32>
    %758 = arith.addf %756, %757 : vector<2x32xf32>
    %759 = math.tanh %758 : vector<2x32xf32>
    %c1_325 = arith.constant 1 : index
    %c0_326 = arith.constant 0 : index
    %c0_327 = arith.constant 0 : index
    %760 = vector.load %arg7[%c1_325, %c0_326, %c0_327] : memref<2x32x96xf32, #tpu.memory_space<vmem>>, vector<1x32x96xf32>
    %761 = vector.shape_cast %760 : vector<1x32x96xf32> to vector<32x96xf32>
    %cst_328 = arith.constant dense<0.000000e+00> : vector<2x96xf32>
    %762 = tpu.matmul %677, %761, %cst_328 {dimension_numbers = #tpu.dot_dimension_numbers<[1], [0], [0], [1], [0, 0, 1, 1], [], []>} : vector<2x32xf32>, vector<32x96xf32>, vector<2x96xf32> -> vector<2x96xf32>
    %c1_329 = arith.constant 1 : index
    %c0_330 = arith.constant 0 : index
    %c0_331 = arith.constant 0 : index
    %763 = vector.load %arg8[%c1_329, %c0_330, %c0_331] : memref<2x32x96xf32, #tpu.memory_space<vmem>>, vector<1x32x96xf32>
    %764 = vector.shape_cast %763 : vector<1x32x96xf32> to vector<32x96xf32>
    %cst_332 = arith.constant dense<0.000000e+00> : vector<2x96xf32>
    %765 = tpu.matmul %759, %764, %cst_332 {dimension_numbers = #tpu.dot_dimension_numbers<[1], [0], [0], [1], [0, 0, 1, 1], [], []>} : vector<2x32xf32>, vector<32x96xf32>, vector<2x96xf32> -> vector<2x96xf32>
    %766 = arith.addf %765, %762 : vector<2x96xf32>
    %c1_333 = arith.constant 1 : index
    %c0_334 = arith.constant 0 : index
    %c0_335 = arith.constant 0 : index
    %767 = vector.load %arg9[%c1_333, %c0_334, %c0_335] : memref<2x1x96xf32, #tpu.memory_space<vmem>>, vector<1x1x96xf32>
    %768 = vector.shape_cast %767 : vector<1x1x96xf32> to vector<1x96xf32>
    %769 = vector.broadcast %768 : vector<1x96xf32> to vector<2x96xf32>
    %770 = arith.addf %766, %769 : vector<2x96xf32>
    %771 = vector.extract_strided_slice %770 {offsets = [0, 0], sizes = [2, 32], strides = [1, 1]} : vector<2x96xf32> to vector<2x32xf32>
    %772 = vector.extract_strided_slice %770 {offsets = [0, 32], sizes = [2, 32], strides = [1, 1]} : vector<2x96xf32> to vector<2x32xf32>
    %773 = arith.negf %772 : vector<2x32xf32>
    %774 = math.exp %773 : vector<2x32xf32>
    %cst_336 = arith.constant 1.000000e+00 : f32
    %775 = vector.broadcast %cst_336 : f32 to vector<2x32xf32>
    %776 = arith.addf %775, %774 : vector<2x32xf32>
    %777 = arith.divf %775, %776 : vector<2x32xf32>
    %778 = vector.extract_strided_slice %770 {offsets = [0, 64], sizes = [2, 32], strides = [1, 1]} : vector<2x96xf32> to vector<2x32xf32>
    %779 = arith.negf %778 : vector<2x32xf32>
    %780 = math.exp %779 : vector<2x32xf32>
    %cst_337 = arith.constant 1.000000e+00 : f32
    %781 = vector.broadcast %cst_337 : f32 to vector<2x32xf32>
    %782 = arith.addf %781, %780 : vector<2x32xf32>
    %783 = arith.divf %781, %782 : vector<2x32xf32>
    %784 = arith.mulf %777, %771 : vector<2x32xf32>
    %785 = arith.mulf %783, %676 : vector<2x32xf32>
    %786 = arith.addf %784, %785 : vector<2x32xf32>
    %787 = math.tanh %786 : vector<2x32xf32>
    %c12_338 = arith.constant 12 : index
    %c0_339 = arith.constant 0 : index
    %788 = vector.load %arg17[%c12_338, %c0_339] : memref<16x64xf32, #tpu.memory_space<vmem>>, vector<2x32xf32>
    tpu.vector_store %arg17[%c12_338, %c0_339], %734 {strides = array<i32>} : memref<16x64xf32, #tpu.memory_space<vmem>>, vector<2x32xf32>,
    %c2_340 = arith.constant 2 : index
    %c32_341 = arith.constant 32 : index
    %789 = vector.load %arg17[%c2_340, %c32_341] : memref<16x64xf32, #tpu.memory_space<vmem>>, vector<2x32xf32>
    tpu.vector_store %arg17[%c2_340, %c32_341], %787 {strides = array<i32>} : memref<16x64xf32, #tpu.memory_space<vmem>>, vector<2x32xf32>,
    %790 = vector.extract_strided_slice %7 {offsets = [14, 0], sizes = [2, 96], strides = [1, 1]} : vector<16x192xf32> to vector<2x96xf32>
    %791 = vector.extract_strided_slice %7 {offsets = [0, 96], sizes = [2, 96], strides = [1, 1]} : vector<16x192xf32> to vector<2x96xf32>
    %c0_342 = arith.constant 0 : index
    %c0_343 = arith.constant 0 : index
    %c0_344 = arith.constant 0 : index
    %792 = vector.load %arg3[%c0_342, %c0_343, %c0_344] : memref<2x32x96xf32, #tpu.memory_space<vmem>>, vector<1x32x96xf32>
    %793 = vector.shape_cast %792 : vector<1x32x96xf32> to vector<32x96xf32>
    %cst_345 = arith.constant dense<0.000000e+00> : vector<2x96xf32>
    %794 = tpu.matmul %706, %793, %cst_345 {dimension_numbers = #tpu.dot_dimension_numbers<[1], [0], [0], [1], [0, 0, 1, 1], [], []>} : vector<2x32xf32>, vector<32x96xf32>, vector<2x96xf32> -> vector<2x96xf32>
    %795 = arith.addf %790, %794 : vector<2x96xf32>
    %c0_346 = arith.constant 0 : index
    %c0_347 = arith.constant 0 : index
    %c0_348 = arith.constant 0 : index
    %796 = vector.load %arg5[%c0_346, %c0_347, %c0_348] : memref<2x1x96xf32, #tpu.memory_space<vmem>>, vector<1x1x96xf32>
    %797 = vector.shape_cast %796 : vector<1x1x96xf32> to vector<1x96xf32>
    %798 = vector.broadcast %797 : vector<1x96xf32> to vector<2x96xf32>
    %799 = arith.addf %795, %798 : vector<2x96xf32>
    %800 = vector.extract_strided_slice %799 {offsets = [0, 0], sizes = [2, 32], strides = [1, 1]} : vector<2x96xf32> to vector<2x32xf32>
    %801 = vector.extract_strided_slice %799 {offsets = [0, 32], sizes = [2, 32], strides = [1, 1]} : vector<2x96xf32> to vector<2x32xf32>
    %802 = arith.negf %801 : vector<2x32xf32>
    %803 = math.exp %802 : vector<2x32xf32>
    %cst_349 = arith.constant 1.000000e+00 : f32
    %804 = vector.broadcast %cst_349 : f32 to vector<2x32xf32>
    %805 = arith.addf %804, %803 : vector<2x32xf32>
    %806 = arith.divf %804, %805 : vector<2x32xf32>
    %807 = vector.extract_strided_slice %799 {offsets = [0, 64], sizes = [2, 32], strides = [1, 1]} : vector<2x96xf32> to vector<2x32xf32>
    %808 = arith.negf %807 : vector<2x32xf32>
    %809 = math.exp %808 : vector<2x32xf32>
    %cst_350 = arith.constant 1.000000e+00 : f32
    %810 = vector.broadcast %cst_350 : f32 to vector<2x32xf32>
    %811 = arith.addf %810, %809 : vector<2x32xf32>
    %812 = arith.divf %810, %811 : vector<2x32xf32>
    %813 = arith.mulf %806, %800 : vector<2x32xf32>
    %814 = arith.mulf %812, %705 : vector<2x32xf32>
    %815 = arith.addf %813, %814 : vector<2x32xf32>
    %816 = math.tanh %815 : vector<2x32xf32>
    %c1_351 = arith.constant 1 : index
    %c0_352 = arith.constant 0 : index
    %c0_353 = arith.constant 0 : index
    %817 = vector.load %arg3[%c1_351, %c0_352, %c0_353] : memref<2x32x96xf32, #tpu.memory_space<vmem>>, vector<1x32x96xf32>
    %818 = vector.shape_cast %817 : vector<1x32x96xf32> to vector<32x96xf32>
    %cst_354 = arith.constant dense<0.000000e+00> : vector<2x96xf32>
    %819 = tpu.matmul %734, %818, %cst_354 {dimension_numbers = #tpu.dot_dimension_numbers<[1], [0], [0], [1], [0, 0, 1, 1], [], []>} : vector<2x32xf32>, vector<32x96xf32>, vector<2x96xf32> -> vector<2x96xf32>
    %c1_355 = arith.constant 1 : index
    %c0_356 = arith.constant 0 : index
    %c0_357 = arith.constant 0 : index
    %820 = vector.load %arg4[%c1_355, %c0_356, %c0_357] : memref<2x32x96xf32, #tpu.memory_space<vmem>>, vector<1x32x96xf32>
    %821 = vector.shape_cast %820 : vector<1x32x96xf32> to vector<32x96xf32>
    %cst_358 = arith.constant dense<0.000000e+00> : vector<2x96xf32>
    %822 = tpu.matmul %816, %821, %cst_358 {dimension_numbers = #tpu.dot_dimension_numbers<[1], [0], [0], [1], [0, 0, 1, 1], [], []>} : vector<2x32xf32>, vector<32x96xf32>, vector<2x96xf32> -> vector<2x96xf32>
    %823 = arith.addf %822, %819 : vector<2x96xf32>
    %c1_359 = arith.constant 1 : index
    %c0_360 = arith.constant 0 : index
    %c0_361 = arith.constant 0 : index
    %824 = vector.load %arg5[%c1_359, %c0_360, %c0_361] : memref<2x1x96xf32, #tpu.memory_space<vmem>>, vector<1x1x96xf32>
    %825 = vector.shape_cast %824 : vector<1x1x96xf32> to vector<1x96xf32>
    %826 = vector.broadcast %825 : vector<1x96xf32> to vector<2x96xf32>
    %827 = arith.addf %823, %826 : vector<2x96xf32>
    %828 = vector.extract_strided_slice %827 {offsets = [0, 0], sizes = [2, 32], strides = [1, 1]} : vector<2x96xf32> to vector<2x32xf32>
    %829 = vector.extract_strided_slice %827 {offsets = [0, 32], sizes = [2, 32], strides = [1, 1]} : vector<2x96xf32> to vector<2x32xf32>
    %830 = arith.negf %829 : vector<2x32xf32>
    %831 = math.exp %830 : vector<2x32xf32>
    %cst_362 = arith.constant 1.000000e+00 : f32
    %832 = vector.broadcast %cst_362 : f32 to vector<2x32xf32>
    %833 = arith.addf %832, %831 : vector<2x32xf32>
    %834 = arith.divf %832, %833 : vector<2x32xf32>
    %835 = vector.extract_strided_slice %827 {offsets = [0, 64], sizes = [2, 32], strides = [1, 1]} : vector<2x96xf32> to vector<2x32xf32>
    %836 = arith.negf %835 : vector<2x32xf32>
    %837 = math.exp %836 : vector<2x32xf32>
    %cst_363 = arith.constant 1.000000e+00 : f32
    %838 = vector.broadcast %cst_363 : f32 to vector<2x32xf32>
    %839 = arith.addf %838, %837 : vector<2x32xf32>
    %840 = arith.divf %838, %839 : vector<2x32xf32>
    %841 = arith.mulf %834, %828 : vector<2x32xf32>
    %842 = arith.mulf %840, %733 : vector<2x32xf32>
    %843 = arith.addf %841, %842 : vector<2x32xf32>
    %844 = math.tanh %843 : vector<2x32xf32>
    %c0_364 = arith.constant 0 : index
    %c0_365 = arith.constant 0 : index
    %c0_366 = arith.constant 0 : index
    %845 = vector.load %arg7[%c0_364, %c0_365, %c0_366] : memref<2x32x96xf32, #tpu.memory_space<vmem>>, vector<1x32x96xf32>
    %846 = vector.shape_cast %845 : vector<1x32x96xf32> to vector<32x96xf32>
    %cst_367 = arith.constant dense<0.000000e+00> : vector<2x96xf32>
    %847 = tpu.matmul %759, %846, %cst_367 {dimension_numbers = #tpu.dot_dimension_numbers<[1], [0], [0], [1], [0, 0, 1, 1], [], []>} : vector<2x32xf32>, vector<32x96xf32>, vector<2x96xf32> -> vector<2x96xf32>
    %848 = arith.addf %791, %847 : vector<2x96xf32>
    %c0_368 = arith.constant 0 : index
    %c0_369 = arith.constant 0 : index
    %c0_370 = arith.constant 0 : index
    %849 = vector.load %arg9[%c0_368, %c0_369, %c0_370] : memref<2x1x96xf32, #tpu.memory_space<vmem>>, vector<1x1x96xf32>
    %850 = vector.shape_cast %849 : vector<1x1x96xf32> to vector<1x96xf32>
    %851 = vector.broadcast %850 : vector<1x96xf32> to vector<2x96xf32>
    %852 = arith.addf %848, %851 : vector<2x96xf32>
    %853 = vector.extract_strided_slice %852 {offsets = [0, 0], sizes = [2, 32], strides = [1, 1]} : vector<2x96xf32> to vector<2x32xf32>
    %854 = vector.extract_strided_slice %852 {offsets = [0, 32], sizes = [2, 32], strides = [1, 1]} : vector<2x96xf32> to vector<2x32xf32>
    %855 = arith.negf %854 : vector<2x32xf32>
    %856 = math.exp %855 : vector<2x32xf32>
    %cst_371 = arith.constant 1.000000e+00 : f32
    %857 = vector.broadcast %cst_371 : f32 to vector<2x32xf32>
    %858 = arith.addf %857, %856 : vector<2x32xf32>
    %859 = arith.divf %857, %858 : vector<2x32xf32>
    %860 = vector.extract_strided_slice %852 {offsets = [0, 64], sizes = [2, 32], strides = [1, 1]} : vector<2x96xf32> to vector<2x32xf32>
    %861 = arith.negf %860 : vector<2x32xf32>
    %862 = math.exp %861 : vector<2x32xf32>
    %cst_372 = arith.constant 1.000000e+00 : f32
    %863 = vector.broadcast %cst_372 : f32 to vector<2x32xf32>
    %864 = arith.addf %863, %862 : vector<2x32xf32>
    %865 = arith.divf %863, %864 : vector<2x32xf32>
    %866 = arith.mulf %859, %853 : vector<2x32xf32>
    %867 = arith.mulf %865, %758 : vector<2x32xf32>
    %868 = arith.addf %866, %867 : vector<2x32xf32>
    %869 = math.tanh %868 : vector<2x32xf32>
    %c1_373 = arith.constant 1 : index
    %c0_374 = arith.constant 0 : index
    %c0_375 = arith.constant 0 : index
    %870 = vector.load %arg7[%c1_373, %c0_374, %c0_375] : memref<2x32x96xf32, #tpu.memory_space<vmem>>, vector<1x32x96xf32>
    %871 = vector.shape_cast %870 : vector<1x32x96xf32> to vector<32x96xf32>
    %cst_376 = arith.constant dense<0.000000e+00> : vector<2x96xf32>
    %872 = tpu.matmul %787, %871, %cst_376 {dimension_numbers = #tpu.dot_dimension_numbers<[1], [0], [0], [1], [0, 0, 1, 1], [], []>} : vector<2x32xf32>, vector<32x96xf32>, vector<2x96xf32> -> vector<2x96xf32>
    %c1_377 = arith.constant 1 : index
    %c0_378 = arith.constant 0 : index
    %c0_379 = arith.constant 0 : index
    %873 = vector.load %arg8[%c1_377, %c0_378, %c0_379] : memref<2x32x96xf32, #tpu.memory_space<vmem>>, vector<1x32x96xf32>
    %874 = vector.shape_cast %873 : vector<1x32x96xf32> to vector<32x96xf32>
    %cst_380 = arith.constant dense<0.000000e+00> : vector<2x96xf32>
    %875 = tpu.matmul %869, %874, %cst_380 {dimension_numbers = #tpu.dot_dimension_numbers<[1], [0], [0], [1], [0, 0, 1, 1], [], []>} : vector<2x32xf32>, vector<32x96xf32>, vector<2x96xf32> -> vector<2x96xf32>
    %876 = arith.addf %875, %872 : vector<2x96xf32>
    %c1_381 = arith.constant 1 : index
    %c0_382 = arith.constant 0 : index
    %c0_383 = arith.constant 0 : index
    %877 = vector.load %arg9[%c1_381, %c0_382, %c0_383] : memref<2x1x96xf32, #tpu.memory_space<vmem>>, vector<1x1x96xf32>
    %878 = vector.shape_cast %877 : vector<1x1x96xf32> to vector<1x96xf32>
    %879 = vector.broadcast %878 : vector<1x96xf32> to vector<2x96xf32>
    %880 = arith.addf %876, %879 : vector<2x96xf32>
    %881 = vector.extract_strided_slice %880 {offsets = [0, 0], sizes = [2, 32], strides = [1, 1]} : vector<2x96xf32> to vector<2x32xf32>
    %882 = vector.extract_strided_slice %880 {offsets = [0, 32], sizes = [2, 32], strides = [1, 1]} : vector<2x96xf32> to vector<2x32xf32>
    %883 = arith.negf %882 : vector<2x32xf32>
    %884 = math.exp %883 : vector<2x32xf32>
    %cst_384 = arith.constant 1.000000e+00 : f32
    %885 = vector.broadcast %cst_384 : f32 to vector<2x32xf32>
    %886 = arith.addf %885, %884 : vector<2x32xf32>
    %887 = arith.divf %885, %886 : vector<2x32xf32>
    %888 = vector.extract_strided_slice %880 {offsets = [0, 64], sizes = [2, 32], strides = [1, 1]} : vector<2x96xf32> to vector<2x32xf32>
    %889 = arith.negf %888 : vector<2x32xf32>
    %890 = math.exp %889 : vector<2x32xf32>
    %cst_385 = arith.constant 1.000000e+00 : f32
    %891 = vector.broadcast %cst_385 : f32 to vector<2x32xf32>
    %892 = arith.addf %891, %890 : vector<2x32xf32>
    %893 = arith.divf %891, %892 : vector<2x32xf32>
    %894 = arith.mulf %887, %881 : vector<2x32xf32>
    %895 = arith.mulf %893, %786 : vector<2x32xf32>
    %896 = arith.addf %894, %895 : vector<2x32xf32>
    %897 = math.tanh %896 : vector<2x32xf32>
    %c14_386 = arith.constant 14 : index
    %c0_387 = arith.constant 0 : index
    %898 = vector.load %arg17[%c14_386, %c0_387] : memref<16x64xf32, #tpu.memory_space<vmem>>, vector<2x32xf32>
    tpu.vector_store %arg17[%c14_386, %c0_387], %844 {strides = array<i32>} : memref<16x64xf32, #tpu.memory_space<vmem>>, vector<2x32xf32>,
    %c0_388 = arith.constant 0 : index
    %c32_389 = arith.constant 32 : index
    %899 = vector.load %arg17[%c0_388, %c32_389] : memref<16x64xf32, #tpu.memory_space<vmem>>, vector<2x32xf32>
    tpu.vector_store %arg17[%c0_388, %c32_389], %897 {strides = array<i32>} : memref<16x64xf32, #tpu.memory_space<vmem>>, vector<2x32xf32>,
    %c0_390 = arith.constant 0 : index
    %c0_391 = arith.constant 0 : index
    %900 = vector.load %arg17[%c0_390, %c0_391] : memref<16x64xf32, #tpu.memory_space<vmem>>, vector<16x64xf32>
    %c0_392 = arith.constant 0 : index
    %c0_393 = arith.constant 0 : index
    %901 = vector.load %arg10[%c0_392, %c0_393] : memref<64x16xf32, #tpu.memory_space<vmem>>, vector<64x16xf32>
    %cst_394 = arith.constant dense<0.000000e+00> : vector<16x16xf32>
    %902 = tpu.matmul %900, %901, %cst_394 {dimension_numbers = #tpu.dot_dimension_numbers<[1], [0], [0], [1], [0, 0, 1, 1], [], []>} : vector<16x64xf32>, vector<64x16xf32>, vector<16x16xf32> -> vector<16x16xf32>
    %c0_395 = arith.constant 0 : index
    %c0_396 = arith.constant 0 : index
    %903 = vector.load %arg11[%c0_395, %c0_396] : memref<1x16xf32, #tpu.memory_space<vmem>>, vector<1x16xf32>
    %904 = vector.broadcast %903 : vector<1x16xf32> to vector<16x16xf32>
    %905 = arith.addf %902, %904 : vector<16x16xf32>
    %c0_397 = arith.constant 0 : index
    %c0_398 = arith.constant 0 : index
    %906 = vector.load %arg12[%c0_397, %c0_398] : memref<16x3xf32, #tpu.memory_space<vmem>>, vector<16x3xf32>
    %cst_399 = arith.constant dense<0.000000e+00> : vector<16x3xf32>
    %907 = tpu.matmul %905, %906, %cst_399 {dimension_numbers = #tpu.dot_dimension_numbers<[1], [0], [0], [1], [0, 0, 1, 1], [], []>} : vector<16x16xf32>, vector<16x3xf32>, vector<16x3xf32> -> vector<16x3xf32>
    %c0_400 = arith.constant 0 : index
    %c0_401 = arith.constant 0 : index
    %908 = vector.load %arg13[%c0_400, %c0_401] : memref<1x3xf32, #tpu.memory_space<vmem>>, vector<1x3xf32>
    %909 = vector.broadcast %908 : vector<1x3xf32> to vector<16x3xf32>
    %910 = arith.addf %907, %909 : vector<16x3xf32>
    %cst_402 = arith.constant dense<0xFF800000> : vector<16xf32>
    %911 = vector.multi_reduction <maximumf>, %910, %cst_402 [1] : vector<16x3xf32> to vector<16xf32>
    %912 = vector.shape_cast %911 : vector<16xf32> to vector<16x1xf32>
    %913 = vector.broadcast %912 : vector<16x1xf32> to vector<16x3xf32>
    %914 = arith.subf %910, %913 : vector<16x3xf32>
    %915 = math.exp %914 : vector<16x3xf32>
    %cst_403 = arith.constant dense<0.000000e+00> : vector<16xf32>
    %916 = vector.multi_reduction <add>, %915, %cst_403 [1] : vector<16x3xf32> to vector<16xf32>
    %917 = vector.shape_cast %916 : vector<16xf32> to vector<16x1xf32>
    %918 = tpu.reciprocal %917 {approx = true} : vector<16x1xf32> -> vector<16x1xf32>
    %919 = vector.broadcast %918 : vector<16x1xf32> to vector<16x3xf32>
    %920 = arith.mulf %915, %919 : vector<16x3xf32>
    %c0_404 = arith.constant 0 : index
    %c0_405 = arith.constant 0 : index
    %921 = vector.load %arg14[%c0_404, %c0_405] : memref<16x3xf32, #tpu.memory_space<vmem>>, vector<16x3xf32>
    tpu.vector_store %arg14[%c0_404, %c0_405], %920 {strides = array<i32>} : memref<16x3xf32, #tpu.memory_space<vmem>>, vector<16x3xf32>,
    %c0_406 = arith.constant 0 : index
    %c0_407 = arith.constant 0 : index
    %c0_408 = arith.constant 0 : index
    %922 = vector.load %arg15[%c0_406, %c0_407, %c0_408] : memref<2x2x32xf32, #tpu.memory_space<vmem>>, vector<1x2x32xf32>
    %923 = vector.shape_cast %922 : vector<1x2x32xf32> to vector<2x32xf32>
    %924 = vector.shape_cast %815 : vector<2x32xf32> to vector<1x2x32xf32>
    tpu.vector_store %arg15[%c0_406, %c0_407, %c0_408], %924 {strides = array<i32>} : memref<2x2x32xf32, #tpu.memory_space<vmem>>, vector<1x2x32xf32>,
    %c0_409 = arith.constant 0 : index
    %c0_410 = arith.constant 0 : index
    %c0_411 = arith.constant 0 : index
    %925 = vector.load %arg16[%c0_409, %c0_410, %c0_411] : memref<2x2x32xf32, #tpu.memory_space<vmem>>, vector<1x2x32xf32>
    %926 = vector.shape_cast %925 : vector<1x2x32xf32> to vector<2x32xf32>
    %927 = vector.shape_cast %868 : vector<2x32xf32> to vector<1x2x32xf32>
    tpu.vector_store %arg16[%c0_409, %c0_410, %c0_411], %927 {strides = array<i32>} : memref<2x2x32xf32, #tpu.memory_space<vmem>>, vector<1x2x32xf32>,
    %c1_412 = arith.constant 1 : index
    %c0_413 = arith.constant 0 : index
    %c0_414 = arith.constant 0 : index
    %928 = vector.load %arg15[%c1_412, %c0_413, %c0_414] : memref<2x2x32xf32, #tpu.memory_space<vmem>>, vector<1x2x32xf32>
    %929 = vector.shape_cast %928 : vector<1x2x32xf32> to vector<2x32xf32>
    %930 = vector.shape_cast %843 : vector<2x32xf32> to vector<1x2x32xf32>
    tpu.vector_store %arg15[%c1_412, %c0_413, %c0_414], %930 {strides = array<i32>} : memref<2x2x32xf32, #tpu.memory_space<vmem>>, vector<1x2x32xf32>,
    %c1_415 = arith.constant 1 : index
    %c0_416 = arith.constant 0 : index
    %c0_417 = arith.constant 0 : index
    %931 = vector.load %arg16[%c1_415, %c0_416, %c0_417] : memref<2x2x32xf32, #tpu.memory_space<vmem>>, vector<1x2x32xf32>
    %932 = vector.shape_cast %931 : vector<1x2x32xf32> to vector<2x32xf32>
    %933 = vector.shape_cast %896 : vector<2x32xf32> to vector<1x2x32xf32>
    tpu.vector_store %arg16[%c1_415, %c0_416, %c0_417], %933 {strides = array<i32>} : memref<2x2x32xf32, #tpu.memory_space<vmem>>, vector<1x2x32xf32>,
    return
  }
}

</mosaic_0001>

<bundles_post_ra>
// kernel: bi_ran_forward.1
= control target key start
LH: loop header
LB: loop body
LE: loop exit
PB: predicated region body
PF: predicated region fallthrough
CT: control target
= control target key end

     0   :  { %s8118_s0 = inlined_call_operand.vmem [shape: s32[16,1], index: 0, kind: input, shape index: {}]   ;;  %s8119_s1 = inlined_call_operand.vmem [shape: f32[50,192], index: 1, kind: input, shape index: {}]   ;;  %s8120_s2 = inlined_call_operand.vmem [shape: f32[2,2,32], index: 2, kind: input, shape index: {}]   ;;  %s8121_s3 = inlined_call_operand.vmem [shape: f32[2,32,96], index: 3, kind: input, shape index: {}]   ;;  %s8122_s4 = inlined_call_operand.vmem [shape: f32[2,32,96], index: 4, kind: input, shape index: {}]   ;;  %s8123_s5 = inlined_call_operand.vmem [shape: f32[2,1,96], index: 5, kind: input, shape index: {}]   ;;  %s8124_s6 = inlined_call_operand.vmem [shape: f32[2,2,32], index: 6, kind: input, shape index: {}]   ;;  %s8125_s7 = inlined_call_operand.vmem [shape: f32[2,32,96], index: 7, kind: input, shape index: {}]   ;;  %s8126_s8 = inlined_call_operand.vmem [shape: f32[2,32,96], index: 8, kind: input, shape index: {}]   ;;  %s8127_s9 = inlined_call_operand.vmem [shape: f32[2,1,96], index: 9, kind: input, shape index: {}]   ;;  %s8128_s10 = inlined_call_operand.vmem [shape: f32[64,16], index: 10, kind: input, shape index: {}]   ;;  %s8129_s11 = inlined_call_operand.vmem [shape: f32[1,16], index: 11, kind: input, shape index: {}]   ;;  %s8130_s12 = inlined_call_operand.vmem [shape: f32[16,3], index: 12, kind: input, shape index: {}]   ;;  %s8131_s13 = inlined_call_operand.vmem [shape: f32[1,3], index: 13, kind: input, shape index: {}]   ;;  %s8132_s14 = inlined_call_operand.vmem [shape: f32[16,3], index: 14, kind: output, shape index: {0}]   ;;  %s8133_s15 = inlined_call_operand.hbm [shape: f32[2,2,32], index: 15, kind: output, shape index: {1}]   ;;  %s8134_s16 = inlined_call_operand.hbm [shape: f32[2,2,32], index: 16, kind: output, shape index: {2}]  }
   0x1   :  { %8136 = sst [smem:[#allocation9_spill]] %s8118_s0 }
   0x2   :  { %22 = vsyncpa [#allocation4], 0  ;;  %s8137_s23 = sld [smem:[#allocation9_spill]]  ;;  %v81_v1 = vld [vmem:[%s8119_s1 + $0x68] sm:$0x3]  ;;  %vm89_vm0 = vcmask 1041408  }
   0x3   :  { %v79_v2 = vld [vmem:[%s8119_s1 + $0x58] sm:$0xff]  ;;  %v6620_v3 = vmov 0   ;;  %5280 = vmatprep.subr.msk.mxu0 %vm89_vm0, %v81_v1  ;;  %v80_v4 = vld [vmem:[%s8119_s1 + $0x60] sm:$0x3]  ;;  %v78_v5 = vld [vmem:[%s8119_s1 + $0x50] sm:$0xff]  ;;  %v6621_v8 = vmov 0.0  }
   0x4   :  { %6365 = vset.pattern.permute.xlu0 %v6620_v3  ;;  %5281 = vmatpush1.msk.msra.mxu0 %vm89_vm0, %v80_v4  ;;  %v77_v6 = vld [vmem:[%s8119_s1 + $0x48] sm:$0xff]  ;;  %v6735_v7 = vld [vmem:[%s8121_s3 + $0x18] sm:$0xff]  ;;  %v76_v9 = vld [vmem:[%s8119_s1 + $0x40] sm:$0xff] }
   0x5   :  { %116 = vmatprep.subr.mxu0 %v79_v2  ;;  %5802 = vmatprep.subr.mxu1 %v6621_v8  ;;  %v6744_v10 = vld [vmem:[%s8121_s3 + $0x10] sm:$0xff]  ;;  %v75_v11 = vld [vmem:[%s8119_s1 + $0x38] sm:$0xff]  ;;  %v6757_v13 = vld [vmem:[%s8121_s3 + $0x8] sm:$0xff] }
   0x6   :  { %117 = vmatpush1.msra.mxu0 %v78_v5  ;;  %5803 = vmatpush3.msra.mxu1 %v6735_v7  ;;  %v74_v12 = vld [vmem:[%s8119_s1 + $0x30] sm:$0xff]  ;;  %v73_v14 = vld [vmem:[%s8119_s1 + $0x28] sm:$0xff]  ;;  %v173_v15 = vld [vmem:[%s8120_s2] sm:$0x3] }
   0x7   :  { %118 = vmatprep.subr.mxu0 %v77_v6  ;;  %5804 = vmatprep.subr.mxu1 %v6621_v8 }
   0x8   :  { %v52_v0 = vld [vmem:[%s8137_s23] sm:$0xff]  ;;  %119 = vmatpush1.msra.mxu0 %v76_v9  ;;  %5805 = vmatpush3.msra.mxu1 %v6744_v10 }
   0x9   :  { %57 = vperm.xlu0 %6365, %v52_v0  }
   0xa   :  { %23 = vsyncpa [#allocation6], 0  ;;  %120 = vmatprep.subr.mxu0 %v75_v11  ;;  %5806 = vmatprep.subr.mxu1 %v6621_v8  ;;  %v72_v16 = vld [vmem:[%s8119_s1 + $0x20] sm:$0xff]  ;;  %6367 = vtanh.f32 %v173_v15  ;;  %v71_v18 = vld [vmem:[%s8119_s1 + $0x18] sm:$0xff]  ;;  %vm6622_vm1 = vmmov 0   ;;  %s6623_s19 = smov 64   ;;  %v54_v23 = vlaneseq }
   0xb   :  { %v6773_v17 = vld [vmem:[%s8121_s3] sm:$0xff]  ;;  %121 = vmatpush1.msra.mxu0 %v74_v12  ;;  %5807 = vmatpush3.msra.mxu1 %v6757_v13  ;;  %v70_v19 = vld [vmem:[%s8119_s1 + $0x10] sm:$0xff]  ;;  %v69_v20 = vld [vmem:[%s8119_s1 + $0x8] sm:$0xff]  ;;  %vm187_vm2 = vcmask 261120   ;;  %vm82_vm3 = vcmask 408576   ;;  %s6624_s21 = smov 32  }
   0xc   :  { %122 = vmatprep.subr.mxu0 %v73_v14  ;;  %5808 = vmatprep.subr.mxu1 %v6621_v8  ;;  %v68_v21 = vld [vmem:[%s8119_s1] sm:$0xff]  ;;  %v6799_v24 = vand.u32 127, %v54_v23  ;;  %s6625_s22 = smov 96   ;;  %v53_v39 = vld [vmem:[%s8137_s23 + $0x8] sm:$0xff]  ;;  %v6822_v40 = vld [vmem:[%s8121_s3 + $0x38] sm:$0xff]  ;;  %vm791_vm6 = vcmask 254976  }
   0xd   :  { %123 = vmatpush1.msra.mxu0 %v72_v16  ;;  %5809 = vmatpush3.msra.mxu1 %v6773_v17  ;;  %v6810_v30 = vld [vmem:[%s8123_s5] ss:$0 sm:$0xff]  ;;  %v6827_v41 = vld [vmem:[%s8121_s3 + $0x30] sm:$0xff]  ;;  %v6832_v42 = vld [vmem:[%s8125_s7 + $0x38] sm:$0xff]  ;;  %vm793_vm7 = vcmask 517376   ;;  %vm5025_vm8 = vcmask 523264  }
   0xe   :  { %124 = vmatprep.subr.mxu0 %v71_v18  ;;  %5810 = vmatprep.mubr.msk.f32.mxu1 %vm6622_vm1, %v6621_v8  ;;  %v6838_v43 = vld [vmem:[%s8125_s7 + $0x30] sm:$0xff]  ;;  %v6845_v44 = vld [vmem:[%s8121_s3 + $0x28] sm:$0xff]  ;;  %v5284_v45 = vld [vmem:[%s8120_s2 + $0x2] sm:$0x3]  ;;  %vm5116_vm9 = vcmask 130048   ;;  %vm5198_vm10 = vcmask 23552  }
   0xf   :  { %125 = vmatpush1.msra.mxu0 %v70_v19  ;;  %160 = vmatprep.mubr.f32.mxu0 %v6621_v8  ;;  %v6855_v46 = vld [vmem:[%s8125_s7 + $0x28] sm:$0xff]  ;;  %v6862_v47 = vld [vmem:[%s8121_s3 + $0x20] sm:$0xff]  ;;  %v6881_v49 = vld [vmem:[%s8122_s4 + $0x38] sm:$0xff]  ;;  %vm5227_vm11 = vcmask 261126  }
  0x10   :  { %126 = vmatprep.subr.mxu0 %v69_v20  ;;  %282 = vrot.lane.b32.xlu0 %v173_v15, %s6623_s19  ;;  %v6869_v48 = vld [vmem:[%s8125_s7 + $0x20] sm:$0xff]  ;;  %v6887_v51 = vld [vmem:[%s8122_s4 + $0x30] sm:$0xff]  ;;  %v6896_v52 = vld [vmem:[%s8122_s4 + $0x28] sm:$0xff] }
  0x11   :  { %127 = vmatpush1.msra.mxu0 %v68_v21  ;;  %6366 = vset.pattern.permute.xlu1 %v6620_v3  ;;  %v6903_v53 = vld [vmem:[%s8122_s4 + $0x20] sm:$0xff]  ;;  %v6942_v2 = vld [vmem:[%s8125_s7 + $0x18] sm:$0xff]  ;;  %v6949_v4 = vld [vmem:[%s8125_s7 + $0x10] sm:$0xff] }
  0x12   :  { %5813 = vmatprep.subr.mxu1 %v6621_v8  ;;  %5846 = vmatprep.subr.mxu0 %v6621_v8  ;;  %v6914_v58 = vld [vmem:[%s8124_s6 + $0x2] sm:$0x3]  ;;  %v176_v1 = vld [vmem:[%s8124_s6] sm:$0x3]  ;;  %v6958_v5 = vld [vmem:[%s8125_s7 + $0x8] sm:$0xff] }
  0x13   :  { %v6967_v6 = vld [vmem:[%s8125_s7] sm:$0xff] }
  0x14   :  { %v6987_v11 = vld [vmem:[%s8127_s9] ss:$0 sm:$0xff]  ;;  %v7002_v20 = vld [vmem:[%s8123_s5 + $0x1] ss:$0 sm:$0xff] }
  0x17   :  { %v6368_v22 = vpop.eup %6367 }
  0x18   :  { %5811 = vmatmul.mubr.msk.f32.vlgmr.msra.gmra.mxu1 %vm187_vm2, %v6368_v22 }
  0x19   :  { %5821 = vmatprep.mubr.msk.f32.mxu1 %vm6622_vm1, %v6621_v8  ;;  %5814 = vmatpush3.msra.mxu1 %v6822_v40 }
  0x1a   :  { %5815 = vmatprep.subr.mxu1 %v6621_v8 }
  0x1b   :  { %5816 = vmatpush3.msra.mxu1 %v6827_v41 }
  0x1c   :  { %5817 = vmatprep.subr.mxu1 %v6621_v8 }
  0x1d   :  { %5818 = vmatpush3.msra.mxu1 %v6845_v44 }
  0x1e   :  { %5819 = vmatprep.subr.mxu1 %v6621_v8 }
  0x1f   :  { %5820 = vmatpush3.msra.mxu1 %v6862_v47 }
  0x20   :  { %5824 = vmatprep.subr.mxu1 %v6621_v8 }
  0x84   :  { %v58_v25 = vpop.permute.xlu0 %57 }
  0x85   :  { %vm62_vm4 = vcmp.eq.s32.totalorder %v6799_v24, %v58_v25 }
  0x86   :  { %v5278_v26 = vsel %vm62_vm4, 1.0, %v6621_v8 }
  0x87   :  { %5282 = vmatmul.mubr.msk.f32.vlgmr.msra.gmra.mxu0 %vm82_vm3, %v5278_v26 }
  0x88   :  { %166 = vmatprep.mubr.f32.mxu0 %v6621_v8  ;;  %v283_v36 = vpop.permute.xlu0 %282  ;;  %5847 = vmatpush3.msra.mxu0 %v6832_v42 }
  0x89   :  { %5848 = vmatprep.subr.mxu0 %v6621_v8 }
  0x8a   :  { %5849 = vmatpush3.msra.mxu0 %v6838_v43 }
  0x8b   :  { %5850 = vmatprep.subr.mxu0 %v6621_v8 }
  0x8c   :  { %5851 = vmatpush3.msra.mxu0 %v6855_v46 }
  0x8d   :  { %5852 = vmatprep.subr.mxu0 %v6621_v8 }
  0x8e   :  { %5853 = vmatpush3.msra.mxu0 %v6869_v48 }
  0x8f   :  { %5868 = vmatprep.subr.mxu0 %v6621_v8 }
  0xd8   :  { %v257_v27 = vpop.f32.mrf.mxu1 }
  0xda   :  { %v5812_v28 = vpop.f32.mrf.mxu1 }
 0x147   :  { %v6805_v29 = vpop.f32.mrf.mxu0 }
 0x148   :  { %v261_v31 = vadd.f32 %v257_v27, %v6805_v29 }
 0x149   :  { %v6991_v12 = vpop.f32.mrf.mxu0 }
 0x14a   :  { %v269_v32 = vadd.f32 %v6810_v30, %v261_v31 }
 0x14c   :  { %277 = vrot.lane.b32.xlu1 %v269_v32, %s6624_s21  ;;  %v5288_v33 = vmul.f32 -1.442695, %v269_v32  ;;  %v588_v32 = vrot.slane %v176_v1, 2 }
 0x14e   :  { %6369 = vpow2.f32 %v5288_v33 }
 0x15b   :  { %v6370_v34 = vpop.eup %6369 }
 0x15c   :  { %v273_v35 = vadd.f32 1.0, %v6370_v34 }
 0x15e   :  { %6371 = vrcp.f32 %v273_v35 }
 0x15f   :  { %6373 = vtanh.f32 %v5284_v45 }
 0x16b   :  { %v6372_v37 = vpop.eup %6371 }
 0x16c   :  { %v285_v38 = vmul.f32 %v6372_v37, %v283_v36  ;;  %v6374_v50 = vpop.eup %6373 }
 0x16d   :  { %5822 = vmatmul.mubr.msk.f32.vlgmr.msra.gmra.mxu1 %vm187_vm2, %v6374_v50 }
 0x16e   :  { %287 = vrot.lane.b32.xlu1 %v285_v38, %s6625_s22  ;;  %5825 = vmatpush3.msra.mxu1 %v6881_v49 }
 0x16f   :  { %5832 = vmatprep.mubr.msk.f32.mxu1 %vm6622_vm1, %v6621_v8  ;;  %5826 = vmatprep.subr.mxu1 %v6621_v8 }
 0x170   :  { %5827 = vmatpush3.msra.mxu1 %v6887_v51 }
 0x171   :  { %5828 = vmatprep.subr.mxu1 %v6621_v8 }
 0x172   :  { %60 = vperm.xlu1 %6366, %v53_v39   ;;  %5829 = vmatpush3.msra.mxu1 %v6896_v52 }
 0x173   :  { %5830 = vmatprep.subr.mxu1 %v6621_v8 }
 0x174   :  { %5831 = vmatpush3.msra.mxu1 %v6903_v53 }
 0x175   :  { %5835 = vmatprep.subr.mxu1 %v6621_v8 }
 0x1be   :  { %v278_v54 = vpop.permute.xlu1 %277 }
 0x1bf   :  { %v280_v55 = vmul.f32 %v6372_v37, %v278_v54 }
 0x1e0   :  { %v288_v56 = vpop.permute.xlu1 %287 }
 0x1e1   :  { %v6909_v57 = vadd.f32 %v288_v56, %v280_v55 }
 0x1e3   :  { %6375 = vtanh.f32 %v6909_v57 }
 0x1e4   :  { %6377 = vtanh.f32 %v6914_v58 }
 0x1e5   :  { %6379 = vtanh.f32 %v176_v1 }
 0x1ed   :  { %v61_v59 = vpop.permute.xlu1 %60 }
 0x1ee   :  { %vm63_vm5 = vcmp.eq.s32.totalorder %v6799_v24, %v61_v59 }
 0x1ef   :  { %v5279_v60 = vsel %vm63_vm5, 1.0, %v6621_v8 }
 0x1f0   :  { %v6376_v61 = vpop.eup %6375  ;;  %5283 = vmatmul.mubr.msk.f32.gmra.mxu0 %vm82_vm3, %v5279_v60 }
 0x1f1   :  { %v6378_v62 = vpop.eup %6377  ;;  %376 = vrot.lane.b32.xlu0 %v6376_v61, %s6625_s22  ;;  %5854 = vmatprep.mubr.msk.f32.mxu0 %vm6622_vm1, %v6621_v8 }
 0x1f2   :  { %v6380_v9 = vpop.eup %6379 }
 0x1f4   :  { %5855 = vmatmul.mubr.msk.f32.vlgmr.msra.gmra.mxu0 %vm187_vm2, %v6378_v62 }
 0x1f5   :  { %5869 = vmatpush3.msra.mxu0 %v6735_v7  ;;  %5876 = vmatprep.mubr.msk.f32.mxu0 %vm6622_vm1, %v6621_v8 }
 0x1f6   :  { %5870 = vmatprep.subr.mxu0 %v6621_v8  ;;  %471 = vrot.lane.b32.xlu0 %v5284_v45, %s6623_s19 }
 0x1f7   :  { %5871 = vmatpush3.msra.mxu0 %v6744_v10 }
 0x1f8   :  { %5872 = vmatprep.subr.mxu0 %v6621_v8 }
 0x1f9   :  { %5873 = vmatpush3.msra.mxu0 %v6757_v13 }
 0x1fa   :  { %5874 = vmatprep.subr.mxu0 %v6621_v8  ;;  %571 = vrot.lane.b32.xlu0 %v6987_v11, %s6625_s22 }
 0x1fb   :  { %5875 = vmatpush3.msra.mxu0 %v6773_v17 }
 0x1fc   :  { %5890 = vmatprep.subr.mxu0 %v6621_v8 }
 0x22d   :  { %v366_v63 = vpop.f32.mrf.mxu1 }
 0x22f   :  { %v5823_v0 = vpop.f32.mrf.mxu1 }
 0x263   :  { %v377_v3 = vpop.permute.xlu0 %376 }
 0x264   :  { %5833 = vmatmul.mubr.msk.f32.vlgmr.msra.gmra.mxu1 %vm187_vm2, %v377_v3  ;;  %5877 = vmatmul.mubr.msk.f32.vlgmr.msra.gmra.mxu0 %vm187_vm2, %v377_v3  ;;  %v7018_v3 = vld [vmem:[%s8126_s8 + $0x38] sm:$0xff] }
 0x265   :  { %5836 = vmatpush3.msra.mxu1 %v6942_v2  ;;  %5843 = vmatprep.mubr.msk.f32.mxu1 %vm6622_vm1, %v6621_v8 }
 0x266   :  { %5837 = vmatprep.subr.mxu1 %v6621_v8  ;;  %5891 = vmatpush3.msra.mxu0 %v6881_v49 }
 0x267   :  { %5838 = vmatpush3.msra.mxu1 %v6949_v4  ;;  %5892 = vmatprep.subr.mxu0 %v6621_v8 }
 0x268   :  { %5839 = vmatprep.subr.mxu1 %v6621_v8  ;;  %5893 = vmatpush3.msra.mxu0 %v6887_v51  ;;  %v472_v35 = vpop.permute.xlu0 %471 }
 0x269   :  { %5840 = vmatpush3.msra.mxu1 %v6958_v5  ;;  %5894 = vmatprep.subr.mxu0 %v6621_v8 }
 0x26a   :  { %5841 = vmatprep.subr.mxu1 %v6621_v8  ;;  %5895 = vmatpush3.msra.mxu0 %v6896_v52 }
 0x26b   :  { %5842 = vmatpush3.msra.mxu1 %v6967_v6  ;;  %5896 = vmatprep.subr.mxu0 %v6621_v8 }
 0x26c   :  { %5844 = vmatmul.mubr.msk.f32.vlgmr.msra.gmra.mxu1 %vm187_vm2, %v6380_v9  ;;  %5857 = vmatprep.subr.mxu1 %v6621_v8  ;;  %v572_v50 = vpop.permute.xlu0 %571 }
 0x26d   :  { %5865 = vmatprep.mubr.msk.f32.mxu1 %vm6622_vm1, %v6621_v8  ;;  %5897 = vmatpush3.msra.mxu0 %v6903_v53 }
 0x26e   :  { %5898 = vmatprep.mubr.msk.f32.mxu0 %vm6622_vm1, %v6621_v8  ;;  %5912 = vmatprep.subr.mxu0 %v6621_v8 }
 0x26f   :  { %5858 = vmatpush3.msra.mxu1 %v7018_v3 }
 0x270   :  { %5859 = vmatprep.subr.mxu1 %v6621_v8 }
 0x2b0   :  { %v6993_v14 = vpop.f32.mrf.mxu0 }
 0x2b2   :  { %v6995_v15 = vpop.f32.mrf.mxu0 }
 0x2b4   :  { %v6997_v16 = vpop.f32.mrf.mxu0 }
 0x2b6   :  { %v5856_v18 = vpop.f32.mrf.mxu0 }
 0x324   :  { %v446_v19 = vpop.f32.mrf.mxu1  ;;  %v865_v21 = vpop.f32.mrf.mxu0 }
 0x325   :  { %v447_v22 = vadd.f32 %v446_v19, %v366_v63  ;;  %v870_v18 = vrot.slane %v865_v21, 6  ;;  %v893_v21 = vrot.slane %v6909_v57, 6 }
 0x326   :  { %v5834_v23 = vpop.f32.mrf.mxu1  ;;  %v5878_v24 = vpop.f32.mrf.mxu0 }
 0x327   :  { %v458_v25 = vadd.f32 %v7002_v20, %v447_v22  ;;  %v7025_v22 = vld [vmem:[%s8126_s8 + $0x30] sm:$0xff]  ;;  %v7033_v23 = vld [vmem:[%s8126_s8 + $0x28] sm:$0xff]  ;;  %v872_v24 = vadd.f32 %v870_v18, %v6805_v29 }
 0x328   :  { %5860 = vmatpush3.msra.mxu1 %v7025_v22 }
 0x329   :  { %v5301_v26 = vmul.f32 -1.442695, %v458_v25  ;;  %466 = vrot.lane.b32.xlu0 %v458_v25, %s6624_s21  ;;  %5861 = vmatprep.subr.mxu1 %v6621_v8  ;;  %v7042_v25 = vld [vmem:[%s8126_s8 + $0x20] sm:$0xff]  ;;  %v880_v57 = vadd.f32 %v6810_v30, %v872_v24 }
 0x32a   :  { %5862 = vmatpush3.msra.mxu1 %v7033_v23 }
 0x32b   :  { %6381 = vpow2.f32 %v5301_v26  ;;  %5863 = vmatprep.subr.mxu1 %v6621_v8 }
 0x32c   :  { %v554_v27 = vpop.f32.mrf.mxu1  ;;  %5864 = vmatpush3.msra.mxu1 %v7042_v25 }
 0x32d   :  { %v559_v28 = vrot.slane %v554_v27, 2  ;;  %5879 = vmatprep.subr.mxu1 %v6621_v8  ;;  %v5320_v27 = vmul.f32 -1.442695, %v880_v57 }
 0x32e   :  { %v5845_v31 = vpop.f32.mrf.mxu1 }
 0x32f   :  { %560 = vrot.lane.b32.xlu1 %v559_v28, %s6625_s22 }
 0x333   :  { %589 = vrot.lane.b32.xlu1 %v588_v32, %s6624_s21 }
 0x338   :  { %v6382_v33 = vpop.eup %6381 }
 0x339   :  { %v462_v34 = vadd.f32 1.0, %v6382_v33 }
 0x33b   :  { %6383 = vrcp.f32 %v462_v34 }
 0x348   :  { %v6384_v36 = vpop.eup %6383 }
 0x349   :  { %v474_v37 = vmul.f32 %v6384_v36, %v472_v35 }
 0x34b   :  { %476 = vrot.lane.b32.xlu1 %v474_v37, %s6625_s22 }
 0x39b   :  { %v467_v62 = vpop.permute.xlu0 %466 }
 0x39c   :  { %v469_v63 = vmul.f32 %v6384_v36, %v467_v62 }
 0x3a1   :  { %v561_v38 = vpop.permute.xlu1 %560 }
 0x3a2   :  { %v563_v39 = vadd.f32 %v561_v38, %v6993_v14  ;;  %v564_v45 = vadd.f32 %v561_v38, %v6995_v15 }
 0x3a4   :  { %v575_v54 = vadd.f32 %v572_v50, %v564_v45  ;;  %v574_v55 = vadd.f32 %v572_v50, %v563_v39 }
 0x3a5   :  { %v590_v61 = vpop.permute.xlu1 %589 }
 0x3a6   :  { %v5304_v56 = vmul.f32 -1.442695, %v575_v54  ;;  %583 = vrot.lane.b32.xlu0 %v574_v55, %s6624_s21  ;;  %v7095_v54 = vld [vmem:[%s8127_s9 + $0x1] ss:$0 sm:$0xff] }
 0x3a8   :  { %6385 = vpow2.f32 %v5304_v56 }
 0x3b5   :  { %v6386_v59 = vpop.eup %6385 }
 0x3b6   :  { %v579_v60 = vadd.f32 1.0, %v6386_v59 }
 0x3b8   :  { %6387 = vrcp.f32 %v579_v60 }
 0x3bd   :  { %v477_v0 = vpop.permute.xlu1 %476 }
 0x3be   :  { %v7012_v1 = vadd.f32 %v477_v0, %v469_v63 }
 0x3c0   :  { %6389 = vtanh.f32 %v7012_v1 }
 0x3c1   :  { %6391 = vpow2.f32 %v5320_v27 }
 0x3c5   :  { %v6388_v9 = vpop.eup %6387 }
 0x3c6   :  { %v592_v19 = vmul.f32 %v6388_v9, %v590_v61 }
 0x3c8   :  { %594 = vrot.lane.b32.xlu1 %v592_v19, %s6625_s22 }
 0x3cc   :  { %894 = vrot.lane.b32.xlu1 %v893_v21, %s6624_s21 }
 0x3cd   :  { %v6390_v26 = vpop.eup %6389 }
 0x3ce   :  { %788 = vrot.lane.b32.xlu0 %v6390_v26, %s6625_s22  ;;  %v6392_v28 = vpop.eup %6391 }
 0x3cf   :  { %v884_v31 = vadd.f32 1.0, %v6392_v28 }
 0x3d0   :  { %888 = vrot.lane.b32.xlu1 %v880_v57, %s6624_s21 }
 0x3d1   :  { %6393 = vrcp.f32 %v884_v31 }
 0x3d2   :  { %777 = vrot.lane.b32.xlu0 %v6914_v58, %s6623_s19 }
 0x3de   :  { %v6394_v36 = vpop.eup %6393 }
 0x418   :  { %v584_v32 = vpop.permute.xlu0 %583 }
 0x419   :  { %v586_v33 = vmul.f32 %v6388_v9, %v584_v32 }
 0x43a   :  { %v595_v34 = vpop.permute.xlu1 %594 }
 0x43b   :  { %v7052_v35 = vadd.f32 %v595_v34, %v586_v33 }
 0x43d   :  { %6395 = vtanh.f32 %v7052_v35  ;;  %v1194_v27 = vrot.slane %v7052_v35, 2 }
 0x43e   :  { %v895_v37 = vpop.permute.xlu1 %894 }
 0x43f   :  { %v897_v38 = vmul.f32 %v6394_v36, %v895_v37 }
 0x440   :  { %v789_v39 = vpop.permute.xlu0 %788 }
 0x441   :  { %792 = vst.msk [vmem:[#allocation2] sm:$0x3] %vm791_vm6, %v789_v39  ;;  %899 = vrot.lane.b32.xlu0 %v897_v38, %s6625_s22 }
 0x442   :  { %v889_v0 = vpop.permute.xlu1 %888 }
 0x443   :  { %v891_v24 = vmul.f32 %v6394_v36, %v889_v0 }
 0x444   :  { %v778_v63 = vpop.permute.xlu0 %777 }
 0x445   :  { %1177 = vrot.lane.b32.xlu0 %v6987_v11, %s6625_s22 }
 0x44a   :  { %v6396_v58 = vpop.eup %6395 }
 0x44b   :  { %v683_v45 = vrot.slane %v6396_v58, 6 }
 0x44d   :  { %5866 = vmatmul.mubr.msk.f32.vlgmr.msra.gmra.mxu1 %vm187_vm2, %v683_v45 }
 0x44e   :  { %5880 = vmatpush3.msra.mxu1 %v6822_v40  ;;  %5887 = vmatprep.mubr.msk.f32.mxu1 %vm6622_vm1, %v6621_v8 }
 0x44f   :  { %5881 = vmatprep.subr.mxu1 %v6621_v8 }
 0x450   :  { %5882 = vmatpush3.msra.mxu1 %v6827_v41 }
 0x451   :  { %5883 = vmatprep.subr.mxu1 %v6621_v8 }
 0x452   :  { %5884 = vmatpush3.msra.mxu1 %v6845_v44 }
 0x453   :  { %5885 = vmatprep.subr.mxu1 %v6621_v8 }
 0x454   :  { %5886 = vmatpush3.msra.mxu1 %v6862_v47 }
 0x455   :  { %5888 = vmatmul.mubr.msk.f32.vlgmr.msra.gmra.mxu1 %vm187_vm2, %v789_v39  ;;  %5901 = vmatprep.subr.mxu1 %v6621_v8 }
 0x456   :  { %5902 = vmatpush3.msra.mxu1 %v6942_v2  ;;  %5909 = vmatprep.mubr.msk.f32.mxu1 %vm6622_vm1, %v6621_v8 }
 0x457   :  { %5903 = vmatprep.subr.mxu1 %v6621_v8 }
 0x458   :  { %5904 = vmatpush3.msra.mxu1 %v6949_v4 }
 0x459   :  { %5905 = vmatprep.subr.mxu1 %v6621_v8 }
 0x45a   :  { %5906 = vmatpush3.msra.mxu1 %v6958_v5 }
 0x45b   :  { %5907 = vmatprep.subr.mxu1 %v6621_v8 }
 0x45c   :  { %5908 = vmatpush3.msra.mxu1 %v6967_v6 }
 0x45d   :  { %5910 = vmatmul.mubr.msk.f32.vlgmr.msra.gmra.mxu1 %vm187_vm2, %v683_v45  ;;  %5923 = vmatprep.subr.mxu1 %v6621_v8 }
 0x45e   :  { %5924 = vmatpush3.msra.mxu1 %v7018_v3  ;;  %5931 = vmatprep.mubr.msk.f32.mxu1 %vm6622_vm1, %v6621_v8 }
 0x45f   :  { %5925 = vmatprep.subr.mxu1 %v6621_v8 }
 0x460   :  { %5926 = vmatpush3.msra.mxu1 %v7025_v22 }
 0x461   :  { %5927 = vmatprep.subr.mxu1 %v6621_v8 }
 0x462   :  { %5928 = vmatpush3.msra.mxu1 %v7033_v23 }
 0x463   :  { %5929 = vmatprep.subr.mxu1 %v6621_v8 }
 0x464   :  { %5930 = vmatpush3.msra.mxu1 %v7042_v25 }
 0x465   :  { %5945 = vmatprep.subr.mxu1 %v6621_v8 }
 0x4b3   :  { %v900_v19 = vpop.permute.xlu0 %899 }
 0x4b4   :  { %v902_v57 = vadd.f32 %v900_v19, %v891_v24 }
 0x4b6   :  { %v1496_v19 = vrot.slane %v902_v57, 6 }
 0x4b7   :  { %v1178_v36 = vpop.permute.xlu0 %1177 }
 0x50d   :  { %v752_v50 = vpop.f32.mrf.mxu1 }
 0x50e   :  { %v753_v55 = vadd.f32 %v752_v50, %v6997_v16 }
 0x50f   :  { %v5867_v56 = vpop.f32.mrf.mxu1 }
 0x510   :  { %v764_v59 = vadd.f32 %v7095_v54, %v753_v55 }
 0x512   :  { %v5317_v60 = vmul.f32 -1.442695, %v764_v59 }
 0x514   :  { %6397 = vpow2.f32 %v5317_v60 }
 0x515   :  { %v7099_v61 = vpop.f32.mrf.mxu1 }
 0x517   :  { %v5889_v62 = vpop.f32.mrf.mxu1 }
 0x51d   :  { %v1160_v9 = vpop.f32.mrf.mxu1 }
 0x51e   :  { %v1165_v18 = vrot.slane %v1160_v9, 4 }
 0x51f   :  { %v5911_v21 = vpop.f32.mrf.mxu1 }
 0x520   :  { %1166 = vrot.lane.b32.xlu1 %v1165_v18, %s6625_s22 }
 0x521   :  { %v6398_v26 = vpop.eup %6397 }
 0x522   :  { %v768_v16 = vadd.f32 1.0, %v6398_v26 }
 0x524   :  { %6399 = vrcp.f32 %v768_v16  ;;  %772 = vrot.lane.b32.xlu1 %v764_v59, %s6624_s21 }
 0x525   :  { %6401 = vtanh.f32 %v902_v57 }
 0x528   :  { %1195 = vrot.lane.b32.xlu1 %v1194_v27, %s6624_s21 }
 0x531   :  { %v6400_v28 = vpop.eup %6399 }
 0x532   :  { %v780_v31 = vmul.f32 %v6400_v28, %v778_v63  ;;  %v6402_v32 = vpop.eup %6401 }
 0x533   :  { %v985_v33 = vrot.slane %v6402_v32, 2 }
 0x534   :  { %782 = vrot.lane.b32.xlu0 %v780_v31, %s6625_s22 }
 0x538   :  { %986 = vrot.lane.b32.xlu0 %v985_v33, %s6625_s22 }
 0x592   :  { %v1167_v34 = vpop.permute.xlu1 %1166 }
 0x593   :  { %v1169_v37 = vadd.f32 %v1167_v34, %v6993_v14  ;;  %v1170_v38 = vadd.f32 %v1167_v34, %v6995_v15 }
 0x595   :  { %v1180_v39 = vadd.f32 %v1178_v36, %v1169_v37  ;;  %v1181_v58 = vadd.f32 %v1178_v36, %v1170_v38 }
 0x596   :  { %v773_v45 = vpop.permute.xlu1 %772 }
 0x597   :  { %v5336_v35 = vmul.f32 -1.442695, %v1181_v58  ;;  %1189 = vrot.lane.b32.xlu1 %v1180_v39, %s6624_s21  ;;  %v775_v50 = vmul.f32 %v6400_v28, %v773_v45 }
 0x599   :  { %6403 = vpow2.f32 %v5336_v35 }
 0x59a   :  { %v1196_v0 = vpop.permute.xlu1 %1195 }
 0x5a6   :  { %v6404_v55 = vpop.eup %6403  ;;  %v783_v56 = vpop.permute.xlu0 %782 }
 0x5a7   :  { %v1185_v59 = vadd.f32 1.0, %v6404_v55  ;;  %v785_v60 = vadd.f32 %v783_v56, %v775_v50 }
 0x5a9   :  { %6405 = vrcp.f32 %v1185_v59 }
 0x5aa   :  { %6407 = vtanh.f32 %v785_v60  ;;  %v987_v62 = vpop.permute.xlu0 %986 }
 0x5ab   :  { %5899 = vmatmul.mubr.msk.f32.vlgmr.msra.gmra.mxu0 %vm187_vm2, %v987_v62 }
 0x5ac   :  { %5913 = vmatpush3.msra.mxu0 %v6832_v42  ;;  %5920 = vmatprep.mubr.msk.f32.mxu0 %vm6622_vm1, %v6621_v8 }
 0x5ad   :  { %5914 = vmatprep.subr.mxu0 %v6621_v8 }
 0x5ae   :  { %5915 = vmatpush3.msra.mxu0 %v6838_v43 }
 0x5af   :  { %5916 = vmatprep.subr.mxu0 %v6621_v8 }
 0x5b0   :  { %5917 = vmatpush3.msra.mxu0 %v6855_v46 }
 0x5b1   :  { %5918 = vmatprep.subr.mxu0 %v6621_v8 }
 0x5b2   :  { %5919 = vmatpush3.msra.mxu0 %v6869_v48 }
 0x5b3   :  { %5934 = vmatprep.subr.mxu0 %v6621_v8 }
 0x5b6   :  { %v6406_v63 = vpop.eup %6405 }
 0x5b7   :  { %v6408_v9 = vpop.eup %6407  ;;  %v1198_v18 = vmul.f32 %v6406_v63, %v1196_v0 }
 0x5b8   :  { %1210 = vrot.lane.b32.xlu0 %v6408_v9, %s6625_s22  ;;  %794 = vst.msk [vmem:[#allocation2 + $0xe] sm:$0x3] %vm793_vm7, %v6408_v9 }
 0x5b9   :  { %1200 = vrot.lane.b32.xlu1 %v1198_v18, %s6625_s22 }
 0x5bc   :  { %1080 = vrot.lane.b32.xlu0 %v7012_v1, %s6624_s21 }
 0x5bd   :  { %1497 = vrot.lane.b32.xlu1 %v1496_v19, %s6624_s21 }
 0x5c0   :  { %1382 = vrot.lane.b32.xlu0 %v785_v60, %s6624_s21 }
 0x609   :  { %v1190_v21 = vpop.permute.xlu1 %1189 }
 0x60a   :  { %v1192_v24 = vmul.f32 %v6406_v63, %v1190_v21 }
 0x62a   :  { %v1211_v26 = vpop.permute.xlu0 %1210 }
 0x62b   :  { %5921 = vmatmul.mubr.msk.f32.vlgmr.msra.gmra.mxu0 %vm187_vm2, %v1211_v26  ;;  %v1201_v16 = vpop.permute.xlu1 %1200 }
 0x62c   :  { %5935 = vmatpush3.msra.mxu0 %v6735_v7  ;;  %v7130_v27 = vadd.f32 %v1201_v16, %v1192_v24  ;;  %5942 = vmatprep.mubr.msk.f32.mxu0 %vm6622_vm1, %v6621_v8 }
 0x62d   :  { %5936 = vmatprep.subr.mxu0 %v6621_v8 }
 0x62e   :  { %6409 = vtanh.f32 %v7130_v27  ;;  %5937 = vmatpush3.msra.mxu0 %v6744_v10  ;;  %v1081_v28 = vpop.permute.xlu0 %1080 }
 0x62f   :  { %5938 = vmatprep.subr.mxu0 %v6621_v8  ;;  %v1498_v39 = vpop.permute.xlu1 %1497 }
 0x630   :  { %5939 = vmatpush3.msra.mxu0 %v6757_v13 }
 0x631   :  { %5940 = vmatprep.subr.mxu0 %v6621_v8 }
 0x632   :  { %5941 = vmatpush3.msra.mxu0 %v6773_v17  ;;  %v1383_v35 = vpop.permute.xlu0 %1382 }
 0x633   :  { %5943 = vmatmul.mubr.msk.f32.vlgmr.msra.gmra.mxu0 %vm187_vm2, %v987_v62  ;;  %5956 = vmatprep.subr.mxu0 %v6621_v8 }
 0x634   :  { %5957 = vmatpush3.msra.mxu0 %v6881_v49  ;;  %5964 = vmatprep.mubr.msk.f32.mxu0 %vm6622_vm1, %v6621_v8 }
 0x635   :  { %5958 = vmatprep.subr.mxu0 %v6621_v8 }
 0x636   :  { %5959 = vmatpush3.msra.mxu0 %v6887_v51 }
 0x637   :  { %5960 = vmatprep.subr.mxu0 %v6621_v8 }
 0x638   :  { %5961 = vmatpush3.msra.mxu0 %v6896_v52 }
 0x639   :  { %5962 = vmatprep.subr.mxu0 %v6621_v8 }
 0x63a   :  { %5963 = vmatpush3.msra.mxu0 %v6903_v53 }
 0x63b   :  { %v7152_v7 = vpop.eup %6409  ;;  %5978 = vmatprep.subr.mxu0 %v6621_v8 }
 0x63c   :  { %v1289_v49 = vrot.slane %v7152_v7, 4 }
 0x63e   :  { %5932 = vmatmul.mubr.msk.f32.vlgmr.msra.gmra.mxu1 %vm187_vm2, %v1289_v49 }
 0x63f   :  { %5946 = vmatpush3.msra.mxu1 %v6822_v40  ;;  %5953 = vmatprep.mubr.msk.f32.mxu1 %vm6622_vm1, %v6621_v8 }
 0x640   :  { %5947 = vmatprep.subr.mxu1 %v6621_v8 }
 0x641   :  { %5948 = vmatpush3.msra.mxu1 %v6827_v41 }
 0x642   :  { %5949 = vmatprep.subr.mxu1 %v6621_v8 }
 0x643   :  { %5950 = vmatpush3.msra.mxu1 %v6845_v44 }
 0x644   :  { %5951 = vmatprep.subr.mxu1 %v6621_v8 }
 0x645   :  { %5952 = vmatpush3.msra.mxu1 %v6862_v47 }
 0x646   :  { %5967 = vmatprep.subr.mxu1 %v6621_v8 }
 0x66b   :  { %v1056_v51 = vpop.f32.mrf.mxu0 }
 0x66c   :  { %v1057_v40 = vadd.f32 %v1056_v51, %v7099_v61 }
 0x66d   :  { %v5900_v52 = vpop.f32.mrf.mxu0 }
 0x66e   :  { %v1067_v53 = vadd.f32 %v7002_v20, %v1057_v40 }
 0x670   :  { %v5333_v1 = vmul.f32 -1.442695, %v1067_v53  ;;  %1075 = vrot.lane.b32.xlu1 %v1067_v53, %s6624_s21 }
 0x672   :  { %6411 = vpow2.f32 %v5333_v1 }
 0x67f   :  { %v6412_v41 = vpop.eup %6411 }
 0x680   :  { %v1071_v57 = vadd.f32 1.0, %v6412_v41 }
 0x682   :  { %6413 = vrcp.f32 %v1071_v57 }
 0x68f   :  { %v6414_v44 = vpop.eup %6413 }
 0x690   :  { %v1083_v31 = vmul.f32 %v6414_v44, %v1081_v28 }
 0x692   :  { %1085 = vrot.lane.b32.xlu0 %v1083_v31, %s6625_s22 }
 0x6e2   :  { %v1076_v50 = vpop.permute.xlu1 %1075 }
 0x6e3   :  { %v1078_v59 = vmul.f32 %v6414_v44, %v1076_v50 }
 0x6eb   :  { %v1280_v47 = vpop.f32.mrf.mxu0 }
 0x6ed   :  { %v5922_v32 = vpop.f32.mrf.mxu0 }
 0x6f3   :  { %v1468_v33 = vpop.f32.mrf.mxu0 }
 0x6f4   :  { %v1473_v34 = vrot.slane %v1468_v33, 4 }
 0x6f5   :  { %v5944_v61 = vpop.f32.mrf.mxu0 }
 0x6f6   :  { %v1475_v36 = vadd.f32 %v1473_v34, %v6805_v29 }
 0x6f8   :  { %v1483_v37 = vadd.f32 %v6810_v30, %v1475_v36 }
 0x6fa   :  { %v5352_v38 = vmul.f32 -1.442695, %v1483_v37  ;;  %1491 = vrot.lane.b32.xlu1 %v1483_v37, %s6624_s21 }
 0x6fc   :  { %6415 = vpow2.f32 %v5352_v38 }
 0x6fe   :  { %v1358_v58 = vpop.f32.mrf.mxu1 }
 0x6ff   :  { %v1359_v45 = vadd.f32 %v1358_v58, %v1280_v47 }
 0x700   :  { %v5933_v55 = vpop.f32.mrf.mxu1 }
 0x701   :  { %v1369_v56 = vadd.f32 %v7095_v54, %v1359_v45  ;;  %v7258_v55 = vld [vmem:[%s8123_s5] ss:$0 sm:$0xff] }
 0x703   :  { %v5349_v60 = vmul.f32 -1.442695, %v1369_v56  ;;  %1377 = vrot.lane.b32.xlu1 %v1369_v56, %s6624_s21 }
 0x704   :  { %v1086_v62 = vpop.permute.xlu0 %1085 }
 0x705   :  { %6417 = vpow2.f32 %v5349_v60  ;;  %v7178_v63 = vadd.f32 %v1086_v62, %v1078_v59 }
 0x707   :  { %6419 = vtanh.f32 %v7178_v63 }
 0x709   :  { %v6416_v30 = vpop.eup %6415 }
 0x70a   :  { %v1487_v0 = vadd.f32 1.0, %v6416_v30 }
 0x70c   :  { %6421 = vrcp.f32 %v1487_v0 }
 0x712   :  { %v6418_v9 = vpop.eup %6417 }
 0x713   :  { %v1373_v18 = vadd.f32 1.0, %v6418_v9 }
 0x714   :  { %v6420_v19 = vpop.eup %6419 }
 0x715   :  { %6423 = vrcp.f32 %v1373_v18  ;;  %1393 = vrot.lane.b32.xlu1 %v6420_v19, %s6625_s22 }
 0x719   :  { %v6422_v21 = vpop.eup %6421 }
 0x71a   :  { %v1500_v24 = vmul.f32 %v6422_v21, %v1498_v39 }
 0x71c   :  { %1502 = vrot.lane.b32.xlu0 %v1500_v24, %s6625_s22 }
 0x722   :  { %v6424_v26 = vpop.eup %6423 }
 0x723   :  { %v1385_v16 = vmul.f32 %v6424_v26, %v1383_v35 }
 0x725   :  { %1387 = vrot.lane.b32.xlu0 %v1385_v16, %s6625_s22 }
 0x76c   :  { %v1492_v51 = vpop.permute.xlu1 %1491 }
 0x76d   :  { %v1494_v53 = vmul.f32 %v6422_v21, %v1492_v51 }
 0x775   :  { %v1378_v40 = vpop.permute.xlu1 %1377 }
 0x776   :  { %v1380_v57 = vmul.f32 %v6424_v26, %v1378_v40 }
 0x787   :  { %v1394_v52 = vpop.permute.xlu1 %1393 }
 0x788   :  { %1396 = vst.msk [vmem:[#allocation2 + $0x2] sm:$0x3] %vm791_vm6, %v1394_v52  ;;  %5954 = vmatmul.mubr.msk.f32.vlgmr.msra.gmra.mxu1 %vm187_vm2, %v1394_v52 }
 0x789   :  { %5968 = vmatpush3.msra.mxu1 %v6942_v2  ;;  %5975 = vmatprep.mubr.msk.f32.mxu1 %vm6622_vm1, %v6621_v8 }
 0x78a   :  { %5969 = vmatprep.subr.mxu1 %v6621_v8 }
 0x78b   :  { %5970 = vmatpush3.msra.mxu1 %v6949_v4 }
 0x78c   :  { %5971 = vmatprep.subr.mxu1 %v6621_v8 }
 0x78d   :  { %5972 = vmatpush3.msra.mxu1 %v6958_v5 }
 0x78e   :  { %v1503_v1 = vpop.permute.xlu0 %1502  ;;  %5973 = vmatprep.subr.mxu1 %v6621_v8 }
 0x78f   :  { %v1505_v41 = vadd.f32 %v1503_v1, %v1494_v53  ;;  %5974 = vmatpush3.msra.mxu1 %v6967_v6 }
 0x790   :  { %5976 = vmatmul.mubr.msk.f32.vlgmr.msra.gmra.mxu1 %vm187_vm2, %v1289_v49  ;;  %5989 = vmatprep.subr.mxu1 %v6621_v8 }
 0x791   :  { %6425 = vtanh.f32 %v1505_v41  ;;  %5990 = vmatpush3.msra.mxu1 %v7018_v3  ;;  %5997 = vmatprep.mubr.msk.f32.mxu1 %vm6622_vm1, %v6621_v8 }
 0x792   :  { %5991 = vmatprep.subr.mxu1 %v6621_v8 }
 0x793   :  { %5992 = vmatpush3.msra.mxu1 %v7025_v22 }
 0x794   :  { %5993 = vmatprep.subr.mxu1 %v6621_v8 }
 0x795   :  { %5994 = vmatpush3.msra.mxu1 %v7033_v23  ;;  %v2099_v23 = vrot.slane %v1505_v41, 6 }
 0x796   :  { %5995 = vmatprep.subr.mxu1 %v6621_v8 }
 0x797   :  { %v1388_v7 = vpop.permute.xlu0 %1387  ;;  %5996 = vmatpush3.msra.mxu1 %v7042_v25 }
 0x798   :  { %v7208_v49 = vadd.f32 %v1388_v7, %v1380_v57  ;;  %6011 = vmatprep.subr.mxu1 %v6621_v8 }
 0x79a   :  { %6427 = vtanh.f32 %v7208_v49 }
 0x79e   :  { %v6426_v3 = vpop.eup %6425 }
 0x79f   :  { %v1588_v44 = vrot.slane %v6426_v3, 4 }
 0x7a1   :  { %1589 = vrot.lane.b32.xlu0 %v1588_v44, %s6625_s22 }
 0x7a7   :  { %v6428_v22 = vpop.eup %6427 }
 0x7a8   :  { %1813 = vrot.lane.b32.xlu1 %v6428_v22, %s6625_s22  ;;  %1397 = vst.msk [vmem:[#allocation2 + $0xc] sm:$0x3] %vm793_vm7, %v6428_v22 }
 0x7ac   :  { %1780 = vrot.lane.b32.xlu1 %v6987_v11, %s6625_s22 }
 0x7b0   :  { %2100 = vrot.lane.b32.xlu1 %v2099_v23, %s6624_s21 }
 0x813   :  { %v1590_v25 = vpop.permute.xlu0 %1589 }
 0x814   :  { %5965 = vmatmul.mubr.msk.f32.vlgmr.msra.gmra.mxu0 %vm187_vm2, %v1590_v25 }
 0x815   :  { %5979 = vmatpush3.msra.mxu0 %v6832_v42  ;;  %5986 = vmatprep.mubr.msk.f32.mxu0 %vm6622_vm1, %v6621_v8  ;;  %v6575_v42 = vld [vmem:[%s8121_s3 + $0x18] sm:$0xff] }
 0x816   :  { %5980 = vmatprep.subr.mxu0 %v6621_v8 }
 0x817   :  { %5981 = vmatpush3.msra.mxu0 %v6838_v43 }
 0x818   :  { %5982 = vmatprep.subr.mxu0 %v6621_v8 }
 0x819   :  { %5983 = vmatpush3.msra.mxu0 %v6855_v46 }
 0x81a   :  { %5984 = vmatprep.subr.mxu0 %v6621_v8  ;;  %v1814_v28 = vpop.permute.xlu1 %1813 }
 0x81b   :  { %5985 = vmatpush3.msra.mxu0 %v6869_v48 }
 0x81c   :  { %6000 = vmatprep.subr.mxu0 %v6621_v8  ;;  %5987 = vmatmul.mubr.msk.f32.vlgmr.msra.gmra.mxu0 %vm187_vm2, %v1814_v28  ;;  %v7274_v28 = vld [vmem:[%s8122_s4 + $0x38] sm:$0xff] }
 0x81d   :  { %6001 = vmatpush3.msra.mxu0 %v6575_v42  ;;  %6008 = vmatprep.mubr.msk.f32.mxu0 %vm6622_vm1, %v6621_v8  ;;  %v7279_v42 = vld [vmem:[%s8122_s4 + $0x30] sm:$0xff] }
 0x81e   :  { %6002 = vmatprep.subr.mxu0 %v6621_v8  ;;  %v1781_v32 = vpop.permute.xlu1 %1780 }
 0x81f   :  { %6003 = vmatpush3.msra.mxu0 %v6744_v10 }
 0x820   :  { %6004 = vmatprep.subr.mxu0 %v6621_v8 }
 0x821   :  { %6005 = vmatpush3.msra.mxu0 %v6757_v13  ;;  %v1797_v13 = vrot.slane %v7130_v27, 2 }
 0x822   :  { %6006 = vmatprep.subr.mxu0 %v6621_v8  ;;  %v2101_v53 = vpop.permute.xlu1 %2100 }
 0x823   :  { %6007 = vmatpush3.msra.mxu0 %v6773_v17 }
 0x824   :  { %6009 = vmatmul.mubr.msk.f32.vlgmr.msra.gmra.mxu0 %vm187_vm2, %v1590_v25  ;;  %6022 = vmatprep.subr.mxu0 %v6621_v8 }
 0x825   :  { %6030 = vmatprep.mubr.msk.f32.mxu0 %vm6622_vm1, %v6621_v8  ;;  %6023 = vmatpush3.msra.mxu0 %v7274_v28 }
 0x826   :  { %6024 = vmatprep.subr.mxu0 %v6621_v8 }
 0x827   :  { %6025 = vmatpush3.msra.mxu0 %v7279_v42 }
 0x828   :  { %6026 = vmatprep.subr.mxu0 %v6621_v8 }
 0x848   :  { %v1579_v43 = vpop.f32.mrf.mxu1 }
 0x84a   :  { %v5955_v46 = vpop.f32.mrf.mxu1 }
 0x84b   :  { %v7286_v46 = vld [vmem:[%s8122_s4 + $0x28] sm:$0xff] }
 0x84c   :  { %6027 = vmatpush3.msra.mxu0 %v7286_v46 }
 0x84d   :  { %6028 = vmatprep.subr.mxu0 %v6621_v8 }
 0x850   :  { %v1763_v48 = vpop.f32.mrf.mxu1 }
 0x851   :  { %v1768_v31 = vrot.slane %v1763_v48, 6 }
 0x852   :  { %v5977_v10 = vpop.f32.mrf.mxu1 }
 0x853   :  { %1769 = vrot.lane.b32.xlu0 %v1768_v31, %s6625_s22  ;;  %v7293_v31 = vld [vmem:[%s8122_s4 + $0x20] sm:$0xff] }
 0x854   :  { %6029 = vmatpush3.msra.mxu0 %v7293_v31 }
 0x855   :  { %6044 = vmatprep.subr.mxu0 %v6621_v8 }
 0x857   :  { %1683 = vrot.lane.b32.xlu0 %v7178_v63, %s6624_s21 }
 0x85b   :  { %1798 = vrot.lane.b32.xlu0 %v1797_v13, %s6624_s21 }
 0x8c5   :  { %v1770_v17 = vpop.permute.xlu0 %1769 }
 0x8c6   :  { %v1773_v47 = vadd.f32 %v1770_v17, %v6995_v15  ;;  %v1772_v18 = vadd.f32 %v1770_v17, %v6993_v14 }
 0x8c8   :  { %v1784_v34 = vadd.f32 %v1781_v32, %v1773_v47  ;;  %v1783_v26 = vadd.f32 %v1781_v32, %v1772_v18 }
 0x8c9   :  { %v1684_v9 = vpop.permute.xlu0 %1683 }
 0x8ca   :  { %v5368_v38 = vmul.f32 -1.442695, %v1784_v34  ;;  %v7314_v34 = vld [vmem:[%s8121_s3 + $0x30] sm:$0xff] }
 0x8cd   :  { %v1799_v51 = vpop.permute.xlu0 %1798 }
 0x8d4   :  { %v1659_v33 = vpop.f32.mrf.mxu0 }
 0x8d5   :  { %v1660_v61 = vadd.f32 %v1659_v33, %v1579_v43  ;;  %v7308_v33 = vld [vmem:[%s8121_s3 + $0x38] sm:$0xff] }
 0x8d6   :  { %v5966_v36 = vpop.f32.mrf.mxu0 }
 0x8d7   :  { %v1670_v37 = vadd.f32 %v7002_v20, %v1660_v61  ;;  %v7330_v61 = vld [vmem:[%s8121_s3 + $0x20] sm:$0xff] }
 0x8d9   :  { %v5365_v39 = vmul.f32 -1.442695, %v1670_v37  ;;  %1678 = vrot.lane.b32.xlu1 %v1670_v37, %s6624_s21 }
 0x8db   :  { %6429 = vpow2.f32 %v5365_v39 }
 0x8dc   :  { %v7253_v58 = vpop.f32.mrf.mxu0  ;;  %6431 = vpow2.f32 %v5368_v38 }
 0x8de   :  { %v5988_v27 = vpop.f32.mrf.mxu0 }
 0x8e4   :  { %v2071_v35 = vpop.f32.mrf.mxu0 }
 0x8e5   :  { %v2076_v45 = vrot.slane %v2071_v35, 2 }
 0x8e6   :  { %v6010_v50 = vpop.f32.mrf.mxu0 }
 0x8e7   :  { %v2078_v56 = vadd.f32 %v2076_v45, %v6805_v29 }
 0x8e8   :  { %v6430_v20 = vpop.eup %6429 }
 0x8e9   :  { %v1674_v59 = vadd.f32 1.0, %v6430_v20  ;;  %v2086_v60 = vadd.f32 %v7258_v55, %v2078_v56  ;;  %v6432_v62 = vpop.eup %6431 }
 0x8ea   :  { %v1788_v30 = vadd.f32 1.0, %v6432_v62 }
 0x8eb   :  { %6433 = vrcp.f32 %v1674_v59  ;;  %2094 = vrot.lane.b32.xlu1 %v2086_v60, %s6624_s21  ;;  %v5384_v63 = vmul.f32 -1.442695, %v2086_v60 }
 0x8ed   :  { %6435 = vpow2.f32 %v5384_v63 }
 0x8ee   :  { %6437 = vrcp.f32 %v1788_v30  ;;  %v7371_v30 = vld [vmem:[%s8123_s5 + $0x1] ss:$0 sm:$0xff] }
 0x8f8   :  { %v6434_v0 = vpop.eup %6433 }
 0x8f9   :  { %v1686_v19 = vmul.f32 %v6434_v0, %v1684_v9 }
 0x8fa   :  { %v6436_v21 = vpop.eup %6435 }
 0x8fb   :  { %v2090_v24 = vadd.f32 1.0, %v6436_v21  ;;  %1688 = vrot.lane.b32.xlu0 %v1686_v19, %s6625_s22  ;;  %v6438_v16 = vpop.eup %6437  ;;  %v7378_v19 = vld [vmem:[%s8125_s7 + $0x38] sm:$0xff] }
 0x8fc   :  { %v1801_v40 = vmul.f32 %v6438_v16, %v1799_v51  ;;  %v7385_v51 = vld [vmem:[%s8125_s7 + $0x30] sm:$0xff] }
 0x8fd   :  { %6439 = vrcp.f32 %v2090_v24 }
 0x8ff   :  { %1792 = vrot.lane.b32.xlu0 %v1783_v26, %s6624_s21 }
 0x903   :  { %1803 = vrot.lane.b32.xlu0 %v1801_v40, %s6625_s22 }
 0x90a   :  { %v6440_v52 = vpop.eup %6439 }
 0x90b   :  { %v2103_v1 = vmul.f32 %v6440_v52, %v2101_v53  ;;  %v7392_v53 = vld [vmem:[%s8125_s7 + $0x28] sm:$0xff] }
 0x90d   :  { %2105 = vrot.lane.b32.xlu1 %v2103_v1, %s6625_s22  ;;  %v7397_v1 = vld [vmem:[%s8125_s7 + $0x20] sm:$0xff] }
 0x94b   :  { %v1679_v41 = vpop.permute.xlu1 %1678 }
 0x94c   :  { %v1681_v57 = vmul.f32 %v6434_v0, %v1679_v41 }
 0x95d   :  { %v2095_v43 = vpop.permute.xlu1 %2094 }
 0x95e   :  { %v2097_v10 = vmul.f32 %v6440_v52, %v2095_v43 }
 0x96d   :  { %v1689_v7 = vpop.permute.xlu0 %1688 }
 0x96e   :  { %v1691_v3 = vadd.f32 %v1689_v7, %v1681_v57 }
 0x970   :  { %6441 = vtanh.f32 %v1691_v3 }
 0x971   :  { %v1793_v44 = vpop.permute.xlu0 %1792 }
 0x972   :  { %v1795_v22 = vmul.f32 %v6438_v16, %v1793_v44 }
 0x975   :  { %v1804_v23 = vpop.permute.xlu0 %1803 }
 0x976   :  { %v7268_v25 = vadd.f32 %v1804_v23, %v1795_v22 }
 0x978   :  { %6443 = vtanh.f32 %v7268_v25  ;;  %v2399_v62 = vrot.slane %v7268_v25, 2 }
 0x97d   :  { %v6442_v48 = vpop.eup %6441 }
 0x97e   :  { %1996 = vrot.lane.b32.xlu1 %v6442_v48, %s6625_s22 }
 0x97f   :  { %v2106_v13 = vpop.permute.xlu1 %2105 }
 0x980   :  { %v7298_v17 = vadd.f32 %v2106_v13, %v2097_v10 }
 0x982   :  { %6445 = vtanh.f32 %v7298_v17  ;;  %1985 = vrot.lane.b32.xlu1 %v7208_v49, %s6624_s21  ;;  %v7323_v49 = vld [vmem:[%s8121_s3 + $0x28] sm:$0xff] }
 0x985   :  { %v6444_v47 = vpop.eup %6443 }
 0x986   :  { %v1892_v32 = vrot.slane %v6444_v47, 2 }
 0x988   :  { %5998 = vmatmul.mubr.msk.f32.vlgmr.msra.gmra.mxu1 %vm187_vm2, %v1892_v32 }
 0x989   :  { %6012 = vmatpush3.msra.mxu1 %v7308_v33  ;;  %6019 = vmatprep.mubr.msk.f32.mxu1 %vm6622_vm1, %v6621_v8 }
 0x98a   :  { %6013 = vmatprep.subr.mxu1 %v6621_v8 }
 0x98b   :  { %6014 = vmatpush3.msra.mxu1 %v7314_v34 }
 0x98c   :  { %6015 = vmatprep.subr.mxu1 %v6621_v8 }
 0x98d   :  { %6016 = vmatpush3.msra.mxu1 %v7323_v49 }
 0x98e   :  { %6017 = vmatprep.subr.mxu1 %v6621_v8 }
 0x98f   :  { %v6446_v36 = vpop.eup %6445  ;;  %6018 = vmatpush3.msra.mxu1 %v7330_v61 }
 0x990   :  { %v2191_v37 = vrot.slane %v6446_v36, 6  ;;  %6033 = vmatprep.subr.mxu1 %v6621_v8  ;;  %v7420_v36 = vld [vmem:[%s8126_s8 + $0x30] sm:$0xff] }
 0x992   :  { %2192 = vrot.lane.b32.xlu0 %v2191_v37, %s6625_s22  ;;  %v7434_v37 = vld [vmem:[%s8126_s8 + $0x20] sm:$0xff] }
 0x996   :  { %2286 = vrot.lane.b32.xlu0 %v1691_v3, %s6624_s21 }
 0x9f0   :  { %v1997_v38 = vpop.permute.xlu1 %1996 }
 0x9f1   :  { %1999 = vst.msk [vmem:[#allocation2 + $0x4] sm:$0x3] %vm791_vm6, %v1997_v38  ;;  %6020 = vmatmul.mubr.msk.f32.vlgmr.msra.gmra.mxu1 %vm187_vm2, %v1997_v38 }
 0x9f2   :  { %6034 = vmatpush3.msra.mxu1 %v6942_v2  ;;  %6041 = vmatprep.mubr.msk.f32.mxu1 %vm6622_vm1, %v6621_v8 }
 0x9f3   :  { %6035 = vmatprep.subr.mxu1 %v6621_v8 }
 0x9f4   :  { %6036 = vmatpush3.msra.mxu1 %v6949_v4  ;;  %v1986_v56 = vpop.permute.xlu1 %1985 }
 0x9f5   :  { %6037 = vmatprep.subr.mxu1 %v6621_v8 }
 0x9f6   :  { %6038 = vmatpush3.msra.mxu1 %v6958_v5 }
 0x9f7   :  { %6039 = vmatprep.subr.mxu1 %v6621_v8 }
 0x9f8   :  { %6040 = vmatpush3.msra.mxu1 %v6967_v6 }
 0x9f9   :  { %6042 = vmatmul.mubr.msk.f32.vlgmr.msra.gmra.mxu1 %vm187_vm2, %v1892_v32  ;;  %6055 = vmatprep.subr.mxu1 %v6621_v8  ;;  %v7415_v32 = vld [vmem:[%s8126_s8 + $0x38] sm:$0xff] }
 0x9fa   :  { %6063 = vmatprep.mubr.msk.f32.mxu1 %vm6622_vm1, %v6621_v8  ;;  %6056 = vmatpush3.msra.mxu1 %v7415_v32 }
 0x9fb   :  { %6057 = vmatprep.subr.mxu1 %v6621_v8 }
 0x9fc   :  { %6058 = vmatpush3.msra.mxu1 %v7420_v36 }
 0x9fd   :  { %6059 = vmatprep.subr.mxu1 %v6621_v8 }
 0xa04   :  { %v7353_v2 = vpop.permute.xlu0 %2192 }
 0xa05   :  { %6031 = vmatmul.mubr.msk.f32.vlgmr.msra.gmra.mxu0 %vm187_vm2, %v7353_v2 }
 0xa06   :  { %6052 = vmatprep.mubr.msk.f32.mxu0 %vm6622_vm1, %v6621_v8  ;;  %6045 = vmatpush3.msra.mxu0 %v7378_v19 }
 0xa07   :  { %6046 = vmatprep.subr.mxu0 %v6621_v8 }
 0xa08   :  { %v2287_v26 = vpop.permute.xlu0 %2286  ;;  %6047 = vmatpush3.msra.mxu0 %v7385_v51 }
 0xa09   :  { %6048 = vmatprep.subr.mxu0 %v6621_v8 }
 0xa0a   :  { %6049 = vmatpush3.msra.mxu0 %v7392_v53 }
 0xa0b   :  { %6050 = vmatprep.subr.mxu0 %v6621_v8 }
 0xa0c   :  { %6051 = vmatpush3.msra.mxu0 %v7397_v1 }
 0xa0d   :  { %6066 = vmatprep.subr.mxu0 %v6621_v8 }
 0xa48   :  { %v1961_v4 = vpop.f32.mrf.mxu1 }
 0xa49   :  { %v1962_v5 = vadd.f32 %v1961_v4, %v7253_v58 }
 0xa4a   :  { %v5999_v39 = vpop.f32.mrf.mxu1 }
 0xa4b   :  { %v1972_v6 = vadd.f32 %v7095_v54, %v1962_v5  ;;  %v2697_v39 = vrot.slane %v7298_v17, 6  ;;  %v7455_v17 = vld [vmem:[%s8121_s3 + $0x10] sm:$0xff] }
 0xa4d   :  { %v5381_v27 = vmul.f32 -1.442695, %v1972_v6  ;;  %1980 = vrot.lane.b32.xlu1 %v1972_v6, %s6624_s21 }
 0xa4f   :  { %6447 = vpow2.f32 %v5381_v27 }
 0xa5c   :  { %v6448_v35 = vpop.eup %6447 }
 0xa5d   :  { %v1976_v45 = vadd.f32 1.0, %v6448_v35 }
 0xa5f   :  { %6449 = vrcp.f32 %v1976_v45 }
 0xa6c   :  { %v6450_v50 = vpop.eup %6449 }
 0xa6d   :  { %v1988_v20 = vmul.f32 %v6450_v50, %v1986_v56 }
 0xa6f   :  { %1990 = vrot.lane.b32.xlu0 %v1988_v20, %s6625_s22  ;;  %v7464_v20 = vld [vmem:[%s8121_s3 + $0x8] sm:$0xff] }
 0xa73   :  { %2382 = vrot.lane.b32.xlu0 %v6987_v11, %s6625_s22 }
 0xab1   :  { %v2182_v59 = vpop.f32.mrf.mxu1 }
 0xab3   :  { %v6021_v58 = vpop.f32.mrf.mxu1 }
 0xab9   :  { %v2366_v60 = vpop.f32.mrf.mxu1 }
 0xaba   :  { %2371 = vrot.lane.b32.xlu1 %v2366_v60, %s6625_s22 }
 0xabb   :  { %v6043_v54 = vpop.f32.mrf.mxu1 }
 0xabe   :  { %2400 = vrot.lane.b32.xlu1 %v2399_v62, %s6624_s21 }
 0xabf   :  { %v1981_v16 = vpop.permute.xlu1 %1980 }
 0xac0   :  { %v1983_v40 = vmul.f32 %v6450_v50, %v1981_v16  ;;  %v7449_v50 = vld [vmem:[%s8121_s3 + $0x18] sm:$0xff] }
 0xac5   :  { %v2262_v63 = vpop.f32.mrf.mxu0 }
 0xac6   :  { %v2263_v0 = vadd.f32 %v2262_v63, %v2182_v59  ;;  %v7471_v59 = vld [vmem:[%s8121_s3] sm:$0xff] }
 0xac7   :  { %v6032_v9 = vpop.f32.mrf.mxu0 }
 0xac8   :  { %v2273_v11 = vadd.f32 %v7371_v30, %v2263_v0  ;;  %v7509_v0 = vld [vmem:[%s8125_s7 + $0x18] sm:$0xff] }
 0xaca   :  { %v5397_v18 = vmul.f32 -1.442695, %v2273_v11  ;;  %2281 = vrot.lane.b32.xlu0 %v2273_v11, %s6624_s21  ;;  %v7516_v11 = vld [vmem:[%s8125_s7 + $0x10] sm:$0xff] }
 0xacc   :  { %6451 = vpow2.f32 %v5397_v18  ;;  %v7525_v18 = vld [vmem:[%s8125_s7 + $0x8] sm:$0xff] }
 0xad9   :  { %v6452_v21 = vpop.eup %6451 }
 0xada   :  { %v2277_v24 = vadd.f32 1.0, %v6452_v21  ;;  %v7532_v21 = vld [vmem:[%s8125_s7] sm:$0xff] }
 0xadc   :  { %6453 = vrcp.f32 %v2277_v24 }
 0xae1   :  { %v1991_v52 = vpop.permute.xlu0 %1990 }
 0xae2   :  { %v7399_v41 = vadd.f32 %v1991_v52, %v1983_v40 }
 0xae4   :  { %6455 = vtanh.f32 %v7399_v41 }
 0xae5   :  { %v2383_v22 = vpop.permute.xlu0 %2382 }
 0xae9   :  { %v6454_v57 = vpop.eup %6453 }
 0xaea   :  { %v2289_v7 = vmul.f32 %v6454_v57, %v2287_v26 }
 0xaec   :  { %2291 = vrot.lane.b32.xlu1 %v2289_v7, %s6625_s22 }
 0xaf1   :  { %v6456_v3 = vpop.eup %6455 }
 0xaf2   :  { %2415 = vrot.lane.b32.xlu0 %v6456_v3, %s6625_s22  ;;  %2000 = vst.msk [vmem:[#allocation2 + $0xa] sm:$0x3] %vm793_vm7, %v6456_v3 }
 0xb2c   :  { %v2372_v44 = vpop.permute.xlu1 %2371 }
 0xb2d   :  { %v2374_v23 = vadd.f32 %v2372_v44, %v6993_v14  ;;  %v2375_v25 = vadd.f32 %v2372_v44, %v6995_v15  ;;  %v7427_v15 = vld [vmem:[%s8126_s8 + $0x28] sm:$0xff] }
 0xb2e   :  { %6060 = vmatpush3.msra.mxu1 %v7427_v15 }
 0xb2f   :  { %v2385_v43 = vadd.f32 %v2383_v22, %v2374_v23  ;;  %v2386_v48 = vadd.f32 %v2383_v22, %v2375_v25  ;;  %6061 = vmatprep.subr.mxu1 %v6621_v8  ;;  %v7556_v25 = vld [vmem:[%s8127_s9] ss:$0 sm:$0xff] }
 0xb30   :  { %v2401_v4 = vpop.permute.xlu1 %2400  ;;  %6062 = vmatpush3.msra.mxu1 %v7434_v37 }
 0xb31   :  { %v5400_v10 = vmul.f32 -1.442695, %v2386_v48  ;;  %2394 = vrot.lane.b32.xlu1 %v2385_v43, %s6624_s21  ;;  %6077 = vmatprep.subr.mxu1 %v6621_v8  ;;  %v7563_v48 = vld [vmem:[%s8127_s9 + $0x1] ss:$0 sm:$0xff] }
 0xb33   :  { %6457 = vpow2.f32 %v5400_v10 }
 0xb3c   :  { %v2282_v6 = vpop.permute.xlu0 %2281 }
 0xb3d   :  { %v2284_v27 = vmul.f32 %v6454_v57, %v2282_v6 }
 0xb40   :  { %v6458_v13 = vpop.eup %6457 }
 0xb41   :  { %v2390_v47 = vadd.f32 1.0, %v6458_v13 }
 0xb43   :  { %6459 = vrcp.f32 %v2390_v47 }
 0xb50   :  { %v6460_v38 = vpop.eup %6459 }
 0xb51   :  { %v2403_v5 = vmul.f32 %v6460_v38, %v2401_v4 }
 0xb53   :  { %2405 = vrot.lane.b32.xlu0 %v2403_v5, %s6625_s22 }
 0xb57   :  { %2698 = vrot.lane.b32.xlu0 %v2697_v39, %s6624_s21 }
 0xb5e   :  { %v2292_v35 = vpop.permute.xlu1 %2291 }
 0xb5f   :  { %v7443_v45 = vadd.f32 %v2292_v35, %v2284_v27 }
 0xb61   :  { %6461 = vtanh.f32 %v7443_v45 }
 0xb64   :  { %v2416_v56 = vpop.permute.xlu0 %2415 }
 0xb65   :  { %6053 = vmatmul.mubr.msk.f32.vlgmr.msra.gmra.mxu0 %vm187_vm2, %v2416_v56 }
 0xb66   :  { %6067 = vmatpush3.msra.mxu0 %v7449_v50  ;;  %6074 = vmatprep.mubr.msk.f32.mxu0 %vm6622_vm1, %v6621_v8 }
 0xb67   :  { %6068 = vmatprep.subr.mxu0 %v6621_v8 }
 0xb68   :  { %6069 = vmatpush3.msra.mxu0 %v7455_v17 }
 0xb69   :  { %6070 = vmatprep.subr.mxu0 %v6621_v8 }
 0xb6a   :  { %6071 = vmatpush3.msra.mxu0 %v7464_v20 }
 0xb6b   :  { %6072 = vmatprep.subr.mxu0 %v6621_v8 }
 0xb6c   :  { %6073 = vmatpush3.msra.mxu0 %v7471_v59 }
 0xb6d   :  { %6075 = vmatmul.mubr.msk.f32.vlgmr.msra.gmra.mxu0 %vm187_vm2, %v7353_v2  ;;  %6088 = vmatprep.subr.mxu0 %v6621_v8 }
 0xb6e   :  { %v6462_v58 = vpop.eup %6461  ;;  %6089 = vmatpush3.msra.mxu0 %v7274_v28  ;;  %6096 = vmatprep.mubr.msk.f32.mxu0 %vm6622_vm1, %v6621_v8 }
 0xb6f   :  { %2597 = vrot.lane.b32.xlu1 %v6462_v58, %s6625_s22  ;;  %6090 = vmatprep.subr.mxu0 %v6621_v8 }
 0xb70   :  { %6091 = vmatpush3.msra.mxu0 %v7279_v42 }
 0xb71   :  { %6092 = vmatprep.subr.mxu0 %v6621_v8 }
 0xb72   :  { %6093 = vmatpush3.msra.mxu0 %v7286_v46 }
 0xb73   :  { %2586 = vrot.lane.b32.xlu1 %v7399_v41, %s6624_s21  ;;  %6094 = vmatprep.subr.mxu0 %v6621_v8 }
 0xb74   :  { %6095 = vmatpush3.msra.mxu0 %v7293_v31 }
 0xb75   :  { %6110 = vmatprep.subr.mxu0 %v6621_v8 }
 0xba3   :  { %v2395_v2 = vpop.permute.xlu1 %2394 }
 0xba4   :  { %v2397_v60 = vmul.f32 %v6460_v38, %v2395_v2 }
 0xbc5   :  { %v2406_v54 = vpop.permute.xlu0 %2405 }
 0xbc6   :  { %v7492_v62 = vadd.f32 %v2406_v54, %v2397_v60 }
 0xbc8   :  { %6463 = vtanh.f32 %v7492_v62  ;;  %v2997_v58 = vrot.slane %v7492_v62, 2 }
 0xbc9   :  { %v2699_v22 = vpop.permute.xlu0 %2698 }
 0xbd5   :  { %v6464_v63 = vpop.eup %6463 }
 0xbd6   :  { %6064 = vmatmul.mubr.msk.f32.vlgmr.msra.gmra.mxu1 %vm187_vm2, %v6464_v63 }
 0xbd7   :  { %6078 = vmatpush3.msra.mxu1 %v7308_v33  ;;  %6085 = vmatprep.mubr.msk.f32.mxu1 %vm6622_vm1, %v6621_v8 }
 0xbd8   :  { %6079 = vmatprep.subr.mxu1 %v6621_v8 }
 0xbd9   :  { %6080 = vmatpush3.msra.mxu1 %v7314_v34 }
 0xbda   :  { %6081 = vmatprep.subr.mxu1 %v6621_v8 }
 0xbdb   :  { %6082 = vmatpush3.msra.mxu1 %v7323_v49 }
 0xbdc   :  { %6083 = vmatprep.subr.mxu1 %v6621_v8 }
 0xbdd   :  { %6084 = vmatpush3.msra.mxu1 %v7330_v61 }
 0xbde   :  { %6099 = vmatprep.subr.mxu1 %v6621_v8 }
 0xbe1   :  { %v2598_v9 = vpop.permute.xlu1 %2597 }
 0xbe2   :  { %2600 = vst.msk [vmem:[#allocation2 + $0x6] sm:$0x3] %vm791_vm6, %v2598_v9  ;;  %6086 = vmatmul.mubr.msk.f32.vlgmr.msra.gmra.mxu1 %vm187_vm2, %v2598_v9 }
 0xbe3   :  { %6100 = vmatpush3.msra.mxu1 %v7509_v0  ;;  %6107 = vmatprep.mubr.msk.f32.mxu1 %vm6622_vm1, %v6621_v8 }
 0xbe4   :  { %6101 = vmatprep.subr.mxu1 %v6621_v8 }
 0xbe5   :  { %6102 = vmatpush3.msra.mxu1 %v7516_v11  ;;  %v2587_v60 = vpop.permute.xlu1 %2586 }
 0xbe6   :  { %6103 = vmatprep.subr.mxu1 %v6621_v8 }
 0xbe7   :  { %6104 = vmatpush3.msra.mxu1 %v7525_v18 }
 0xbe8   :  { %6105 = vmatprep.subr.mxu1 %v6621_v8 }
 0xbe9   :  { %6106 = vmatpush3.msra.mxu1 %v7532_v21 }
 0xbea   :  { %6108 = vmatmul.mubr.msk.f32.vlgmr.msra.gmra.mxu1 %vm187_vm2, %v6464_v63  ;;  %6121 = vmatprep.subr.mxu1 %v6621_v8 }
 0xbeb   :  { %6122 = vmatpush3.msra.mxu1 %v7415_v32  ;;  %6129 = vmatprep.mubr.msk.f32.mxu1 %vm6622_vm1, %v6621_v8 }
 0xbec   :  { %6123 = vmatprep.subr.mxu1 %v6621_v8 }
 0xbed   :  { %6124 = vmatpush3.msra.mxu1 %v7420_v36 }
 0xbee   :  { %6125 = vmatprep.subr.mxu1 %v6621_v8 }
 0xbef   :  { %6126 = vmatpush3.msra.mxu1 %v7427_v15 }
 0xbf0   :  { %6127 = vmatprep.subr.mxu1 %v6621_v8 }
 0xbf1   :  { %6128 = vmatpush3.msra.mxu1 %v7434_v37 }
 0xbf2   :  { %6143 = vmatprep.subr.mxu1 %v6621_v8 }
 0xc25   :  { %v2485_v24 = vpop.f32.mrf.mxu0 }
 0xc27   :  { %v6054_v26 = vpop.f32.mrf.mxu0 }
 0xc2d   :  { %v2672_v16 = vpop.f32.mrf.mxu0 }
 0xc2e   :  { %v2676_v40 = vadd.f32 %v2672_v16, %v6993_v14 }
 0xc2f   :  { %v6076_v52 = vpop.f32.mrf.mxu0 }
 0xc30   :  { %v2684_v41 = vadd.f32 %v7258_v55, %v2676_v40 }
 0xc32   :  { %v5416_v57 = vmul.f32 -1.442695, %v2684_v41  ;;  %2692 = vrot.lane.b32.xlu0 %v2684_v41, %s6624_s21 }
 0xc34   :  { %6465 = vpow2.f32 %v5416_v57 }
 0xc41   :  { %v6466_v7 = vpop.eup %6465 }
 0xc42   :  { %v2688_v3 = vadd.f32 1.0, %v6466_v7 }
 0xc44   :  { %6467 = vrcp.f32 %v2688_v3 }
 0xc51   :  { %v6468_v44 = vpop.eup %6467 }
 0xc52   :  { %v2701_v23 = vmul.f32 %v6468_v44, %v2699_v22 }
 0xc54   :  { %2703 = vrot.lane.b32.xlu1 %v2701_v23, %s6625_s22 }
 0xc58   :  { %2980 = vrot.lane.b32.xlu1 %v7556_v25, %s6625_s22 }
 0xc96   :  { %v2562_v43 = vpop.f32.mrf.mxu1 }
 0xc97   :  { %v2563_v10 = vadd.f32 %v2562_v43, %v2485_v24 }
 0xc98   :  { %v6065_v13 = vpop.f32.mrf.mxu1 }
 0xc99   :  { %v2573_v47 = vadd.f32 %v7563_v48, %v2563_v10 }
 0xc9b   :  { %v5413_v38 = vmul.f32 -1.442695, %v2573_v47 }
 0xc9d   :  { %6469 = vpow2.f32 %v5413_v38 }
 0xca2   :  { %v7566_v4 = vpop.f32.mrf.mxu1 }
 0xca4   :  { %v6087_v5 = vpop.f32.mrf.mxu1  ;;  %v2693_v63 = vpop.permute.xlu0 %2692 }
 0xca5   :  { %v2695_v9 = vmul.f32 %v6468_v44, %v2693_v63 }
 0xcaa   :  { %v6470_v39 = vpop.eup %6469  ;;  %v2963_v6 = vpop.f32.mrf.mxu1 }
 0xcab   :  { %v2577_v27 = vadd.f32 1.0, %v6470_v39  ;;  %v2968_v35 = vrot.slane %v2963_v6, 2 }
 0xcac   :  { %v6109_v56 = vpop.f32.mrf.mxu1 }
 0xcad   :  { %6471 = vrcp.f32 %v2577_v27  ;;  %2969 = vrot.lane.b32.xlu0 %v2968_v35, %s6625_s22 }
 0xcb1   :  { %2581 = vrot.lane.b32.xlu0 %v2573_v47, %s6624_s21 }
 0xcb5   :  { %2998 = vrot.lane.b32.xlu0 %v2997_v58, %s6624_s21 }
 0xcba   :  { %v6472_v2 = vpop.eup %6471 }
 0xcbb   :  { %v2589_v54 = vmul.f32 %v6472_v2, %v2587_v60 }
 0xcbd   :  { %2591 = vrot.lane.b32.xlu1 %v2589_v54, %s6625_s22 }
 0xcc6   :  { %v2704_v24 = vpop.permute.xlu1 %2703 }
 0xcc7   :  { %v2706_v26 = vadd.f32 %v2704_v24, %v2695_v9 }
 0xcc9   :  { %6473 = vtanh.f32 %v2706_v26  ;;  %v3299_v6 = vrot.slane %v2706_v26, 6 }
 0xcca   :  { %v2981_v52 = vpop.permute.xlu1 %2980 }
 0xcd6   :  { %v6474_v16 = vpop.eup %6473 }
 0xcd7   :  { %2789 = vrot.lane.b32.xlu1 %v6474_v16, %s6625_s22 }
 0xd1f   :  { %v2970_v40 = vpop.permute.xlu0 %2969 }
 0xd20   :  { %v2972_v41 = vadd.f32 %v2970_v40, %v6805_v29  ;;  %v2973_v62 = vadd.f32 %v2970_v40, %v6991_v12 }
 0xd22   :  { %v2983_v57 = vadd.f32 %v2981_v52, %v2972_v41  ;;  %v2984_v7 = vadd.f32 %v2981_v52, %v2973_v62 }
 0xd23   :  { %v2582_v22 = vpop.permute.xlu0 %2581 }
 0xd24   :  { %v5432_v3 = vmul.f32 -1.442695, %v2984_v7  ;;  %2992 = vrot.lane.b32.xlu0 %v2983_v57, %s6624_s21  ;;  %v2584_v44 = vmul.f32 %v6472_v2, %v2582_v22 }
 0xd26   :  { %6475 = vpow2.f32 %v5432_v3 }
 0xd27   :  { %v2999_v5 = vpop.permute.xlu0 %2998 }
 0xd2f   :  { %v2592_v23 = vpop.permute.xlu1 %2591 }
 0xd30   :  { %v7577_v43 = vadd.f32 %v2592_v23, %v2584_v44 }
 0xd32   :  { %6477 = vtanh.f32 %v7577_v43 }
 0xd33   :  { %v6476_v10 = vpop.eup %6475 }
 0xd34   :  { %v2988_v13 = vadd.f32 1.0, %v6476_v10 }
 0xd36   :  { %6479 = vrcp.f32 %v2988_v13 }
 0xd3f   :  { %v6478_v47 = vpop.eup %6477 }
 0xd40   :  { %3013 = vrot.lane.b32.xlu1 %v6478_v47, %s6625_s22  ;;  %2601 = vst.msk [vmem:[#allocation2 + $0x8] sm:$0x3] %vm793_vm7, %v6478_v47 }
 0xd43   :  { %v6480_v38 = vpop.eup %6479 }
 0xd44   :  { %v3001_v39 = vmul.f32 %v6480_v38, %v2999_v5  ;;  %2883 = vrot.lane.b32.xlu1 %v7443_v45, %s6624_s21 }
 0xd46   :  { %3003 = vrot.lane.b32.xlu0 %v3001_v39, %s6625_s22 }
 0xd49   :  { %v2790_v27 = vpop.permute.xlu1 %2789 }
 0xd4a   :  { %3300 = vrot.lane.b32.xlu0 %v3299_v6, %s6624_s21  ;;  %6097 = vmatmul.mubr.msk.f32.vlgmr.msra.gmra.mxu0 %vm187_vm2, %v2790_v27 }
 0xd4b   :  { %6111 = vmatpush3.msra.mxu0 %v7378_v19  ;;  %6118 = vmatprep.mubr.msk.f32.mxu0 %vm6622_vm1, %v6621_v8 }
 0xd4c   :  { %6112 = vmatprep.subr.mxu0 %v6621_v8 }
 0xd4d   :  { %6113 = vmatpush3.msra.mxu0 %v7385_v51 }
 0xd4e   :  { %6114 = vmatprep.subr.mxu0 %v6621_v8 }
 0xd4f   :  { %6115 = vmatpush3.msra.mxu0 %v7392_v53 }
 0xd50   :  { %6116 = vmatprep.subr.mxu0 %v6621_v8 }
 0xd51   :  { %6117 = vmatpush3.msra.mxu0 %v7397_v1 }
 0xd52   :  { %6132 = vmatprep.subr.mxu0 %v6621_v8 }
 0xd96   :  { %v2993_v35 = vpop.permute.xlu0 %2992 }
 0xd97   :  { %v2995_v56 = vmul.f32 %v6480_v38, %v2993_v35 }
 0xdb2   :  { %v3014_v45 = vpop.permute.xlu1 %3013 }
 0xdb3   :  { %6119 = vmatmul.mubr.msk.f32.vlgmr.msra.gmra.mxu0 %vm187_vm2, %v3014_v45 }
 0xdb4   :  { %6133 = vmatpush3.msra.mxu0 %v7449_v50  ;;  %6140 = vmatprep.mubr.msk.f32.mxu0 %vm6622_vm1, %v6621_v8 }
 0xdb5   :  { %6134 = vmatprep.subr.mxu0 %v6621_v8 }
 0xdb6   :  { %6135 = vmatpush3.msra.mxu0 %v7455_v17 }
 0xdb7   :  { %6136 = vmatprep.subr.mxu0 %v6621_v8 }
 0xdb8   :  { %v3004_v58 = vpop.permute.xlu0 %3003  ;;  %6137 = vmatpush3.msra.mxu0 %v7464_v20 }
 0xdb9   :  { %v7605_v2 = vadd.f32 %v3004_v58, %v2995_v56  ;;  %6138 = vmatprep.subr.mxu0 %v6621_v8 }
 0xdba   :  { %6139 = vmatpush3.msra.mxu0 %v7471_v59 }
 0xdbb   :  { %6481 = vtanh.f32 %v7605_v2  ;;  %6141 = vmatmul.mubr.msk.f32.vlgmr.msra.gmra.mxu0 %vm187_vm2, %v2790_v27  ;;  %6154 = vmatprep.subr.mxu0 %v6621_v8 }
 0xdbc   :  { %6155 = vmatpush3.msra.mxu0 %v7274_v28  ;;  %6162 = vmatprep.mubr.msk.f32.mxu0 %vm6622_vm1, %v6621_v8  ;;  %v3301_v13 = vpop.permute.xlu0 %3300 }
 0xdbd   :  { %6156 = vmatprep.subr.mxu0 %v6621_v8 }
 0xdbe   :  { %6157 = vmatpush3.msra.mxu0 %v7279_v42 }
 0xdbf   :  { %6158 = vmatprep.subr.mxu0 %v6621_v8 }
 0xdc0   :  { %6159 = vmatpush3.msra.mxu0 %v7286_v46 }
 0xdc1   :  { %6160 = vmatprep.subr.mxu0 %v6621_v8 }
 0xdc2   :  { %6161 = vmatpush3.msra.mxu0 %v7293_v31 }
 0xdc3   :  { %6176 = vmatprep.subr.mxu0 %v6621_v8 }
 0xdc8   :  { %v7622_v60 = vpop.eup %6481 }
 0xdc9   :  { %v3092_v28 = vrot.slane %v7622_v60, 6 }
 0xdcb   :  { %6130 = vmatmul.mubr.msk.f32.vlgmr.msra.gmra.mxu1 %vm187_vm2, %v3092_v28 }
 0xdcc   :  { %6144 = vmatpush3.msra.mxu1 %v7308_v33  ;;  %6151 = vmatprep.mubr.msk.f32.mxu1 %vm6622_vm1, %v6621_v8 }
 0xdcd   :  { %6145 = vmatprep.subr.mxu1 %v6621_v8 }
 0xdce   :  { %6146 = vmatpush3.msra.mxu1 %v7314_v34 }
 0xdcf   :  { %6147 = vmatprep.subr.mxu1 %v6621_v8 }
 0xdd0   :  { %6148 = vmatpush3.msra.mxu1 %v7323_v49 }
 0xdd1   :  { %6149 = vmatprep.subr.mxu1 %v6621_v8 }
 0xdd2   :  { %6150 = vmatpush3.msra.mxu1 %v7330_v61  ;;  %v2884_v61 = vpop.permute.xlu1 %2883 }
 0xdd3   :  { %6165 = vmatprep.subr.mxu1 %v6621_v8 }
 0xe0a   :  { %v2859_v42 = vpop.f32.mrf.mxu0 }
 0xe0b   :  { %v2860_v46 = vadd.f32 %v2859_v42, %v7566_v4 }
 0xe0c   :  { %v6098_v31 = vpop.f32.mrf.mxu0 }
 0xe0d   :  { %v2870_v33 = vadd.f32 %v7371_v30, %v2860_v46 }
 0xe0f   :  { %v5429_v54 = vmul.f32 -1.442695, %v2870_v33  ;;  %2878 = vrot.lane.b32.xlu1 %v2870_v33, %s6624_s21 }
 0xe11   :  { %6483 = vpow2.f32 %v5429_v54 }
 0xe13   :  { %3185 = vrot.lane.b32.xlu1 %v7577_v43, %s6624_s21 }
 0xe1e   :  { %v6484_v34 = vpop.eup %6483 }
 0xe1f   :  { %v2874_v49 = vadd.f32 1.0, %v6484_v34 }
 0xe21   :  { %6485 = vrcp.f32 %v2874_v49 }
 0xe2e   :  { %v6486_v63 = vpop.eup %6485 }
 0xe2f   :  { %v2886_v9 = vmul.f32 %v6486_v63, %v2884_v61 }
 0xe31   :  { %2888 = vrot.lane.b32.xlu0 %v2886_v9, %s6625_s22 }
 0xe73   :  { %v3083_v24 = vpop.f32.mrf.mxu0 }
 0xe75   :  { %v6120_v4 = vpop.f32.mrf.mxu0 }
 0xe7b   :  { %v3271_v26 = vpop.f32.mrf.mxu0 }
 0xe7c   :  { %v3276_v16 = vrot.slane %v3271_v26, 6 }
 0xe7d   :  { %v6142_v40 = vpop.f32.mrf.mxu0 }
 0xe7e   :  { %v3278_v52 = vadd.f32 %v3276_v16, %v6993_v14 }
 0xe80   :  { %v3286_v41 = vadd.f32 %v7258_v55, %v3278_v52 }
 0xe81   :  { %v2879_v47 = vpop.permute.xlu1 %2878 }
 0xe82   :  { %v5448_v62 = vmul.f32 -1.442695, %v3286_v41  ;;  %3294 = vrot.lane.b32.xlu0 %v3286_v41, %s6624_s21  ;;  %v2881_v5 = vmul.f32 %v6486_v63, %v2879_v47 }
 0xe84   :  { %6487 = vpow2.f32 %v5448_v62 }
 0xe85   :  { %v3186_v35 = vpop.permute.xlu1 %3185 }
 0xe8b   :  { %v3161_v57 = vpop.f32.mrf.mxu1 }
 0xe8c   :  { %v3162_v7 = vadd.f32 %v3161_v57, %v3083_v24 }
 0xe8d   :  { %v6131_v3 = vpop.f32.mrf.mxu1 }
 0xe8e   :  { %v3172_v22 = vadd.f32 %v7563_v48, %v3162_v7 }
 0xe90   :  { %v5445_v44 = vmul.f32 -1.442695, %v3172_v22  ;;  %3180 = vrot.lane.b32.xlu0 %v3172_v22, %s6624_s21 }
 0xe91   :  { %v6488_v23 = vpop.eup %6487 }
 0xe92   :  { %v3290_v43 = vadd.f32 1.0, %v6488_v23  ;;  %6489 = vpow2.f32 %v5445_v44  ;;  %v7733_v23 = vld [vmem:[%s8123_s5] ss:$0 sm:$0xff] }
 0xe94   :  { %6491 = vrcp.f32 %v3290_v43 }
 0xe9f   :  { %v6490_v10 = vpop.eup %6489 }
 0xea0   :  { %v3176_v55 = vadd.f32 1.0, %v6490_v10 }
 0xea1   :  { %v6492_v38 = vpop.eup %6491 }
 0xea2   :  { %6493 = vrcp.f32 %v3176_v55  ;;  %v3303_v39 = vmul.f32 %v6492_v38, %v3301_v13 }
 0xea3   :  { %v2889_v6 = vpop.permute.xlu0 %2888 }
 0xea4   :  { %3305 = vrot.lane.b32.xlu1 %v3303_v39, %s6625_s22  ;;  %v7650_v27 = vadd.f32 %v2889_v6, %v2881_v5 }
 0xea6   :  { %6495 = vtanh.f32 %v7650_v27 }
 0xeaf   :  { %v6494_v45 = vpop.eup %6493 }
 0xeb0   :  { %v3188_v56 = vmul.f32 %v6494_v45, %v3186_v35 }
 0xeb2   :  { %3190 = vrot.lane.b32.xlu1 %v3188_v56, %s6625_s22 }
 0xeb3   :  { %v6496_v58 = vpop.eup %6495 }
 0xeb4   :  { %3196 = vrot.lane.b32.xlu0 %v6496_v58, %s6625_s22 }
 0xef4   :  { %v3295_v42 = vpop.permute.xlu0 %3294 }
 0xef5   :  { %v3297_v46 = vmul.f32 %v6492_v38, %v3295_v42 }
 0xf02   :  { %v3181_v54 = vpop.permute.xlu0 %3180 }
 0xf03   :  { %v3183_v34 = vmul.f32 %v6494_v45, %v3181_v54 }
 0xf16   :  { %v3306_v31 = vpop.permute.xlu1 %3305 }
 0xf17   :  { %v7655_v33 = vadd.f32 %v3306_v31, %v3297_v46 }
 0xf19   :  { %6497 = vtanh.f32 %v7655_v33 }
 0xf24   :  { %v3191_v49 = vpop.permute.xlu1 %3190 }
 0xf25   :  { %v7658_v63 = vadd.f32 %v3191_v49, %v3183_v34 }
 0xf26   :  { %v6498_v61 = vpop.eup %6497  ;;  %v3197_v9 = vpop.permute.xlu0 %3196 }
 0xf27   :  { %6499 = vtanh.f32 %v7658_v63  ;;  %3199 = vst.msk [vmem:[#allocation2 + $0x8] sm:$0x3] %vm791_vm6, %v3197_v9  ;;  %6152 = vmatmul.mubr.msk.f32.vlgmr.msra.gmra.mxu1 %vm187_vm2, %v3197_v9  ;;  %v3391_v24 = vrot.slane %v6498_v61, 2 }
 0xf28   :  { %6166 = vmatpush3.msra.mxu1 %v7509_v0  ;;  %6173 = vmatprep.mubr.msk.f32.mxu1 %vm6622_vm1, %v6621_v8 }
 0xf29   :  { %6167 = vmatprep.subr.mxu1 %v6621_v8  ;;  %3392 = vrot.lane.b32.xlu1 %v3391_v24, %s6625_s22 }
 0xf2a   :  { %6168 = vmatpush3.msra.mxu1 %v7516_v11 }
 0xf2b   :  { %6169 = vmatprep.subr.mxu1 %v6621_v8 }
 0xf2c   :  { %6170 = vmatpush3.msra.mxu1 %v7525_v18 }
 0xf2d   :  { %6171 = vmatprep.subr.mxu1 %v6621_v8 }
 0xf2e   :  { %6172 = vmatpush3.msra.mxu1 %v7532_v21 }
 0xf2f   :  { %6174 = vmatmul.mubr.msk.f32.vlgmr.msra.gmra.mxu1 %vm187_vm2, %v3092_v28  ;;  %6187 = vmatprep.subr.mxu1 %v6621_v8 }
 0xf30   :  { %6188 = vmatpush3.msra.mxu1 %v7415_v32  ;;  %6195 = vmatprep.mubr.msk.f32.mxu1 %vm6622_vm1, %v6621_v8  ;;  %v3600_v32 = vrot.slane %v7605_v2, 2 }
 0xf31   :  { %6189 = vmatprep.subr.mxu1 %v6621_v8 }
 0xf32   :  { %6190 = vmatpush3.msra.mxu1 %v7420_v36 }
 0xf33   :  { %6191 = vmatprep.subr.mxu1 %v6621_v8 }
 0xf34   :  { %v6500_v4 = vpop.eup %6499  ;;  %6192 = vmatpush3.msra.mxu1 %v7427_v15 }
 0xf35   :  { %3200 = vst.msk [vmem:[#allocation2 + $0x6] sm:$0x3] %vm793_vm7, %v6500_v4  ;;  %3616 = vrot.lane.b32.xlu0 %v6500_v4, %s6625_s22  ;;  %6193 = vmatprep.subr.mxu1 %v6621_v8 }
 0xf36   :  { %6194 = vmatpush3.msra.mxu1 %v7434_v37 }
 0xf37   :  { %6209 = vmatprep.subr.mxu1 %v6621_v8 }
 0xf39   :  { %3583 = vrot.lane.b32.xlu0 %v7556_v25, %s6625_s22 }
 0xf3d   :  { %3601 = vrot.lane.b32.xlu0 %v3600_v32, %s6624_s21  ;;  %v7750_v32 = vld [vmem:[%s8122_s4 + $0x38] sm:$0xff] }
 0xf9b   :  { %v3393_v36 = vpop.permute.xlu1 %3392 }
 0xf9c   :  { %6163 = vmatmul.mubr.msk.f32.vlgmr.msra.gmra.mxu0 %vm187_vm2, %v3393_v36 }
 0xf9d   :  { %6177 = vmatpush3.msra.mxu0 %v7378_v19  ;;  %6184 = vmatprep.mubr.msk.f32.mxu0 %vm6622_vm1, %v6621_v8 }
 0xf9e   :  { %6178 = vmatprep.subr.mxu0 %v6621_v8 }
 0xf9f   :  { %6179 = vmatpush3.msra.mxu0 %v7385_v51 }
 0xfa0   :  { %6180 = vmatprep.subr.mxu0 %v6621_v8 }
 0xfa1   :  { %6181 = vmatpush3.msra.mxu0 %v7392_v53 }
 0xfa2   :  { %6182 = vmatprep.subr.mxu0 %v6621_v8 }
 0xfa3   :  { %6183 = vmatpush3.msra.mxu0 %v7397_v1 }
 0xfa4   :  { %6198 = vmatprep.subr.mxu0 %v6621_v8 }
 0xfa7   :  { %v3617_v15 = vpop.permute.xlu0 %3616 }
 0xfa8   :  { %6185 = vmatmul.mubr.msk.f32.vlgmr.msra.gmra.mxu0 %vm187_vm2, %v3617_v15  ;;  %v7762_v15 = vld [vmem:[%s8122_s4 + $0x28] sm:$0xff] }
 0xfa9   :  { %6199 = vmatpush3.msra.mxu0 %v7449_v50  ;;  %6206 = vmatprep.mubr.msk.f32.mxu0 %vm6622_vm1, %v6621_v8  ;;  %v3902_v50 = vrot.slane %v7655_v33, 6 }
 0xfaa   :  { %6200 = vmatprep.subr.mxu0 %v6621_v8 }
 0xfab   :  { %6201 = vmatpush3.msra.mxu0 %v7455_v17  ;;  %v3584_v40 = vpop.permute.xlu0 %3583 }
 0xfac   :  { %6202 = vmatprep.subr.mxu0 %v6621_v8 }
 0xfad   :  { %6203 = vmatpush3.msra.mxu0 %v7464_v20 }
 0xfae   :  { %6204 = vmatprep.subr.mxu0 %v6621_v8 }
 0xfaf   :  { %6205 = vmatpush3.msra.mxu0 %v7471_v59  ;;  %v3602_v56 = vpop.permute.xlu0 %3601 }
 0xfb0   :  { %6207 = vmatmul.mubr.msk.f32.vlgmr.msra.gmra.mxu0 %vm187_vm2, %v3393_v36  ;;  %6220 = vmatprep.subr.mxu0 %v6621_v8  ;;  %v7755_v36 = vld [vmem:[%s8122_s4 + $0x30] sm:$0xff] }
 0xfb1   :  { %6228 = vmatprep.mubr.msk.f32.mxu0 %vm6622_vm1, %v6621_v8  ;;  %6221 = vmatpush3.msra.mxu0 %v7750_v32 }
 0xfb2   :  { %6222 = vmatprep.subr.mxu0 %v6621_v8 }
 0xfb3   :  { %6223 = vmatpush3.msra.mxu0 %v7755_v36 }
 0xfb4   :  { %6224 = vmatprep.subr.mxu0 %v6621_v8 }
 0xfb5   :  { %6225 = vmatpush3.msra.mxu0 %v7762_v15 }
 0xfb6   :  { %6226 = vmatprep.subr.mxu0 %v6621_v8 }
 0xfe7   :  { %v3382_v19 = vpop.f32.mrf.mxu1 }
 0xfe9   :  { %v6153_v51 = vpop.f32.mrf.mxu1 }
 0xfea   :  { %v7769_v51 = vld [vmem:[%s8122_s4 + $0x20] sm:$0xff] }
 0xfeb   :  { %6227 = vmatpush3.msra.mxu0 %v7769_v51 }
 0xfec   :  { %6242 = vmatprep.subr.mxu0 %v6621_v8 }
 0xfef   :  { %v3566_v53 = vpop.f32.mrf.mxu1 }
 0xff0   :  { %v3571_v1 = vrot.slane %v3566_v53, 4 }
 0xff1   :  { %v6175_v37 = vpop.f32.mrf.mxu1 }
 0xff2   :  { %3572 = vrot.lane.b32.xlu1 %v3571_v1, %s6625_s22 }
 0xff6   :  { %3486 = vrot.lane.b32.xlu1 %v7650_v27, %s6624_s21 }
 0xffa   :  { %3903 = vrot.lane.b32.xlu1 %v3902_v50, %s6624_s21 }
0x105c   :  { %v3462_v17 = vpop.f32.mrf.mxu0 }
0x105d   :  { %v3463_v20 = vadd.f32 %v3462_v17, %v3382_v19 }
0x105e   :  { %v6164_v59 = vpop.f32.mrf.mxu0 }
0x105f   :  { %v3473_v2 = vadd.f32 %v7371_v30, %v3463_v20  ;;  %v7784_v59 = vld [vmem:[%s8121_s3 + $0x38] sm:$0xff] }
0x1061   :  { %v5461_v60 = vmul.f32 -1.442695, %v3473_v2  ;;  %3481 = vrot.lane.b32.xlu0 %v3473_v2, %s6624_s21  ;;  %v7790_v2 = vld [vmem:[%s8121_s3 + $0x30] sm:$0xff] }
0x1063   :  { %6501 = vpow2.f32 %v5461_v60  ;;  %v7806_v60 = vld [vmem:[%s8121_s3 + $0x20] sm:$0xff] }
0x1064   :  { %v3573_v28 = vpop.permute.xlu1 %3572 }
0x1065   :  { %v3575_v26 = vadd.f32 %v3573_v28, %v6805_v29  ;;  %v3576_v16 = vadd.f32 %v3573_v28, %v6991_v12 }
0x1067   :  { %v3586_v52 = vadd.f32 %v3584_v40, %v3575_v26  ;;  %v3587_v41 = vadd.f32 %v3584_v40, %v3576_v16 }
0x1068   :  { %v7727_v62 = vpop.f32.mrf.mxu0  ;;  %v3487_v39 = vpop.permute.xlu1 %3486 }
0x1069   :  { %v5464_v57 = vmul.f32 -1.442695, %v3587_v41  ;;  %3595 = vrot.lane.b32.xlu0 %v3586_v52, %s6624_s21 }
0x106a   :  { %v6186_v7 = vpop.f32.mrf.mxu0 }
0x106b   :  { %6503 = vpow2.f32 %v5464_v57 }
0x106c   :  { %v3904_v46 = vpop.permute.xlu1 %3903 }
0x1070   :  { %v6502_v30 = vpop.eup %6501  ;;  %v3874_v3 = vpop.f32.mrf.mxu0 }
0x1071   :  { %v3477_v22 = vadd.f32 1.0, %v6502_v30  ;;  %v3879_v44 = vrot.slane %v3874_v3, 4 }
0x1072   :  { %v6208_v43 = vpop.f32.mrf.mxu0 }
0x1073   :  { %6505 = vrcp.f32 %v3477_v22  ;;  %v3881_v10 = vadd.f32 %v3879_v44, %v6993_v14 }
0x1075   :  { %v3889_v13 = vadd.f32 %v7733_v23, %v3881_v10 }
0x1077   :  { %v5480_v47 = vmul.f32 -1.442695, %v3889_v13  ;;  %3897 = vrot.lane.b32.xlu0 %v3889_v13, %s6624_s21  ;;  %v7848_v13 = vld [vmem:[%s8123_s5 + $0x1] ss:$0 sm:$0xff] }
0x1078   :  { %v6504_v55 = vpop.eup %6503 }
0x1079   :  { %v3591_v38 = vadd.f32 1.0, %v6504_v55  ;;  %6507 = vpow2.f32 %v5480_v47 }
0x107b   :  { %6509 = vrcp.f32 %v3591_v38 }
0x1080   :  { %v6506_v5 = vpop.eup %6505 }
0x1081   :  { %v3489_v6 = vmul.f32 %v6506_v5, %v3487_v39 }
0x1083   :  { %3491 = vrot.lane.b32.xlu1 %v3489_v6, %s6625_s22 }
0x1086   :  { %v6508_v27 = vpop.eup %6507 }
0x1087   :  { %v3893_v45 = vadd.f32 1.0, %v6508_v27  ;;  %v7855_v27 = vld [vmem:[%s8125_s7 + $0x38] sm:$0xff] }
0x1088   :  { %v6510_v35 = vpop.eup %6509 }
0x1089   :  { %6511 = vrcp.f32 %v3893_v45  ;;  %v3604_v58 = vmul.f32 %v6510_v35, %v3602_v56  ;;  %v7860_v45 = vld [vmem:[%s8125_s7 + $0x30] sm:$0xff]  ;;  %v7867_v56 = vld [vmem:[%s8125_s7 + $0x28] sm:$0xff] }
0x108b   :  { %3606 = vrot.lane.b32.xlu1 %v3604_v58, %s6625_s22 }
0x1096   :  { %v6512_v42 = vpop.eup %6511 }
0x1097   :  { %v3906_v31 = vmul.f32 %v6512_v42, %v3904_v46 }
0x1099   :  { %3908 = vrot.lane.b32.xlu1 %v3906_v31, %s6625_s22  ;;  %v7876_v31 = vld [vmem:[%s8125_s7 + $0x20] sm:$0xff] }
0x10d3   :  { %v3482_v33 = vpop.permute.xlu0 %3481 }
0x10d4   :  { %v3484_v54 = vmul.f32 %v6506_v5, %v3482_v33 }
0x10db   :  { %v3596_v61 = vpop.permute.xlu0 %3595 }
0x10dc   :  { %v3598_v9 = vmul.f32 %v6510_v35, %v3596_v61 }
0x10e9   :  { %v3898_v53 = vpop.permute.xlu0 %3897 }
0x10ea   :  { %v3900_v1 = vmul.f32 %v6512_v42, %v3898_v53 }
0x10f5   :  { %v3492_v34 = vpop.permute.xlu1 %3491 }
0x10f6   :  { %v7741_v49 = vadd.f32 %v3492_v34, %v3484_v54 }
0x10f8   :  { %6513 = vtanh.f32 %v7741_v49 }
0x10fd   :  { %v3607_v24 = vpop.permute.xlu1 %3606 }
0x10fe   :  { %v7744_v4 = vadd.f32 %v3607_v24, %v3598_v9 }
0x1100   :  { %6515 = vtanh.f32 %v7744_v4  ;;  %v4203_v10 = vrot.slane %v7744_v4, 2 }
0x1105   :  { %v6514_v19 = vpop.eup %6513 }
0x1106   :  { %3799 = vrot.lane.b32.xlu0 %v6514_v19, %s6625_s22 }
0x110a   :  { %3788 = vrot.lane.b32.xlu0 %v7658_v63, %s6624_s21  ;;  %v7799_v63 = vld [vmem:[%s8121_s3 + $0x28] sm:$0xff] }
0x110b   :  { %v3909_v37 = vpop.permute.xlu1 %3908 }
0x110c   :  { %v7778_v50 = vadd.f32 %v3909_v37, %v3900_v1 }
0x110d   :  { %v6516_v17 = vpop.eup %6515 }
0x110e   :  { %v3695_v20 = vrot.slane %v6516_v17, 4  ;;  %6517 = vtanh.f32 %v7778_v50 }
0x1110   :  { %6196 = vmatmul.mubr.msk.f32.vlgmr.msra.gmra.mxu1 %vm187_vm2, %v3695_v20 }
0x1111   :  { %6210 = vmatpush3.msra.mxu1 %v7784_v59  ;;  %6217 = vmatprep.mubr.msk.f32.mxu1 %vm6622_vm1, %v6621_v8 }
0x1112   :  { %6211 = vmatprep.subr.mxu1 %v6621_v8 }
0x1113   :  { %6212 = vmatpush3.msra.mxu1 %v7790_v2 }
0x1114   :  { %6213 = vmatprep.subr.mxu1 %v6621_v8 }
0x1115   :  { %6214 = vmatpush3.msra.mxu1 %v7799_v63 }
0x1116   :  { %6215 = vmatprep.subr.mxu1 %v6621_v8 }
0x1117   :  { %6216 = vmatpush3.msra.mxu1 %v7806_v60 }
0x1118   :  { %6231 = vmatprep.subr.mxu1 %v6621_v8 }
0x111b   :  { %v6518_v28 = vpop.eup %6517 }
0x111c   :  { %v3994_v26 = vrot.slane %v6518_v28, 4 }
0x111e   :  { %3995 = vrot.lane.b32.xlu1 %v3994_v26, %s6625_s22  ;;  %v7889_v26 = vld [vmem:[%s8126_s8 + $0x38] sm:$0xff] }
0x1178   :  { %v3800_v16 = vpop.permute.xlu0 %3799 }
0x1179   :  { %3802 = vst.msk [vmem:[#allocation2 + $0xa] sm:$0x3] %vm791_vm6, %v3800_v16  ;;  %6218 = vmatmul.mubr.msk.f32.vlgmr.msra.gmra.mxu1 %vm187_vm2, %v3800_v16 }
0x117a   :  { %6232 = vmatpush3.msra.mxu1 %v7509_v0  ;;  %6239 = vmatprep.mubr.msk.f32.mxu1 %vm6622_vm1, %v6621_v8 }
0x117b   :  { %6233 = vmatprep.subr.mxu1 %v6621_v8 }
0x117c   :  { %6234 = vmatpush3.msra.mxu1 %v7516_v11  ;;  %v3789_v30 = vpop.permute.xlu0 %3788 }
0x117d   :  { %6235 = vmatprep.subr.mxu1 %v6621_v8 }
0x117e   :  { %6236 = vmatpush3.msra.mxu1 %v7525_v18 }
0x117f   :  { %6237 = vmatprep.subr.mxu1 %v6621_v8 }
0x1180   :  { %6238 = vmatpush3.msra.mxu1 %v7532_v21 }
0x1181   :  { %6240 = vmatmul.mubr.msk.f32.vlgmr.msra.gmra.mxu1 %vm187_vm2, %v3695_v20  ;;  %6253 = vmatprep.subr.mxu1 %v6621_v8 }
0x1182   :  { %6261 = vmatprep.mubr.msk.f32.mxu1 %vm6622_vm1, %v6621_v8  ;;  %6254 = vmatpush3.msra.mxu1 %v7889_v26 }
0x1183   :  { %6255 = vmatprep.subr.mxu1 %v6621_v8 }
0x1190   :  { %v7828_v0 = vpop.permute.xlu1 %3995 }
0x1191   :  { %6229 = vmatmul.mubr.msk.f32.vlgmr.msra.gmra.mxu0 %vm187_vm2, %v7828_v0 }
0x1192   :  { %6250 = vmatprep.mubr.msk.f32.mxu0 %vm6622_vm1, %v6621_v8  ;;  %6243 = vmatpush3.msra.mxu0 %v7855_v27 }
0x1193   :  { %6244 = vmatprep.subr.mxu0 %v6621_v8 }
0x1194   :  { %6245 = vmatpush3.msra.mxu0 %v7860_v45 }
0x1195   :  { %6246 = vmatprep.subr.mxu0 %v6621_v8 }
0x1196   :  { %6247 = vmatpush3.msra.mxu0 %v7867_v56 }
0x1197   :  { %6248 = vmatprep.subr.mxu0 %v6621_v8 }
0x1198   :  { %6249 = vmatpush3.msra.mxu0 %v7876_v31 }
0x1199   :  { %6264 = vmatprep.subr.mxu0 %v6621_v8 }
0x11d0   :  { %v3764_v11 = vpop.f32.mrf.mxu1 }
0x11d1   :  { %v3765_v18 = vadd.f32 %v3764_v11, %v7727_v62  ;;  %v7896_v11 = vld [vmem:[%s8126_s8 + $0x30] sm:$0xff] }
0x11d2   :  { %v6197_v40 = vpop.f32.mrf.mxu1  ;;  %6256 = vmatpush3.msra.mxu1 %v7896_v11 }
0x11d3   :  { %v3775_v21 = vadd.f32 %v7563_v48, %v3765_v18  ;;  %6257 = vmatprep.subr.mxu1 %v6621_v8  ;;  %v7904_v18 = vld [vmem:[%s8126_s8 + $0x28] sm:$0xff]  ;;  %v4505_v40 = vrot.slane %v7778_v50, 6 }
0x11d4   :  { %6258 = vmatpush3.msra.mxu1 %v7904_v18 }
0x11d5   :  { %v5477_v52 = vmul.f32 -1.442695, %v3775_v21  ;;  %3783 = vrot.lane.b32.xlu1 %v3775_v21, %s6624_s21  ;;  %6259 = vmatprep.subr.mxu1 %v6621_v8  ;;  %v7912_v21 = vld [vmem:[%s8126_s8 + $0x20] sm:$0xff] }
0x11d6   :  { %6260 = vmatpush3.msra.mxu1 %v7912_v21 }
0x11d7   :  { %6519 = vpow2.f32 %v5477_v52  ;;  %6275 = vmatprep.subr.mxu1 %v6621_v8 }
0x11d9   :  { %4089 = vrot.lane.b32.xlu1 %v7741_v49, %s6624_s21 }
0x11dd   :  { %4186 = vrot.lane.b32.xlu1 %v7556_v25, %s6625_s22 }
0x11e4   :  { %v6520_v41 = vpop.eup %6519 }
0x11e5   :  { %v3779_v57 = vadd.f32 1.0, %v6520_v41 }
0x11e7   :  { %6521 = vrcp.f32 %v3779_v57 }
0x11f4   :  { %v6522_v7 = vpop.eup %6521 }
0x11f5   :  { %v3791_v3 = vmul.f32 %v6522_v7, %v3789_v30 }
0x11f7   :  { %3793 = vrot.lane.b32.xlu0 %v3791_v3, %s6625_s22  ;;  %v4409_v3 = vld [vmem:[%s8121_s3 + $0x10] sm:$0xff] }
0x1239   :  { %v3985_v62 = vpop.f32.mrf.mxu1 }
0x123b   :  { %v6219_v48 = vpop.f32.mrf.mxu1 }
0x123c   :  { %v4407_v48 = vld [vmem:[%s8121_s3] sm:$0xff] }
0x1241   :  { %v4169_v22 = vpop.f32.mrf.mxu1 }
0x1242   :  { %v4174_v44 = vrot.slane %v4169_v22, 6 }
0x1243   :  { %v6241_v43 = vpop.f32.mrf.mxu1 }
0x1244   :  { %4175 = vrot.lane.b32.xlu0 %v4174_v44, %s6625_s22 }
0x1247   :  { %v3784_v6 = vpop.permute.xlu1 %3783 }
0x1248   :  { %4204 = vrot.lane.b32.xlu0 %v4203_v10, %s6624_s21  ;;  %v3786_v58 = vmul.f32 %v6522_v7, %v3784_v6  ;;  %v4410_v7 = vld [vmem:[%s8121_s3 + $0x18] sm:$0xff] }
0x124b   :  { %v4090_v54 = vpop.permute.xlu1 %4089 }
0x124f   :  { %v4187_v9 = vpop.permute.xlu1 %4186 }
0x1251   :  { %v4065_v25 = vpop.f32.mrf.mxu0 }
0x1252   :  { %v4066_v47 = vadd.f32 %v4065_v25, %v3985_v62  ;;  %v4408_v62 = vld [vmem:[%s8121_s3 + $0x8] sm:$0xff] }
0x1253   :  { %v6230_v55 = vpop.f32.mrf.mxu0 }
0x1254   :  { %v4076_v38 = vadd.f32 %v7848_v13, %v4066_v47 }
0x1256   :  { %v5493_v5 = vmul.f32 -1.442695, %v4076_v38  ;;  %4084 = vrot.lane.b32.xlu1 %v4076_v38, %s6624_s21 }
0x1258   :  { %6523 = vpow2.f32 %v5493_v5 }
0x1265   :  { %v6524_v39 = vpop.eup %6523 }
0x1266   :  { %v4080_v35 = vadd.f32 1.0, %v6524_v39 }
0x1268   :  { %6525 = vrcp.f32 %v4080_v35 }
0x1269   :  { %v3794_v42 = vpop.permute.xlu0 %3793 }
0x126a   :  { %v3796_v46 = vadd.f32 %v3794_v42, %v3786_v58 }
0x126c   :  { %6527 = vtanh.f32 %v3796_v46 }
0x1275   :  { %v6526_v33 = vpop.eup %6525 }
0x1276   :  { %v4092_v34 = vmul.f32 %v6526_v33, %v4090_v54  ;;  %v5527_v54 = vld [vmem:[%s8127_s9] ss:$0 sm:$0xff] }
0x1278   :  { %4094 = vrot.lane.b32.xlu0 %v4092_v34, %s6625_s22  ;;  %v8006_v34 = vld [vmem:[%s8127_s9 + $0x1] ss:$0 sm:$0xff] }
0x1279   :  { %v6528_v49 = vpop.eup %6527 }
0x127a   :  { %3803 = vst.msk [vmem:[#allocation2 + $0x4] sm:$0x3] %vm793_vm7, %v6528_v49  ;;  %4219 = vrot.lane.b32.xlu1 %v6528_v49, %s6625_s22 }
0x12b6   :  { %v4176_v61 = vpop.permute.xlu0 %4175 }
0x12b7   :  { %v4178_v24 = vadd.f32 %v4176_v61, %v6805_v29  ;;  %v4179_v4 = vadd.f32 %v4176_v61, %v6991_v12 }
0x12b9   :  { %v4189_v19 = vadd.f32 %v4187_v9, %v4178_v24  ;;  %v4190_v53 = vadd.f32 %v4187_v9, %v4179_v4 }
0x12ba   :  { %v4205_v28 = vpop.permute.xlu0 %4204 }
0x12bb   :  { %v5496_v1 = vmul.f32 -1.442695, %v4190_v53  ;;  %4198 = vrot.lane.b32.xlu0 %v4189_v19, %s6624_s21 }
0x12bd   :  { %6529 = vpow2.f32 %v5496_v1 }
0x12c8   :  { %v4085_v52 = vpop.permute.xlu1 %4084 }
0x12c9   :  { %v4087_v41 = vmul.f32 %v6526_v33, %v4085_v52 }
0x12ca   :  { %v6530_v37 = vpop.eup %6529 }
0x12cb   :  { %v4194_v17 = vadd.f32 1.0, %v6530_v37 }
0x12cd   :  { %6531 = vrcp.f32 %v4194_v17 }
0x12da   :  { %v6532_v20 = vpop.eup %6531 }
0x12db   :  { %v4207_v16 = vmul.f32 %v6532_v20, %v4205_v28 }
0x12dd   :  { %4209 = vrot.lane.b32.xlu1 %v4207_v16, %s6625_s22 }
0x12e1   :  { %4506 = vrot.lane.b32.xlu1 %v4505_v40, %s6624_s21 }
0x12e5   :  { %4391 = vrot.lane.b32.xlu1 %v3796_v46, %s6624_s21 }
0x12ea   :  { %v4095_v50 = vpop.permute.xlu0 %4094 }
0x12eb   :  { %v7918_v57 = vadd.f32 %v4095_v50, %v4087_v41 }
0x12ec   :  { %v4220_v30 = vpop.permute.xlu1 %4219 }
0x12ed   :  { %6533 = vtanh.f32 %v7918_v57  ;;  %6251 = vmatmul.mubr.msk.f32.vlgmr.msra.gmra.mxu0 %vm187_vm2, %v4220_v30 }
0x12ee   :  { %6265 = vmatpush3.msra.mxu0 %v4410_v7  ;;  %6272 = vmatprep.mubr.msk.f32.mxu0 %vm6622_vm1, %v6621_v8 }
0x12ef   :  { %6266 = vmatprep.subr.mxu0 %v6621_v8 }
0x12f0   :  { %6267 = vmatpush3.msra.mxu0 %v4409_v3 }
0x12f1   :  { %6268 = vmatprep.subr.mxu0 %v6621_v8 }
0x12f2   :  { %6269 = vmatpush3.msra.mxu0 %v4408_v62 }
0x12f3   :  { %6270 = vmatprep.subr.mxu0 %v6621_v8 }
0x12f4   :  { %6271 = vmatpush3.msra.mxu0 %v4407_v48 }
0x12f5   :  { %6273 = vmatmul.mubr.msk.f32.vlgmr.msra.gmra.mxu0 %vm187_vm2, %v7828_v0  ;;  %6286 = vmatprep.subr.mxu0 %v6621_v8 }
0x12f6   :  { %6287 = vmatpush3.msra.mxu0 %v7750_v32  ;;  %6294 = vmatprep.mubr.msk.f32.mxu0 %vm6622_vm1, %v6621_v8 }
0x12f7   :  { %6288 = vmatprep.subr.mxu0 %v6621_v8 }
0x12f8   :  { %6289 = vmatpush3.msra.mxu0 %v7755_v36 }
0x12f9   :  { %6290 = vmatprep.subr.mxu0 %v6621_v8 }
0x12fa   :  { %v6534_v22 = vpop.eup %6533  ;;  %6291 = vmatpush3.msra.mxu0 %v7762_v15  ;;  %v4705_v15 = vld [vmem:[%s8125_s7 + $0x18] sm:$0xff] }
0x12fb   :  { %4402 = vrot.lane.b32.xlu0 %v6534_v22, %s6625_s22  ;;  %6292 = vmatprep.subr.mxu0 %v6621_v8 }
0x12fc   :  { %6293 = vmatpush3.msra.mxu0 %v7769_v51 }
0x12fd   :  { %6308 = vmatprep.subr.mxu0 %v6621_v8 }
0x132d   :  { %v4199_v32 = vpop.permute.xlu0 %4198 }
0x132e   :  { %v4201_v0 = vmul.f32 %v6532_v20, %v4199_v32 }
0x134f   :  { %v4210_v44 = vpop.permute.xlu1 %4209 }
0x1350   :  { %v4212_v43 = vadd.f32 %v4210_v44, %v4201_v0 }
0x1352   :  { %6535 = vtanh.f32 %v4212_v43 }
0x1353   :  { %v4507_v46 = vpop.permute.xlu1 %4506 }
0x1357   :  { %v4392_v28 = vpop.permute.xlu1 %4391 }
0x135f   :  { %v6536_v10 = vpop.eup %6535 }
0x1360   :  { %v4298_v36 = vrot.slane %v6536_v10, 2 }
0x1362   :  { %6262 = vmatmul.mubr.msk.f32.vlgmr.msra.gmra.mxu1 %vm187_vm2, %v4298_v36 }
0x1363   :  { %6276 = vmatpush3.msra.mxu1 %v7784_v59  ;;  %6283 = vmatprep.mubr.msk.f32.mxu1 %vm6622_vm1, %v6621_v8  ;;  %v4704_v59 = vld [vmem:[%s8125_s7 + $0x10] sm:$0xff] }
0x1364   :  { %6277 = vmatprep.subr.mxu1 %v6621_v8 }
0x1365   :  { %6278 = vmatpush3.msra.mxu1 %v7790_v2  ;;  %v4703_v2 = vld [vmem:[%s8125_s7 + $0x8] sm:$0xff] }
0x1366   :  { %6279 = vmatprep.subr.mxu1 %v6621_v8 }
0x1367   :  { %6280 = vmatpush3.msra.mxu1 %v7799_v63  ;;  %v4702_v63 = vld [vmem:[%s8125_s7] sm:$0xff] }
0x1368   :  { %6281 = vmatprep.subr.mxu1 %v6621_v8 }
0x1369   :  { %6282 = vmatpush3.msra.mxu1 %v7806_v60 }
0x136a   :  { %6297 = vmatprep.subr.mxu1 %v6621_v8 }
0x136d   :  { %v4403_v51 = vpop.permute.xlu0 %4402 }
0x136e   :  { %4405 = vst.msk [vmem:[#allocation2 + $0xc] sm:$0x3] %vm791_vm6, %v4403_v51  ;;  %6284 = vmatmul.mubr.msk.f32.vlgmr.msra.gmra.mxu1 %vm187_vm2, %v4403_v51 }
0x136f   :  { %6298 = vmatpush3.msra.mxu1 %v4705_v15  ;;  %6305 = vmatprep.mubr.msk.f32.mxu1 %vm6622_vm1, %v6621_v8 }
0x1370   :  { %6299 = vmatprep.subr.mxu1 %v6621_v8 }
0x1371   :  { %6300 = vmatpush3.msra.mxu1 %v4704_v59 }
0x1372   :  { %6301 = vmatprep.subr.mxu1 %v6621_v8 }
0x1373   :  { %6302 = vmatpush3.msra.mxu1 %v4703_v2 }
0x1374   :  { %6303 = vmatprep.subr.mxu1 %v6621_v8 }
0x1375   :  { %6304 = vmatpush3.msra.mxu1 %v4702_v63 }
0x1376   :  { %6306 = vmatmul.mubr.msk.f32.vlgmr.msra.gmra.mxu1 %vm187_vm2, %v4298_v36  ;;  %6319 = vmatprep.subr.mxu1 %v6621_v8 }
0x1377   :  { %6320 = vmatpush3.msra.mxu1 %v7889_v26  ;;  %6327 = vmatprep.mubr.msk.f32.mxu1 %vm6622_vm1, %v6621_v8 }
0x1378   :  { %6321 = vmatprep.subr.mxu1 %v6621_v8 }
0x1379   :  { %6322 = vmatpush3.msra.mxu1 %v7896_v11 }
0x137a   :  { %6323 = vmatprep.subr.mxu1 %v6621_v8 }
0x137b   :  { %6324 = vmatpush3.msra.mxu1 %v7904_v18 }
0x137c   :  { %6325 = vmatprep.subr.mxu1 %v6621_v8 }
0x137d   :  { %6326 = vmatpush3.msra.mxu1 %v7912_v21 }
0x13ad   :  { %v4289_v60 = vpop.f32.mrf.mxu0 }
0x13af   :  { %v6252_v25 = vpop.f32.mrf.mxu0 }
0x13b5   :  { %v4477_v47 = vpop.f32.mrf.mxu0 }
0x13b6   :  { %v4482_v55 = vrot.slane %v4477_v47, 2 }
0x13b7   :  { %v6274_v38 = vpop.f32.mrf.mxu0 }
0x13b8   :  { %v4484_v5 = vadd.f32 %v4482_v55, %v6993_v14  ;;  %v4805_v14 = vrot.slane %v4212_v43, 2 }
0x13ba   :  { %v4492_v39 = vadd.f32 %v7733_v23, %v4484_v5 }
0x13bc   :  { %v5512_v6 = vmul.f32 -1.442695, %v4492_v39  ;;  %4500 = vrot.lane.b32.xlu0 %v4492_v39, %s6624_s21 }
0x13be   :  { %6537 = vpow2.f32 %v5512_v6 }
0x13cb   :  { %v6538_v35 = vpop.eup %6537 }
0x13cc   :  { %v4496_v58 = vadd.f32 1.0, %v6538_v35 }
0x13ce   :  { %6539 = vrcp.f32 %v4496_v58 }
0x13db   :  { %v6540_v42 = vpop.eup %6539 }
0x13dc   :  { %v4509_v33 = vmul.f32 %v6540_v42, %v4507_v46 }
0x13de   :  { %4511 = vrot.lane.b32.xlu0 %v4509_v33, %s6625_s22 }
0x13e2   :  { %4788 = vrot.lane.b32.xlu0 %v5527_v54, %s6625_s22 }
0x13e6   :  { %4806 = vrot.lane.b32.xlu0 %v4805_v14, %s6624_s21 }
0x1422   :  { %v4367_v23 = vpop.f32.mrf.mxu1 }
0x1423   :  { %v4368_v49 = vadd.f32 %v4367_v23, %v4289_v60 }
0x1424   :  { %v6263_v61 = vpop.f32.mrf.mxu1 }
0x1425   :  { %v4378_v9 = vadd.f32 %v8006_v34, %v4368_v49 }
0x1427   :  { %v5509_v24 = vmul.f32 -1.442695, %v4378_v9 }
0x1429   :  { %6541 = vpow2.f32 %v5509_v24 }
0x142e   :  { %v8009_v4 = vpop.f32.mrf.mxu1  ;;  %v4501_v16 = vpop.permute.xlu0 %4500 }
0x142f   :  { %v4503_v11 = vmul.f32 %v6540_v42, %v4501_v16  ;;  %v5010_v16 = vld [vmem:[%s8128_s10] sm:$0xff] }
0x1430   :  { %v6285_v19 = vpop.f32.mrf.mxu1 }
0x1431   :  { %v5016_v19 = vld [vmem:[%s8128_s10 + $0x30] sm:$0xff] }
0x1436   :  { %v6542_v53 = vpop.eup %6541  ;;  %v4772_v1 = vpop.f32.mrf.mxu1 }
0x1437   :  { %v4382_v37 = vadd.f32 1.0, %v6542_v53  ;;  %4777 = vrot.lane.b32.xlu1 %v4772_v1, %s6625_s22  ;;  %v5015_v1 = vld [vmem:[%s8128_s10 + $0x28] sm:$0xff] }
0x1438   :  { %v6307_v17 = vpop.f32.mrf.mxu1 }
0x1439   :  { %6543 = vrcp.f32 %v4382_v37  ;;  %v5014_v37 = vld [vmem:[%s8128_s10 + $0x20] sm:$0xff]  ;;  %v5013_v17 = vld [vmem:[%s8128_s10 + $0x18] sm:$0xff] }
0x143b   :  { %4386 = vrot.lane.b32.xlu1 %v4378_v9, %s6624_s21 }
0x1446   :  { %v6544_v20 = vpop.eup %6543 }
0x1447   :  { %v4394_v26 = vmul.f32 %v6544_v20, %v4392_v28 }
0x1449   :  { %4396 = vrot.lane.b32.xlu1 %v4394_v26, %s6625_s22  ;;  %v5011_v26 = vld [vmem:[%s8128_s10 + $0x8] sm:$0xff] }
0x1450   :  { %v4512_v18 = vpop.permute.xlu0 %4511 }
0x1451   :  { %v8014_v40 = vadd.f32 %v4512_v18, %v4503_v11 }
0x1453   :  { %6545 = vtanh.f32 %v8014_v40 }
0x1454   :  { %v4789_v30 = vpop.permute.xlu0 %4788 }
0x1460   :  { %v6546_v21 = vpop.eup %6545 }
0x1461   :  { %v4597_v52 = vrot.slane %v6546_v21, 6 }
0x1463   :  { %4598 = vrot.lane.b32.xlu0 %v4597_v52, %s6625_s22 }
0x14a9   :  { %v4778_v41 = vpop.permute.xlu1 %4777 }
0x14aa   :  { %v4780_v50 = vadd.f32 %v4778_v41, %v6805_v29  ;;  %v4781_v7 = vadd.f32 %v4778_v41, %v6991_v12  ;;  %v4807_v12 = vpop.permute.xlu0 %4806 }
0x14ac   :  { %v4791_v3 = vadd.f32 %v4789_v30, %v4780_v50  ;;  %v4792_v62 = vadd.f32 %v4789_v30, %v4781_v7 }
0x14ad   :  { %v4387_v22 = vpop.permute.xlu1 %4386 }
0x14ae   :  { %v5528_v48 = vmul.f32 -1.442695, %v4792_v62  ;;  %4800 = vrot.lane.b32.xlu1 %v4791_v3, %s6624_s21  ;;  %v4389_v32 = vmul.f32 %v6544_v20, %v4387_v22  ;;  %v5012_v20 = vld [vmem:[%s8128_s10 + $0x10] sm:$0xff]  ;;  %v5108_v3 = vld [vmem:[%s8130_s12 + $0x8] sm:$0xff]  ;;  %v5107_v62 = vld [vmem:[%s8130_s12] sm:$0xff] }
0x14af   :  { %v5542_v22 = vld [vmem:[%s8129_s11] ss:$0 sm:$0xff]  ;;  %s6626_s11 = smov [#allocation3]  }
0x14b0   :  { %6547 = vpow2.f32 %v5528_v48  ;;  %s5249_s12 = sshll.u32 %s6626_s11, 4  ;;  %s5250_s12 = int_to_ptr.vmem [resolvable:$true] %s5249_s12 }
0x14b1   :  { %s6576_s30 = scalar_lea.vmem %s5250_s12, 64  ;;  %p6581_p1 = scmp.lt.s32.totalorder %s5250_s12, %s5250_s12 }
0x14b2   :  { %p6577_p0 = scmp.ne.s32.totalorder %s5250_s12, %s6576_s30  ;;  %p6582_p2 = scmp.lt.s32.totalorder %s6576_s30, %s6576_s30 }
0x14b4   :  { %p6583_p3 = por %p6582_p2, %p6581_p1 }
0x14b6   :  { %p6584_p4 = pnand %p6583_p3, %p6577_p0 }
0x14bb   :  { %v4397_v0 = vpop.permute.xlu1 %4396 }
0x14bc   :  { %v4399_v44 = vadd.f32 %v4397_v0, %v4389_v32 }
0x14bd   :  { %v6548_v43 = vpop.eup %6547 }
0x14be   :  { %v4796_v10 = vadd.f32 1.0, %v6548_v43  ;;  %6549 = vtanh.f32 %v4399_v44  ;;  %v5545_v43 = vld [vmem:[%s8131_s13] ss:$0 sm:$0xff]  ;;  %s6627_s13 = smov [#allocation5]  }
0x14bf   :  { %s5261_s29 = sshll.u32 %s6627_s13, 4  ;;  %s5262_s29 = int_to_ptr.vmem [resolvable:$true] %s5261_s29 }
0x14c0   :  { %6551 = vrcp.f32 %v4796_v10 }
0x14cb   :  { %v6550_v36 = vpop.eup %6549 }
0x14cc   :  { %4406 = vst.msk [vmem:[#allocation2 + $0x2] sm:$0x3] %vm793_vm7, %v6550_v36  ;;  %4821 = vrot.lane.b32.xlu1 %v6550_v36, %s6625_s22 }
0x14cd   :  { %v6552_v29 = vpop.eup %6551 }
0x14ce   :  { %v4809_v15 = vmul.f32 %v6552_v29, %v4807_v12 }
0x14d0   :  { %4811 = vrot.lane.b32.xlu0 %v4809_v15, %s6625_s22  ;;  %4992 = vrot.lane.b32.xlu1 %v4399_v44, %s6624_s21 }
0x14d4   :  { %4692 = vrot.lane.b32.xlu0 %v7918_v57, %s6624_s21 }
0x14d5   :  { %v4599_v51 = vpop.permute.xlu0 %4598 }
0x14d6   :  { %6295 = vmatmul.mubr.msk.f32.vlgmr.msra.gmra.mxu0 %vm187_vm2, %v4599_v51 }
0x14d7   :  { %6309 = vmatpush3.msra.mxu0 %v7855_v27  ;;  %6316 = vmatprep.mubr.msk.f32.mxu0 %vm6622_vm1, %v6621_v8 }
0x14d8   :  { %6310 = vmatprep.subr.mxu0 %v6621_v8 }
0x14d9   :  { %6311 = vmatpush3.msra.mxu0 %v7860_v45 }
0x14da   :  { %6312 = vmatprep.subr.mxu0 %v6621_v8 }
0x14db   :  { %6313 = vmatpush3.msra.mxu0 %v7867_v56 }
0x14dc   :  { %6314 = vmatprep.subr.mxu0 %v6621_v8 }
0x14dd   :  { %6315 = vmatpush3.msra.mxu0 %v7876_v31 }
0x1520   :  { %v4801_v57 = vpop.permute.xlu1 %4800 }
0x1521   :  { %v4803_v27 = vmul.f32 %v6552_v29, %v4801_v57 }
0x153e   :  { %v4822_v59 = vpop.permute.xlu1 %4821 }
0x153f   :  { %6317 = vmatmul.mubr.msk.f32.vlgmr.msra.gmra.mxu0 %vm187_vm2, %v4822_v59 }
0x1542   :  { %v4812_v2 = vpop.permute.xlu0 %4811  ;;  %v4993_v23 = vpop.permute.xlu1 %4992 }
0x1543   :  { %v4814_v63 = vadd.f32 %v4812_v2, %v4803_v27 }
0x1545   :  { %6553 = vtanh.f32 %v4814_v63  ;;  %5229 = vst.msk [vmem:[#allocation5] sm:$0x3] %vm791_vm6, %v4814_v63 }
0x1546   :  { %v4693_v5 = vpop.permute.xlu0 %4692 }
0x1552   :  { %v6554_v60 = vpop.eup %6553 }
0x1553   :  { %6328 = vmatmul.mubr.msk.f32.vlgmr.msra.gmra.mxu1 %vm187_vm2, %v6554_v60 }
0x1596   :  { %v4668_v45 = vpop.f32.mrf.mxu0 }
0x1597   :  { %v4669_v56 = vadd.f32 %v4668_v45, %v8009_v4  ;;  %v5017_v4 = vld [vmem:[%s8128_s10 + $0x38] sm:$0xff] }
0x1598   :  { %v6296_v25 = vpop.f32.mrf.mxu0  ;;  %6330 = vmatprep.subr.mxu0 %v5017_v4 }
0x1599   :  { %v4679_v8 = vadd.f32 %v7848_v13, %v4669_v56  ;;  %6331 = vmatpush3.msra.mxu0 %v5017_v4 }
0x159a   :  { %6332 = vmatprep.subr.mxu0 %v5016_v19 }
0x159b   :  { %v5525_v31 = vmul.f32 -1.442695, %v4679_v8  ;;  %4687 = vrot.lane.b32.xlu0 %v4679_v8, %s6624_s21  ;;  %6333 = vmatpush3.msra.mxu0 %v5016_v19 }
0x159c   :  { %6334 = vmatprep.subr.mxu0 %v5015_v1 }
0x159d   :  { %6555 = vpow2.f32 %v5525_v31  ;;  %6335 = vmatpush3.msra.mxu0 %v5015_v1 }
0x159e   :  { %6336 = vmatprep.subr.mxu0 %v5014_v37 }
0x159f   :  { %6337 = vmatpush3.msra.mxu0 %v5014_v37 }
0x15a0   :  { %6338 = vmatprep.subr.mxu0 %v5013_v17 }
0x15a1   :  { %6339 = vmatpush3.msra.mxu0 %v5013_v17 }
0x15a2   :  { %6340 = vmatprep.subr.mxu0 %v5012_v20 }
0x15a3   :  { %6341 = vmatpush3.msra.mxu0 %v5012_v20 }
0x15a4   :  { %6342 = vmatprep.subr.mxu0 %v5011_v26 }
0x15a5   :  { %6343 = vmatpush3.msra.mxu0 %v5011_v26 }
0x15a6   :  { %6344 = vmatprep.subr.mxu0 %v5010_v16 }
0x15a7   :  { %6345 = vmatpush3.msra.mxu0 %v5010_v16 }
0x15a8   :  { %6349 = vmatprep.subr.mxu0 %v5108_v3 }
0x15aa   :  { %v6556_v47 = vpop.eup %6555 }
0x15ab   :  { %v4683_v55 = vadd.f32 1.0, %v6556_v47 }
0x15ad   :  { %6557 = vrcp.f32 %v4683_v55 }
0x15ba   :  { %v6558_v38 = vpop.eup %6557 }
0x15bb   :  { %v4695_v39 = vmul.f32 %v6558_v38, %v4693_v5 }
0x15bd   :  { %4697 = vrot.lane.b32.xlu1 %v4695_v39, %s6625_s22 }
0x15ff   :  { %v4891_v6 = vpop.f32.mrf.mxu0 }
0x1601   :  { %v6318_v35 = vpop.f32.mrf.mxu0 }
0x160d   :  { %v4688_v49 = vpop.permute.xlu0 %4687 }
0x160e   :  { %v4690_v61 = vmul.f32 %v6558_v38, %v4688_v49 }
0x1613   :  { %v4968_v58 = vpop.f32.mrf.mxu1 }
0x1614   :  { %v4969_v42 = vadd.f32 %v4968_v58, %v4891_v6 }
0x1615   :  { %v6329_v46 = vpop.f32.mrf.mxu1 }
0x1616   :  { %v4979_v33 = vadd.f32 %v8006_v34, %v4969_v42 }
0x1618   :  { %v5541_v13 = vmul.f32 -1.442695, %v4979_v33  ;;  %4987 = vrot.lane.b32.xlu0 %v4979_v33, %s6624_s21 }
0x161a   :  { %6559 = vpow2.f32 %v5541_v13 }
0x1627   :  { %v6560_v54 = vpop.eup %6559 }
0x1628   :  { %v4983_v14 = vadd.f32 1.0, %v6560_v54 }
0x162a   :  { %6561 = vrcp.f32 %v4983_v14 }
0x162f   :  { %v4698_v9 = vpop.permute.xlu1 %4697 }
0x1630   :  { %v8046_v24 = vadd.f32 %v4698_v9, %v4690_v61 }
0x1632   :  { %6563 = vtanh.f32 %v8046_v24 }
0x1637   :  { %v6562_v34 = vpop.eup %6561 }
0x1638   :  { %v4995_v53 = vmul.f32 %v6562_v34, %v4993_v23 }
0x163a   :  { %4997 = vrot.lane.b32.xlu1 %v4995_v53, %s6625_s22 }
0x163f   :  { %v6564_v28 = vpop.eup %6563 }
0x1640   :  { %5003 = vrot.lane.b32.xlu0 %v6564_v28, %s6625_s22 }
0x168a   :  { %v4988_v11 = vpop.permute.xlu0 %4987 }
0x168b   :  { %v4990_v18 = vmul.f32 %v6562_v34, %v4988_v11 }
0x16ac   :  { %v4998_v21 = vpop.permute.xlu1 %4997 }
0x16ad   :  { %v5000_v52 = vadd.f32 %v4998_v21, %v4990_v18 }
0x16af   :  { %6565 = vtanh.f32 %v5000_v52 }
0x16b2   :  { %v5004_v41 = vpop.permute.xlu0 %5003 }
0x16b3   :  { %5006 = vst.msk [vmem:[#allocation2 + $0xe] sm:$0x3] %vm791_vm6, %v5004_v41 }
0x16ba   :  { %v5009_v30 = vld [vmem:[#allocation2 + $0x8] sm:$0xff] }
0x16bc   :  { %v6566_v50 = vpop.eup %6565 }
0x16bd   :  { %5007 = vst.msk [vmem:[#allocation2] sm:$0x3] %vm793_vm7, %v6566_v50 }
0x16c4   :  { %v5008_v7 = vld [vmem:[#allocation2] sm:$0xff] }
0x16c5   :  { %6346 = vmatprep.mubr.msk.f32.mxu0 %vm5025_vm8, %v5008_v7 }
0x16c6   :  { %6347 = vmatmul.mubr.msk.f32.vlgmr.msra.gmra.mxu0 %vm5025_vm8, %v5009_v30 }
0x16c7   :  { %6350 = vmatpush3.msra.mxu0 %v5108_v3 }
0x16c8   :  { %6351 = vmatprep.subr.mxu0 %v5107_v62 }
0x16c9   :  { %6352 = vmatpush3.msra.mxu0 %v5107_v62 }
0x1786   :  { %v6348_v48 = vpop.f32.mrf.mxu0 }
0x1787   :  { %v5104_v44 = vadd.f32 %v6348_v48, %v5542_v22 }
0x1788   :  { %v5098_v32 = vpop.f32.mrf.mxu0 }
0x1789   :  { %v5099_v0 = vadd.f32 %v5542_v22, %v5098_v32 }
0x178b   :  { %6353 = vmatprep.mubr.msk.f32.mxu0 %vm5116_vm9, %v5099_v0 }
0x178c   :  { %6354 = vmatmul.mubr.msk.f32.vlgmr.msra.gmra.mxu0 %vm5116_vm9, %v5104_v44 }
0x184c   :  { %v6355_v10 = vpop.f32.mrf.mxu0 }
0x184d   :  { %v5195_v36 = vadd.f32 %v6355_v10, %v5545_v43 }
0x184e   :  { %v5189_v29 = vpop.f32.mrf.mxu0 }
0x184f   :  { %v5190_v12 = vadd.f32 %v5545_v43, %v5189_v29  ;;  %v5202_v15 = vsel %vm5198_vm10, %v5195_v36, -inf }
0x1850   :  { %5203 = vmax.xlane.f32.xlu0 %v5202_v15 }
0x1851   :  { %v5199_v51 = vsel %vm5198_vm10, %v5190_v12, -inf }
0x1852   :  { %5200 = vmax.xlane.f32.xlu1 %v5199_v51 }
0x18d9   :  { %v5204_v57 = vpop.xlane.xlu0 %5203 }
0x18da   :  { %v5206_v59 = vsub.f32 %v5195_v36, %v5204_v57 }
0x18db   :  { %v5201_v27 = vpop.xlane.xlu1 %5200 }
0x18dc   :  { %v5209_v2 = vmul.f32 1.442695, %v5206_v59  ;;  %v5205_v63 = vsub.f32 %v5190_v12, %v5201_v27 }
0x18de   :  { %6567 = vpow2.f32 %v5209_v2  ;;  %v5207_v60 = vmul.f32 1.442695, %v5205_v63 }
0x18e0   :  { %6569 = vpow2.f32 %v5207_v60 }
0x18eb   :  { %v6568_v45 = vpop.eup %6567 }
0x18ec   :  { %v5214_v56 = vsel %vm5198_vm10, %v6568_v45, 0.0 }
0x18ed   :  { %v6570_v25 = vpop.eup %6569  ;;  %5215 = vadd.xlane.f32.xlu1 %v5214_v56 }
0x18ee   :  { %v5211_v8 = vsel %vm5198_vm10, %v6570_v25, 0.0 }
0x18ef   :  { %5212 = vadd.xlane.f32.xlu0 %v5211_v8 }
0x18fe   :  { %5231 = vrot.lane.b32.xlu1 %v8046_v24, %s6625_s22 }
0x1902   :  { %5237 = vrot.lane.b32.xlu1 %v5000_v52, %s6625_s22 }
0x1905   :  { %5224 = vrot.lane.b32.xlu0 %v8014_v40, %s6625_s22 }
0x1976   :  { %v5216_v31 = vpop.xlane.xlu1 %5215 }
0x1977   :  { %6571 = vrcp.f32 %v5216_v31 }
0x1978   :  { %v5213_v47 = vpop.xlane.xlu0 %5212 }
0x1979   :  { %6573 = vrcp.f32 %v5213_v47 }
0x197a   :  { %v5232_v55 = vpop.permute.xlu1 %5231 }
0x197b   :  { %5235 = vst.msk [vmem:[#allocation3 + $0x2] sm:$0x3] %vm791_vm6, %v5232_v55 }
0x197c   :  { %v5225_v38 = vpop.permute.xlu0 %5224 }
0x197d   :  { %5228 = vst.msk [vmem:[#allocation3 - $0x6] sm:$0xc0] %vm5227_vm11, %v5225_v38 }
0x197e   :  { %v5238_v5 = vpop.permute.xlu1 %5237 }
0x197f   :  { %6587 = shalt.err (!%p6584_p4)
}
0x1980   :  { %s6628_s22 = smov 2   ;;  %5241 = vst.msk [vmem:[#allocation5 + $0x2] sm:$0x3] %vm791_vm6, %v5238_v5  ;;  %s6596_s6 = scalar_lea.vmem %s5262_s29, 64 }
0x1981   :  { %5255 = dma.vmem_to_hbm [thread:$0]  %s5250_s12, 64, %s8133_s15, [#allocation4], %s6624_s21, %s6624_s21, %s6628_s22  }
0x1982   :  { %p6597_p5 = scmp.ne.s32.totalorder %s5262_s29, %s6596_s6  ;;  %p6601_p6 = scmp.lt.s32.totalorder %s5262_s29, %s5262_s29 }
0x1983   :  { %p6602_p7 = scmp.lt.s32.totalorder %s6596_s6, %s6596_s6 }
0x1985   :  { %p6603_p8 = por %p6602_p7, %p6601_p6 }
0x1987   :  { %p6604_p9 = pnand %p6603_p8, %p6597_p5 }
0x1989   :  { %6607 = shalt.err (!%p6604_p9)
}
0x198a   :  { %5267 = dma.vmem_to_hbm [thread:$0]  %s5262_s29, 64, %s8134_s16, [#allocation6], %s6624_s21, %s6624_s21, %s6628_s22   ;;  %v6572_v40 = vpop.eup %6571 }
0x198b   :  { %v5220_v39 = vmul.f32 %v6572_v40, %v6568_v45  ;;  %v6574_v6 = vpop.eup %6573 }
0x198c   :  { %v5219_v35 = vmul.f32 %v6574_v6, %v6570_v25 }
0x198d   :  { %5222 = vst.msk [vmem:[%s8132_s14 + $0x8] sm:$0xff] %vm5198_vm10, %v5220_v39 }
0x198e   :  { %5221 = vst.msk [vmem:[%s8132_s14] sm:$0xff] %vm5198_vm10, %v5219_v35 }
0x198f   :  { %6616 = dma.done.wait [#allocation4], 64  }
0x1990   :  { %6617 = vsyncadd [#allocation4], 4294967232 }
0x1991   :  { %6618 = dma.done.wait [#allocation6], 64  }
0x1992   :  { %6619 = vsyncadd [#allocation6], 4294967232 }
0x1993   :  { %5276 = vsyncpa [#allocation4], 1 }
0x1994   :  { %5277 = vsyncpa [#allocation6], 1 }

</bundles_post_ra>
